<compile_context>
chip_gen: v6e
topology: v6e:2x2x1
jax: 0.10.0
libtpu: 0.0.40
codegen_flags: <defaults>
</compile_context>

<pallas_src>
import math
import functools

import jax
import jax.numpy as jnp
from jax.experimental import pallas as pl
from jax.experimental.pallas import tpu as pltpu


def cross_attention_kernel(x_ref, we_ref,
                           wq_ref, bq_ref,
                           wkv_ref, bkv_ref,
                           wp_ref, bp_ref,
                           o_ref, *, n_head):
    """One block of Bb batch elements per grid step.

    Flattened Q / fused-KV projections, per-head batched softmax attention over
    the word embeddings, concat heads, output projection.
    """
    Bb, T, C = x_ref.shape
    _, N, _ = we_ref.shape
    hd = C // n_head
    cdt = x_ref.dtype                       # MXU operand dtype (bf16-ready)

    # Flatten batch into the M dimension (leading-dim collapse: free).
    x2 = x_ref[...].reshape(Bb * T, C)      # (Bb*T, C)
    we2 = we_ref[...].reshape(Bb * N, C)    # (Bb*N, C)

    # Projections. Weights are pre-transposed (in, out); the 1/sqrt(hd) scale
    # is already folded into wq/bq; K and V weights are fused into (C, 2C).
    q = jnp.dot(x2, wq_ref[...], preferred_element_type=jnp.float32) + bq_ref[...]      # (Bb*T, C)
    kv = jnp.dot(we2, wkv_ref[...], preferred_element_type=jnp.float32) + bkv_ref[...]  # (Bb*N, 2C)

    q3 = q.reshape(Bb, T, C).astype(cdt)            # (Bb, T, C)
    k3 = kv[:, :C].reshape(Bb, N, C).astype(cdt)    # (Bb, N, C)
    v3 = kv[:, C:].reshape(Bb, N, C).astype(cdt)    # (Bb, N, C)

    # Per-head attention, batched over the Bb batch elements in one einsum.
    y_heads = []
    for h in range(n_head):
        qh = q3[:, :, h * hd:(h + 1) * hd]          # (Bb, T, hd)
        kh = k3[:, :, h * hd:(h + 1) * hd]          # (Bb, N, hd)
        vh = v3[:, :, h * hd:(h + 1) * hd]          # (Bb, N, hd)

        att = jnp.einsum('bqd,bkd->bqk', qh, kh,
                         preferred_element_type=jnp.float32)          # (Bb, T, N), f32
        att = att - jnp.max(att, axis=-1, keepdims=True)
        p = jnp.exp(att)                                              # EUP
        # Normalise after the P@V matmul: (p/l)@v == (p@v)/l; fewer VPU muls
        # (T*hd instead of T*N) and the reciprocal runs on the idle EUP slot.
        inv = pl.reciprocal(jnp.sum(p, axis=-1, keepdims=True), approx=True)  # (Bb, T, 1)
        yh = jnp.einsum('bqk,bkd->bqd', p.astype(cdt), vh,
                        preferred_element_type=jnp.float32)           # (Bb, T, hd), f32
        y_heads.append(yh * inv)

    y = jnp.concatenate(y_heads, axis=-1)           # (Bb, T, C), f32

    # Output projection on the flattened block.
    y2 = y.reshape(Bb * T, C).astype(cdt)
    out = jnp.dot(y2, wp_ref[...], preferred_element_type=jnp.float32) + bp_ref[...]
    o_ref[...] = out.reshape(Bb, T, C).astype(o_ref.dtype)


def prepare_params(params, n_head, dtype=None):
    """One-time parameter prep: fuse K|V weights, fold attention scale into Q."""
    C = params["wq"].shape[0]
    hd = C // n_head
    scale = 1.0 / math.sqrt(hd)
    pp = {
        "wq": params["wq"] * scale,
        "bq": params["bq"] * scale,
        "wkv": jnp.concatenate([params["wk"], params["wv"]], axis=1),   # (C, 2C)
        "bkv": jnp.concatenate([params["bk"], params["bv"]], axis=1),   # (1, 2C)
        "wp": params["wp"],
        "bp": params["bp"],
    }
    if dtype is not None:
        pp = {k: v.astype(dtype) for k, v in pp.items()}
    return pp


def cross_attention(x, word_emb, prepared, n_head, *, batch_block=None):
    """x: (B, T, C), word_emb: (B, N, C). `prepared` from prepare_params()."""
    B, T, C = x.shape
    _, N, _ = word_emb.shape
    assert C % n_head == 0

    if batch_block is None:
        # Batch several elements per grid step, but keep >=2 grid steps so both
        # v7x TensorCores get work (dimension_semantics = parallel).
        batch_block = max(1, B // 2)
    Bb = batch_block
    assert B % Bb == 0

    kernel = functools.partial(cross_attention_kernel, n_head=n_head)

    return pl.pallas_call(
        kernel,
        out_shape=jax.ShapeDtypeStruct((B, T, C), x.dtype),
        grid=(B // Bb,),
        in_specs=[
            pl.BlockSpec((Bb, T, C), lambda b: (b, 0, 0)),       # x
            pl.BlockSpec((Bb, N, C), lambda b: (b, 0, 0)),       # word_emb
            pl.BlockSpec((C, C), lambda b: (0, 0)),              # wq (scaled)
            pl.BlockSpec((1, C), lambda b: (0, 0)),              # bq (scaled)
            pl.BlockSpec((C, 2 * C), lambda b: (0, 0)),          # wkv (fused)
            pl.BlockSpec((1, 2 * C), lambda b: (0, 0)),          # bkv (fused)
            pl.BlockSpec((C, C), lambda b: (0, 0)),              # wp
            pl.BlockSpec((1, C), lambda b: (0, 0)),              # bp
        ],
        out_specs=pl.BlockSpec((Bb, T, C), lambda b: (b, 0, 0)),
        compiler_params=pltpu.CompilerParams(dimension_semantics=("parallel",)),
    )(x, word_emb,
      prepared["wq"], prepared["bq"],
      prepared["wkv"], prepared["bkv"],
      prepared["wp"], prepared["bp"])


def cross_attention_ref(x, word_emb, params, n_head):
    """Pure-JAX reference mirroring the PyTorch forward (eval mode, no mask)."""
    B, T, C = x.shape
    _, N, _ = word_emb.shape
    hd = C // n_head

    q = x @ params["wq"] + params["bq"]
    k = word_emb @ params["wk"] + params["bk"]
    v = word_emb @ params["wv"] + params["bv"]

    q = q.reshape(B, T, n_head, hd).transpose(0, 2, 1, 3)   # (B, H, T, hd)
    k = k.reshape(B, N, n_head, hd).transpose(0, 2, 1, 3)   # (B, H, N, hd)
    v = v.reshape(B, N, n_head, hd).transpose(0, 2, 1, 3)   # (B, H, N, hd)

    att = (q @ jnp.swapaxes(k, -2, -1)) * (1.0 / math.sqrt(hd))
    att = jax.nn.softmax(att, axis=-1)
    y = att @ v                                              # (B, H, T, hd)
    y = y.transpose(0, 2, 1, 3).reshape(B, T, C)
    return y @ params["wp"] + params["bp"]


def init_params(key, embed_dim):
    """Deterministic synthetic parameters. Stored pre-transposed: (in, out)."""
    keys = jax.random.split(key, 8)
    p = {}
    names = ["q", "k", "v", "p"]
    for i, name in enumerate(names):
        w = jax.random.normal(keys[2 * i], (embed_dim, embed_dim), jnp.float32) * 0.02
        b = jax.random.normal(keys[2 * i + 1], (1, embed_dim), jnp.float32) * 0.01
        p["w" + name] = w
        p["b" + name] = b
    return p


if __name__ == "__main__":
    # Small shapes consistent with the module (embed_dim % 8 == 0), chosen
    # lane-dense: C = 128 so every last dim presented to the kernel is a
    # multiple of 128.  B=8 with Bb=4 -> grid of 2 parallel steps.
    B, T, N = 8, 16, 8        # T == block_size; N = number of word tokens
    C = 128                   # embed_dim
    n_head = 8                # head_dim = 16

    key = jax.random.PRNGKey(0)
    k_x, k_w, k_p = jax.random.split(key, 3)
    x = jax.random.normal(k_x, (B, T, C), jnp.float32)
    word_emb = jax.random.normal(k_w, (B, N, C), jnp.float32)
    params = init_params(k_p, C)

    ref = cross_attention_ref(x, word_emb, params, n_head)

    # f32 path (tight correctness check; tolerance allows approx-reciprocal).
    pp = prepare_params(params, n_head)
    out = cross_attention(x, word_emb, pp, n_head)
    out = jax.block_until_ready(out)
    assert out.shape == (B, T, C)
    assert jnp.allclose(out, ref, atol=2e-3, rtol=2e-3), "f32 mismatch vs reference"

    # bf16 path (native MXU dtype on v6e/v7x) — loose check for bf16 rounding.
    pp_bf16 = prepare_params(params, n_head, dtype=jnp.bfloat16)
    out_bf16 = cross_attention(x.astype(jnp.bfloat16),
                               word_emb.astype(jnp.bfloat16),
                               pp_bf16, n_head)
    out_bf16 = jax.block_until_ready(out_bf16)
    assert out_bf16.shape == (B, T, C)
    assert jnp.allclose(out_bf16.astype(jnp.float32), ref, atol=3e-2, rtol=3e-2), \
        "bf16 mismatch vs reference"

    print("KERNEL_OK")
</pallas_src>

<mosaic_0001>
module attributes {stable_mosaic.version = 11 : i64} {
  func.func @cross_attention_kernel(%arg0: i32, %arg1: memref<4x16x128xf32, #tpu.memory_space<vmem>>, %arg2: memref<4x8x128xf32, #tpu.memory_space<vmem>>, %arg3: memref<128x128xf32, #tpu.memory_space<vmem>>, %arg4: memref<1x128xf32, #tpu.memory_space<vmem>>, %arg5: memref<128x256xf32, #tpu.memory_space<vmem>>, %arg6: memref<1x256xf32, #tpu.memory_space<vmem>>, %arg7: memref<128x128xf32, #tpu.memory_space<vmem>>, %arg8: memref<1x128xf32, #tpu.memory_space<vmem>>, %arg9: memref<4x16x128xf32, #tpu.memory_space<vmem>>) attributes {dimension_semantics = [#tpu.dimension_semantics<parallel>], iteration_bounds = array<i64: 2>, scalar_prefetch = 0 : i64, scratch_operands = 0 : i64, tpu.core_type = #tpu.core_type<tc>, window_params = [{transform_indices = @transform_0, window_bounds = array<i64: 4, 16, 128>}, {transform_indices = @transform_1, window_bounds = array<i64: 4, 8, 128>}, {pipeline_mode = #tpu.pipeline_mode<synchronous>, transform_indices = @transform_2, window_bounds = array<i64: 128, 128>}, {pipeline_mode = #tpu.pipeline_mode<synchronous>, transform_indices = @transform_3, window_bounds = array<i64: 1, 128>}, {pipeline_mode = #tpu.pipeline_mode<synchronous>, transform_indices = @transform_4, window_bounds = array<i64: 128, 256>}, {pipeline_mode = #tpu.pipeline_mode<synchronous>, transform_indices = @transform_5, window_bounds = array<i64: 1, 256>}, {pipeline_mode = #tpu.pipeline_mode<synchronous>, transform_indices = @transform_6, window_bounds = array<i64: 128, 128>}, {pipeline_mode = #tpu.pipeline_mode<synchronous>, transform_indices = @transform_7, window_bounds = array<i64: 1, 128>}, {transform_indices = @transform_8, window_bounds = array<i64: 4, 16, 128>}]} {
    %c0 = arith.constant 0 : index
    %c0_0 = arith.constant 0 : index
    %c0_1 = arith.constant 0 : index
    %0 = vector.load %arg1[%c0, %c0_0, %c0_1] : memref<4x16x128xf32, #tpu.memory_space<vmem>>, vector<4x16x128xf32>
    %1 = vector.shape_cast %0 : vector<4x16x128xf32> to vector<64x128xf32>
    %c0_2 = arith.constant 0 : index
    %c0_3 = arith.constant 0 : index
    %c0_4 = arith.constant 0 : index
    %2 = vector.load %arg2[%c0_2, %c0_3, %c0_4] : memref<4x8x128xf32, #tpu.memory_space<vmem>>, vector<4x8x128xf32>
    %3 = vector.shape_cast %2 : vector<4x8x128xf32> to vector<32x128xf32>
    %c0_5 = arith.constant 0 : index
    %c0_6 = arith.constant 0 : index
    %4 = vector.load %arg3[%c0_5, %c0_6] : memref<128x128xf32, #tpu.memory_space<vmem>>, vector<128x128xf32>
    %cst = arith.constant dense<0.000000e+00> : vector<64x128xf32>
    %5 = tpu.matmul %1, %4, %cst {dimension_numbers = #tpu.dot_dimension_numbers<[1], [0], [0], [1], [0, 0, 1, 1], [], []>} : vector<64x128xf32>, vector<128x128xf32>, vector<64x128xf32> -> vector<64x128xf32>
    %c0_7 = arith.constant 0 : index
    %c0_8 = arith.constant 0 : index
    %6 = vector.load %arg4[%c0_7, %c0_8] : memref<1x128xf32, #tpu.memory_space<vmem>>, vector<1x128xf32>
    %7 = vector.broadcast %6 : vector<1x128xf32> to vector<64x128xf32>
    %8 = arith.addf %5, %7 : vector<64x128xf32>
    %c0_9 = arith.constant 0 : index
    %c0_10 = arith.constant 0 : index
    %9 = vector.load %arg5[%c0_9, %c0_10] : memref<128x256xf32, #tpu.memory_space<vmem>>, vector<128x256xf32>
    %cst_11 = arith.constant dense<0.000000e+00> : vector<32x256xf32>
    %10 = tpu.matmul %3, %9, %cst_11 {dimension_numbers = #tpu.dot_dimension_numbers<[1], [0], [0], [1], [0, 0, 1, 1], [], []>} : vector<32x128xf32>, vector<128x256xf32>, vector<32x256xf32> -> vector<32x256xf32>
    %c0_12 = arith.constant 0 : index
    %c0_13 = arith.constant 0 : index
    %11 = vector.load %arg6[%c0_12, %c0_13] : memref<1x256xf32, #tpu.memory_space<vmem>>, vector<1x256xf32>
    %12 = vector.broadcast %11 : vector<1x256xf32> to vector<32x256xf32>
    %13 = arith.addf %10, %12 : vector<32x256xf32>
    %14 = vector.shape_cast %8 : vector<64x128xf32> to vector<4x16x128xf32>
    %15 = vector.extract_strided_slice %13 {offsets = [0, 0], sizes = [32, 128], strides = [1, 1]} : vector<32x256xf32> to vector<32x128xf32>
    %16 = vector.shape_cast %15 : vector<32x128xf32> to vector<4x8x128xf32>
    %17 = vector.extract_strided_slice %13 {offsets = [0, 128], sizes = [32, 128], strides = [1, 1]} : vector<32x256xf32> to vector<32x128xf32>
    %18 = vector.shape_cast %17 : vector<32x128xf32> to vector<4x8x128xf32>
    %19 = vector.extract_strided_slice %14 {offsets = [0, 0, 0], sizes = [4, 16, 16], strides = [1, 1, 1]} : vector<4x16x128xf32> to vector<4x16x16xf32>
    %20 = vector.extract_strided_slice %16 {offsets = [0, 0, 0], sizes = [4, 8, 16], strides = [1, 1, 1]} : vector<4x8x128xf32> to vector<4x8x16xf32>
    %21 = vector.extract_strided_slice %18 {offsets = [0, 0, 0], sizes = [4, 8, 16], strides = [1, 1, 1]} : vector<4x8x128xf32> to vector<4x8x16xf32>
    "tpu.trace_start"() <{level = 10 : i32, message = "bqd,bkd->bqk"}> : () -> ()
    %cst_14 = arith.constant dense<0.000000e+00> : vector<4x16x8xf32>
    %22 = tpu.matmul %19, %20, %cst_14 {dimension_numbers = #tpu.dot_dimension_numbers<[2], [2], [1], [1], [0, 0, 0, 1, 1, 1], [0], [0]>} : vector<4x16x16xf32>, vector<4x8x16xf32>, vector<4x16x8xf32> -> vector<4x16x8xf32>
    "tpu.trace_stop"() : () -> ()
    %cst_15 = arith.constant dense<0xFF800000> : vector<4x16xf32>
    %23 = vector.multi_reduction <maximumf>, %22, %cst_15 [2] : vector<4x16x8xf32> to vector<4x16xf32>
    %24 = vector.shape_cast %23 : vector<4x16xf32> to vector<4x16x1xf32>
    %25 = vector.broadcast %24 : vector<4x16x1xf32> to vector<4x16x8xf32>
    %26 = arith.subf %22, %25 : vector<4x16x8xf32>
    %27 = math.exp %26 : vector<4x16x8xf32>
    %cst_16 = arith.constant dense<0.000000e+00> : vector<4x16xf32>
    %28 = vector.multi_reduction <add>, %27, %cst_16 [2] : vector<4x16x8xf32> to vector<4x16xf32>
    %29 = vector.shape_cast %28 : vector<4x16xf32> to vector<4x16x1xf32>
    %30 = tpu.reciprocal %29 {approx = true} : vector<4x16x1xf32> -> vector<4x16x1xf32>
    "tpu.trace_start"() <{level = 10 : i32, message = "bqk,bkd->bqd"}> : () -> ()
    %cst_17 = arith.constant dense<0.000000e+00> : vector<4x16x16xf32>
    %31 = tpu.matmul %27, %21, %cst_17 {dimension_numbers = #tpu.dot_dimension_numbers<[2], [1], [1], [2], [0, 0, 0, 1, 1, 2], [0], [0]>} : vector<4x16x8xf32>, vector<4x8x16xf32>, vector<4x16x16xf32> -> vector<4x16x16xf32>
    "tpu.trace_stop"() : () -> ()
    %32 = vector.broadcast %30 : vector<4x16x1xf32> to vector<4x16x16xf32>
    %33 = arith.mulf %31, %32 : vector<4x16x16xf32>
    %34 = vector.extract_strided_slice %14 {offsets = [0, 0, 16], sizes = [4, 16, 16], strides = [1, 1, 1]} : vector<4x16x128xf32> to vector<4x16x16xf32>
    %35 = vector.extract_strided_slice %16 {offsets = [0, 0, 16], sizes = [4, 8, 16], strides = [1, 1, 1]} : vector<4x8x128xf32> to vector<4x8x16xf32>
    %36 = vector.extract_strided_slice %18 {offsets = [0, 0, 16], sizes = [4, 8, 16], strides = [1, 1, 1]} : vector<4x8x128xf32> to vector<4x8x16xf32>
    "tpu.trace_start"() <{level = 10 : i32, message = "bqd,bkd->bqk"}> : () -> ()
    %cst_18 = arith.constant dense<0.000000e+00> : vector<4x16x8xf32>
    %37 = tpu.matmul %34, %35, %cst_18 {dimension_numbers = #tpu.dot_dimension_numbers<[2], [2], [1], [1], [0, 0, 0, 1, 1, 1], [0], [0]>} : vector<4x16x16xf32>, vector<4x8x16xf32>, vector<4x16x8xf32> -> vector<4x16x8xf32>
    "tpu.trace_stop"() : () -> ()
    %cst_19 = arith.constant dense<0xFF800000> : vector<4x16xf32>
    %38 = vector.multi_reduction <maximumf>, %37, %cst_19 [2] : vector<4x16x8xf32> to vector<4x16xf32>
    %39 = vector.shape_cast %38 : vector<4x16xf32> to vector<4x16x1xf32>
    %40 = vector.broadcast %39 : vector<4x16x1xf32> to vector<4x16x8xf32>
    %41 = arith.subf %37, %40 : vector<4x16x8xf32>
    %42 = math.exp %41 : vector<4x16x8xf32>
    %cst_20 = arith.constant dense<0.000000e+00> : vector<4x16xf32>
    %43 = vector.multi_reduction <add>, %42, %cst_20 [2] : vector<4x16x8xf32> to vector<4x16xf32>
    %44 = vector.shape_cast %43 : vector<4x16xf32> to vector<4x16x1xf32>
    %45 = tpu.reciprocal %44 {approx = true} : vector<4x16x1xf32> -> vector<4x16x1xf32>
    "tpu.trace_start"() <{level = 10 : i32, message = "bqk,bkd->bqd"}> : () -> ()
    %cst_21 = arith.constant dense<0.000000e+00> : vector<4x16x16xf32>
    %46 = tpu.matmul %42, %36, %cst_21 {dimension_numbers = #tpu.dot_dimension_numbers<[2], [1], [1], [2], [0, 0, 0, 1, 1, 2], [0], [0]>} : vector<4x16x8xf32>, vector<4x8x16xf32>, vector<4x16x16xf32> -> vector<4x16x16xf32>
    "tpu.trace_stop"() : () -> ()
    %47 = vector.broadcast %45 : vector<4x16x1xf32> to vector<4x16x16xf32>
    %48 = arith.mulf %46, %47 : vector<4x16x16xf32>
    %49 = vector.extract_strided_slice %14 {offsets = [0, 0, 32], sizes = [4, 16, 16], strides = [1, 1, 1]} : vector<4x16x128xf32> to vector<4x16x16xf32>
    %50 = vector.extract_strided_slice %16 {offsets = [0, 0, 32], sizes = [4, 8, 16], strides = [1, 1, 1]} : vector<4x8x128xf32> to vector<4x8x16xf32>
    %51 = vector.extract_strided_slice %18 {offsets = [0, 0, 32], sizes = [4, 8, 16], strides = [1, 1, 1]} : vector<4x8x128xf32> to vector<4x8x16xf32>
    "tpu.trace_start"() <{level = 10 : i32, message = "bqd,bkd->bqk"}> : () -> ()
    %cst_22 = arith.constant dense<0.000000e+00> : vector<4x16x8xf32>
    %52 = tpu.matmul %49, %50, %cst_22 {dimension_numbers = #tpu.dot_dimension_numbers<[2], [2], [1], [1], [0, 0, 0, 1, 1, 1], [0], [0]>} : vector<4x16x16xf32>, vector<4x8x16xf32>, vector<4x16x8xf32> -> vector<4x16x8xf32>
    "tpu.trace_stop"() : () -> ()
    %cst_23 = arith.constant dense<0xFF800000> : vector<4x16xf32>
    %53 = vector.multi_reduction <maximumf>, %52, %cst_23 [2] : vector<4x16x8xf32> to vector<4x16xf32>
    %54 = vector.shape_cast %53 : vector<4x16xf32> to vector<4x16x1xf32>
    %55 = vector.broadcast %54 : vector<4x16x1xf32> to vector<4x16x8xf32>
    %56 = arith.subf %52, %55 : vector<4x16x8xf32>
    %57 = math.exp %56 : vector<4x16x8xf32>
    %cst_24 = arith.constant dense<0.000000e+00> : vector<4x16xf32>
    %58 = vector.multi_reduction <add>, %57, %cst_24 [2] : vector<4x16x8xf32> to vector<4x16xf32>
    %59 = vector.shape_cast %58 : vector<4x16xf32> to vector<4x16x1xf32>
    %60 = tpu.reciprocal %59 {approx = true} : vector<4x16x1xf32> -> vector<4x16x1xf32>
    "tpu.trace_start"() <{level = 10 : i32, message = "bqk,bkd->bqd"}> : () -> ()
    %cst_25 = arith.constant dense<0.000000e+00> : vector<4x16x16xf32>
    %61 = tpu.matmul %57, %51, %cst_25 {dimension_numbers = #tpu.dot_dimension_numbers<[2], [1], [1], [2], [0, 0, 0, 1, 1, 2], [0], [0]>} : vector<4x16x8xf32>, vector<4x8x16xf32>, vector<4x16x16xf32> -> vector<4x16x16xf32>
    "tpu.trace_stop"() : () -> ()
    %62 = vector.broadcast %60 : vector<4x16x1xf32> to vector<4x16x16xf32>
    %63 = arith.mulf %61, %62 : vector<4x16x16xf32>
    %64 = vector.extract_strided_slice %14 {offsets = [0, 0, 48], sizes = [4, 16, 16], strides = [1, 1, 1]} : vector<4x16x128xf32> to vector<4x16x16xf32>
    %65 = vector.extract_strided_slice %16 {offsets = [0, 0, 48], sizes = [4, 8, 16], strides = [1, 1, 1]} : vector<4x8x128xf32> to vector<4x8x16xf32>
    %66 = vector.extract_strided_slice %18 {offsets = [0, 0, 48], sizes = [4, 8, 16], strides = [1, 1, 1]} : vector<4x8x128xf32> to vector<4x8x16xf32>
    "tpu.trace_start"() <{level = 10 : i32, message = "bqd,bkd->bqk"}> : () -> ()
    %cst_26 = arith.constant dense<0.000000e+00> : vector<4x16x8xf32>
    %67 = tpu.matmul %64, %65, %cst_26 {dimension_numbers = #tpu.dot_dimension_numbers<[2], [2], [1], [1], [0, 0, 0, 1, 1, 1], [0], [0]>} : vector<4x16x16xf32>, vector<4x8x16xf32>, vector<4x16x8xf32> -> vector<4x16x8xf32>
    "tpu.trace_stop"() : () -> ()
    %cst_27 = arith.constant dense<0xFF800000> : vector<4x16xf32>
    %68 = vector.multi_reduction <maximumf>, %67, %cst_27 [2] : vector<4x16x8xf32> to vector<4x16xf32>
    %69 = vector.shape_cast %68 : vector<4x16xf32> to vector<4x16x1xf32>
    %70 = vector.broadcast %69 : vector<4x16x1xf32> to vector<4x16x8xf32>
    %71 = arith.subf %67, %70 : vector<4x16x8xf32>
    %72 = math.exp %71 : vector<4x16x8xf32>
    %cst_28 = arith.constant dense<0.000000e+00> : vector<4x16xf32>
    %73 = vector.multi_reduction <add>, %72, %cst_28 [2] : vector<4x16x8xf32> to vector<4x16xf32>
    %74 = vector.shape_cast %73 : vector<4x16xf32> to vector<4x16x1xf32>
    %75 = tpu.reciprocal %74 {approx = true} : vector<4x16x1xf32> -> vector<4x16x1xf32>
    "tpu.trace_start"() <{level = 10 : i32, message = "bqk,bkd->bqd"}> : () -> ()
    %cst_29 = arith.constant dense<0.000000e+00> : vector<4x16x16xf32>
    %76 = tpu.matmul %72, %66, %cst_29 {dimension_numbers = #tpu.dot_dimension_numbers<[2], [1], [1], [2], [0, 0, 0, 1, 1, 2], [0], [0]>} : vector<4x16x8xf32>, vector<4x8x16xf32>, vector<4x16x16xf32> -> vector<4x16x16xf32>
    "tpu.trace_stop"() : () -> ()
    %77 = vector.broadcast %75 : vector<4x16x1xf32> to vector<4x16x16xf32>
    %78 = arith.mulf %76, %77 : vector<4x16x16xf32>
    %79 = vector.extract_strided_slice %14 {offsets = [0, 0, 64], sizes = [4, 16, 16], strides = [1, 1, 1]} : vector<4x16x128xf32> to vector<4x16x16xf32>
    %80 = vector.extract_strided_slice %16 {offsets = [0, 0, 64], sizes = [4, 8, 16], strides = [1, 1, 1]} : vector<4x8x128xf32> to vector<4x8x16xf32>
    %81 = vector.extract_strided_slice %18 {offsets = [0, 0, 64], sizes = [4, 8, 16], strides = [1, 1, 1]} : vector<4x8x128xf32> to vector<4x8x16xf32>
    "tpu.trace_start"() <{level = 10 : i32, message = "bqd,bkd->bqk"}> : () -> ()
    %cst_30 = arith.constant dense<0.000000e+00> : vector<4x16x8xf32>
    %82 = tpu.matmul %79, %80, %cst_30 {dimension_numbers = #tpu.dot_dimension_numbers<[2], [2], [1], [1], [0, 0, 0, 1, 1, 1], [0], [0]>} : vector<4x16x16xf32>, vector<4x8x16xf32>, vector<4x16x8xf32> -> vector<4x16x8xf32>
    "tpu.trace_stop"() : () -> ()
    %cst_31 = arith.constant dense<0xFF800000> : vector<4x16xf32>
    %83 = vector.multi_reduction <maximumf>, %82, %cst_31 [2] : vector<4x16x8xf32> to vector<4x16xf32>
    %84 = vector.shape_cast %83 : vector<4x16xf32> to vector<4x16x1xf32>
    %85 = vector.broadcast %84 : vector<4x16x1xf32> to vector<4x16x8xf32>
    %86 = arith.subf %82, %85 : vector<4x16x8xf32>
    %87 = math.exp %86 : vector<4x16x8xf32>
    %cst_32 = arith.constant dense<0.000000e+00> : vector<4x16xf32>
    %88 = vector.multi_reduction <add>, %87, %cst_32 [2] : vector<4x16x8xf32> to vector<4x16xf32>
    %89 = vector.shape_cast %88 : vector<4x16xf32> to vector<4x16x1xf32>
    %90 = tpu.reciprocal %89 {approx = true} : vector<4x16x1xf32> -> vector<4x16x1xf32>
    "tpu.trace_start"() <{level = 10 : i32, message = "bqk,bkd->bqd"}> : () -> ()
    %cst_33 = arith.constant dense<0.000000e+00> : vector<4x16x16xf32>
    %91 = tpu.matmul %87, %81, %cst_33 {dimension_numbers = #tpu.dot_dimension_numbers<[2], [1], [1], [2], [0, 0, 0, 1, 1, 2], [0], [0]>} : vector<4x16x8xf32>, vector<4x8x16xf32>, vector<4x16x16xf32> -> vector<4x16x16xf32>
    "tpu.trace_stop"() : () -> ()
    %92 = vector.broadcast %90 : vector<4x16x1xf32> to vector<4x16x16xf32>
    %93 = arith.mulf %91, %92 : vector<4x16x16xf32>
    %94 = vector.extract_strided_slice %14 {offsets = [0, 0, 80], sizes = [4, 16, 16], strides = [1, 1, 1]} : vector<4x16x128xf32> to vector<4x16x16xf32>
    %95 = vector.extract_strided_slice %16 {offsets = [0, 0, 80], sizes = [4, 8, 16], strides = [1, 1, 1]} : vector<4x8x128xf32> to vector<4x8x16xf32>
    %96 = vector.extract_strided_slice %18 {offsets = [0, 0, 80], sizes = [4, 8, 16], strides = [1, 1, 1]} : vector<4x8x128xf32> to vector<4x8x16xf32>
    "tpu.trace_start"() <{level = 10 : i32, message = "bqd,bkd->bqk"}> : () -> ()
    %cst_34 = arith.constant dense<0.000000e+00> : vector<4x16x8xf32>
    %97 = tpu.matmul %94, %95, %cst_34 {dimension_numbers = #tpu.dot_dimension_numbers<[2], [2], [1], [1], [0, 0, 0, 1, 1, 1], [0], [0]>} : vector<4x16x16xf32>, vector<4x8x16xf32>, vector<4x16x8xf32> -> vector<4x16x8xf32>
    "tpu.trace_stop"() : () -> ()
    %cst_35 = arith.constant dense<0xFF800000> : vector<4x16xf32>
    %98 = vector.multi_reduction <maximumf>, %97, %cst_35 [2] : vector<4x16x8xf32> to vector<4x16xf32>
    %99 = vector.shape_cast %98 : vector<4x16xf32> to vector<4x16x1xf32>
    %100 = vector.broadcast %99 : vector<4x16x1xf32> to vector<4x16x8xf32>
    %101 = arith.subf %97, %100 : vector<4x16x8xf32>
    %102 = math.exp %101 : vector<4x16x8xf32>
    %cst_36 = arith.constant dense<0.000000e+00> : vector<4x16xf32>
    %103 = vector.multi_reduction <add>, %102, %cst_36 [2] : vector<4x16x8xf32> to vector<4x16xf32>
    %104 = vector.shape_cast %103 : vector<4x16xf32> to vector<4x16x1xf32>
    %105 = tpu.reciprocal %104 {approx = true} : vector<4x16x1xf32> -> vector<4x16x1xf32>
    "tpu.trace_start"() <{level = 10 : i32, message = "bqk,bkd->bqd"}> : () -> ()
    %cst_37 = arith.constant dense<0.000000e+00> : vector<4x16x16xf32>
    %106 = tpu.matmul %102, %96, %cst_37 {dimension_numbers = #tpu.dot_dimension_numbers<[2], [1], [1], [2], [0, 0, 0, 1, 1, 2], [0], [0]>} : vector<4x16x8xf32>, vector<4x8x16xf32>, vector<4x16x16xf32> -> vector<4x16x16xf32>
    "tpu.trace_stop"() : () -> ()
    %107 = vector.broadcast %105 : vector<4x16x1xf32> to vector<4x16x16xf32>
    %108 = arith.mulf %106, %107 : vector<4x16x16xf32>
    %109 = vector.extract_strided_slice %14 {offsets = [0, 0, 96], sizes = [4, 16, 16], strides = [1, 1, 1]} : vector<4x16x128xf32> to vector<4x16x16xf32>
    %110 = vector.extract_strided_slice %16 {offsets = [0, 0, 96], sizes = [4, 8, 16], strides = [1, 1, 1]} : vector<4x8x128xf32> to vector<4x8x16xf32>
    %111 = vector.extract_strided_slice %18 {offsets = [0, 0, 96], sizes = [4, 8, 16], strides = [1, 1, 1]} : vector<4x8x128xf32> to vector<4x8x16xf32>
    "tpu.trace_start"() <{level = 10 : i32, message = "bqd,bkd->bqk"}> : () -> ()
    %cst_38 = arith.constant dense<0.000000e+00> : vector<4x16x8xf32>
    %112 = tpu.matmul %109, %110, %cst_38 {dimension_numbers = #tpu.dot_dimension_numbers<[2], [2], [1], [1], [0, 0, 0, 1, 1, 1], [0], [0]>} : vector<4x16x16xf32>, vector<4x8x16xf32>, vector<4x16x8xf32> -> vector<4x16x8xf32>
    "tpu.trace_stop"() : () -> ()
    %cst_39 = arith.constant dense<0xFF800000> : vector<4x16xf32>
    %113 = vector.multi_reduction <maximumf>, %112, %cst_39 [2] : vector<4x16x8xf32> to vector<4x16xf32>
    %114 = vector.shape_cast %113 : vector<4x16xf32> to vector<4x16x1xf32>
    %115 = vector.broadcast %114 : vector<4x16x1xf32> to vector<4x16x8xf32>
    %116 = arith.subf %112, %115 : vector<4x16x8xf32>
    %117 = math.exp %116 : vector<4x16x8xf32>
    %cst_40 = arith.constant dense<0.000000e+00> : vector<4x16xf32>
    %118 = vector.multi_reduction <add>, %117, %cst_40 [2] : vector<4x16x8xf32> to vector<4x16xf32>
    %119 = vector.shape_cast %118 : vector<4x16xf32> to vector<4x16x1xf32>
    %120 = tpu.reciprocal %119 {approx = true} : vector<4x16x1xf32> -> vector<4x16x1xf32>
    "tpu.trace_start"() <{level = 10 : i32, message = "bqk,bkd->bqd"}> : () -> ()
    %cst_41 = arith.constant dense<0.000000e+00> : vector<4x16x16xf32>
    %121 = tpu.matmul %117, %111, %cst_41 {dimension_numbers = #tpu.dot_dimension_numbers<[2], [1], [1], [2], [0, 0, 0, 1, 1, 2], [0], [0]>} : vector<4x16x8xf32>, vector<4x8x16xf32>, vector<4x16x16xf32> -> vector<4x16x16xf32>
    "tpu.trace_stop"() : () -> ()
    %122 = vector.broadcast %120 : vector<4x16x1xf32> to vector<4x16x16xf32>
    %123 = arith.mulf %121, %122 : vector<4x16x16xf32>
    %124 = vector.extract_strided_slice %14 {offsets = [0, 0, 112], sizes = [4, 16, 16], strides = [1, 1, 1]} : vector<4x16x128xf32> to vector<4x16x16xf32>
    %125 = vector.extract_strided_slice %16 {offsets = [0, 0, 112], sizes = [4, 8, 16], strides = [1, 1, 1]} : vector<4x8x128xf32> to vector<4x8x16xf32>
    %126 = vector.extract_strided_slice %18 {offsets = [0, 0, 112], sizes = [4, 8, 16], strides = [1, 1, 1]} : vector<4x8x128xf32> to vector<4x8x16xf32>
    "tpu.trace_start"() <{level = 10 : i32, message = "bqd,bkd->bqk"}> : () -> ()
    %cst_42 = arith.constant dense<0.000000e+00> : vector<4x16x8xf32>
    %127 = tpu.matmul %124, %125, %cst_42 {dimension_numbers = #tpu.dot_dimension_numbers<[2], [2], [1], [1], [0, 0, 0, 1, 1, 1], [0], [0]>} : vector<4x16x16xf32>, vector<4x8x16xf32>, vector<4x16x8xf32> -> vector<4x16x8xf32>
    "tpu.trace_stop"() : () -> ()
    %cst_43 = arith.constant dense<0xFF800000> : vector<4x16xf32>
    %128 = vector.multi_reduction <maximumf>, %127, %cst_43 [2] : vector<4x16x8xf32> to vector<4x16xf32>
    %129 = vector.shape_cast %128 : vector<4x16xf32> to vector<4x16x1xf32>
    %130 = vector.broadcast %129 : vector<4x16x1xf32> to vector<4x16x8xf32>
    %131 = arith.subf %127, %130 : vector<4x16x8xf32>
    %132 = math.exp %131 : vector<4x16x8xf32>
    %cst_44 = arith.constant dense<0.000000e+00> : vector<4x16xf32>
    %133 = vector.multi_reduction <add>, %132, %cst_44 [2] : vector<4x16x8xf32> to vector<4x16xf32>
    %134 = vector.shape_cast %133 : vector<4x16xf32> to vector<4x16x1xf32>
    %135 = tpu.reciprocal %134 {approx = true} : vector<4x16x1xf32> -> vector<4x16x1xf32>
    "tpu.trace_start"() <{level = 10 : i32, message = "bqk,bkd->bqd"}> : () -> ()
    %cst_45 = arith.constant dense<0.000000e+00> : vector<4x16x16xf32>
    %136 = tpu.matmul %132, %126, %cst_45 {dimension_numbers = #tpu.dot_dimension_numbers<[2], [1], [1], [2], [0, 0, 0, 1, 1, 2], [0], [0]>} : vector<4x16x8xf32>, vector<4x8x16xf32>, vector<4x16x16xf32> -> vector<4x16x16xf32>
    "tpu.trace_stop"() : () -> ()
    %137 = vector.broadcast %135 : vector<4x16x1xf32> to vector<4x16x16xf32>
    %138 = arith.mulf %136, %137 : vector<4x16x16xf32>
    %139 = tpu.concatenate %33, %48, %63, %78, %93, %108, %123, %138 in 2 : vector<4x16x16xf32>, vector<4x16x16xf32>, vector<4x16x16xf32>, vector<4x16x16xf32>, vector<4x16x16xf32>, vector<4x16x16xf32>, vector<4x16x16xf32>, vector<4x16x16xf32> -> vector<4x16x128xf32>
    %140 = vector.shape_cast %139 : vector<4x16x128xf32> to vector<64x128xf32>
    %c0_46 = arith.constant 0 : index
    %c0_47 = arith.constant 0 : index
    %141 = vector.load %arg7[%c0_46, %c0_47] : memref<128x128xf32, #tpu.memory_space<vmem>>, vector<128x128xf32>
    %cst_48 = arith.constant dense<0.000000e+00> : vector<64x128xf32>
    %142 = tpu.matmul %140, %141, %cst_48 {dimension_numbers = #tpu.dot_dimension_numbers<[1], [0], [0], [1], [0, 0, 1, 1], [], []>} : vector<64x128xf32>, vector<128x128xf32>, vector<64x128xf32> -> vector<64x128xf32>
    %c0_49 = arith.constant 0 : index
    %c0_50 = arith.constant 0 : index
    %143 = vector.load %arg8[%c0_49, %c0_50] : memref<1x128xf32, #tpu.memory_space<vmem>>, vector<1x128xf32>
    %144 = vector.broadcast %143 : vector<1x128xf32> to vector<64x128xf32>
    %145 = arith.addf %142, %144 : vector<64x128xf32>
    %146 = vector.shape_cast %145 : vector<64x128xf32> to vector<4x16x128xf32>
    %c0_51 = arith.constant 0 : index
    %c0_52 = arith.constant 0 : index
    %c0_53 = arith.constant 0 : index
    %147 = vector.load %arg9[%c0_51, %c0_52, %c0_53] : memref<4x16x128xf32, #tpu.memory_space<vmem>>, vector<4x16x128xf32>
    tpu.vector_store %arg9[%c0_51, %c0_52, %c0_53], %146 {strides = array<i32>} : memref<4x16x128xf32, #tpu.memory_space<vmem>>, vector<4x16x128xf32>,
    return
  }
  func.func @transform_0(%arg0: i32) -> (i32, i32, i32) {
    %c0_i32 = arith.constant 0 : i32
    %c0_i32_0 = arith.constant 0 : i32
    %c0_i32_1 = arith.constant 0 : i32
    return %arg0, %c0_i32, %c0_i32_0 : i32, i32, i32
  }
  func.func @transform_1(%arg0: i32) -> (i32, i32, i32) {
    %c0_i32 = arith.constant 0 : i32
    %c0_i32_0 = arith.constant 0 : i32
    %c0_i32_1 = arith.constant 0 : i32
    return %arg0, %c0_i32, %c0_i32_0 : i32, i32, i32
  }
  func.func @transform_2(%arg0: i32) -> (i32, i32) {
    %c0_i32 = arith.constant 0 : i32
    %c0_i32_0 = arith.constant 0 : i32
    %c0_i32_1 = arith.constant 0 : i32
    return %c0_i32, %c0_i32_0 : i32, i32
  }
  func.func @transform_3(%arg0: i32) -> (i32, i32) {
    %c0_i32 = arith.constant 0 : i32
    %c0_i32_0 = arith.constant 0 : i32
    %c0_i32_1 = arith.constant 0 : i32
    return %c0_i32, %c0_i32_0 : i32, i32
  }
  func.func @transform_4(%arg0: i32) -> (i32, i32) {
    %c0_i32 = arith.constant 0 : i32
    %c0_i32_0 = arith.constant 0 : i32
    %c0_i32_1 = arith.constant 0 : i32
    return %c0_i32, %c0_i32_0 : i32, i32
  }
  func.func @transform_5(%arg0: i32) -> (i32, i32) {
    %c0_i32 = arith.constant 0 : i32
    %c0_i32_0 = arith.constant 0 : i32
    %c0_i32_1 = arith.constant 0 : i32
    return %c0_i32, %c0_i32_0 : i32, i32
  }
  func.func @transform_6(%arg0: i32) -> (i32, i32) {
    %c0_i32 = arith.constant 0 : i32
    %c0_i32_0 = arith.constant 0 : i32
    %c0_i32_1 = arith.constant 0 : i32
    return %c0_i32, %c0_i32_0 : i32, i32
  }
  func.func @transform_7(%arg0: i32) -> (i32, i32) {
    %c0_i32 = arith.constant 0 : i32
    %c0_i32_0 = arith.constant 0 : i32
    %c0_i32_1 = arith.constant 0 : i32
    return %c0_i32, %c0_i32_0 : i32, i32
  }
  func.func @transform_8(%arg0: i32) -> (i32, i32, i32) {
    %c0_i32 = arith.constant 0 : i32
    %c0_i32_0 = arith.constant 0 : i32
    %c0_i32_1 = arith.constant 0 : i32
    return %arg0, %c0_i32, %c0_i32_0 : i32, i32, i32
  }
}

</mosaic_0001>

<bundles_post_ra>
// kernel: tpu_custom_call.1
= control target key start
LH: loop header
LB: loop body
LE: loop exit
PB: predicated region body
PF: predicated region fallthrough
CT: control target
= control target key end

     0   :  { %s10665_s0 = inlined_call_operand.hbm [shape: f32[8,16,128], index: 0, kind: input, shape index: {}]   ;;  %s10666_s1 = inlined_call_operand.hbm [shape: f32[8,8,128], index: 1, kind: input, shape index: {}]   ;;  %s10667_s2 = inlined_call_operand.hbm [shape: f32[128,128], index: 2, kind: input, shape index: {}]   ;;  %s10668_s3 = inlined_call_operand.vmem [shape: f32[1,128], index: 3, kind: input, shape index: {}]   ;;  %s10669_s4 = inlined_call_operand.hbm [shape: f32[128,256], index: 4, kind: input, shape index: {}]   ;;  %s10670_s5 = inlined_call_operand.vmem [shape: f32[1,256], index: 5, kind: input, shape index: {}]   ;;  %s10671_s6 = inlined_call_operand.hbm [shape: f32[128,128], index: 6, kind: input, shape index: {}]   ;;  %s10672_s7 = inlined_call_operand.vmem [shape: f32[1,128], index: 7, kind: input, shape index: {}]   ;;  %s10673_s8 = inlined_call_operand.hbm [shape: f32[8,16,128], index: 8, kind: output, shape index: {}]  }
   0x1   :  { %10704 = sst [smem:[#allocation85_spill]] %s10665_s0 }
   0x2   :  { %10705 = sst [smem:[#allocation86_spill]] %s10667_s2 }
   0x3   :  { %10706 = sst [smem:[#allocation87_spill]] %s10669_s4 }
   0x4   :  { %10707 = sst [smem:[#allocation88_spill]] %s10671_s6 }
   0x5   :  { %13 = vsyncpa [#allocation3], 0 }
   0x6   :  { %15 = vsyncpa [#allocation3 + $0x1], 0 }
   0x7   :  { %16 = vsyncpa [#allocation6], 0 }
   0x8   :  { %18 = vsyncpa [#allocation6 + $0x1], 0 }
   0x9   :  { %19 = vsyncpa [#allocation9], 0 }
   0xa   :  { %20 = vsyncpa [#allocation4], 0 }
   0xb   :  { %22 = vsyncpa [#allocation4 + $0x1], 0  ;;  %s9013_s27 = smov 0   ;;  %s9015_s28 = smov 0  }
   0xc   :  { %s9017_s29 = smov 0   ;;  %s9019_s30 = smov 0  }
   0xd LB: > { %10708 = sst [smem:[#allocation17_spill]] %s8942_s29  ;;  %s9034_s9 = sadd.s32 4294967295, %s8946_s30   ;;  %s8946_s30 = sphi %s9019_s30, %s10868_s30   ;;  %s8942_s29 = sphi %s9017_s29, %s10865_s29   ;;  %s8938_s28 = sphi %s9015_s28, %s10867_s28   ;;  %s8934_s27 = sphi %s9013_s27, %s10866_s27  }
   0xe   : > { %s7403_s10 = sadd.s32 4294967294, %s8946_s30   ;;  %p48_p0 = scmp.ne.s32.totalorder %s8938_s28, %s8934_s27 }
   0xf   : > { %p10678_p1 = scmp.eq.s32.totalorder %s9034_s9, 0  ;;  %p224_p2 = scmp.eq.s32.totalorder %s9034_s9, 1 }
  0x10   : > { %p230_p3 = scmp.eq.s32.totalorder %s7403_s10, 1  ;;  %p7404_p5 = scmp.ge.s32.totalorder %s8946_s30, 1 }
  0x11   : > { %p9043_p4 = por %p10678_p1, %p48_p0  ;;  %p237_p7 = scmp.lt.s32.totalorder %s8946_s30, 3 }
  0x12   : > { %p9048_p6 = por %p230_p3, %p48_p0  ;;  %s8948_s14 = smov [#allocation7]  }
  0x13   : > { %s10709_s11 = scalar_select %p9043_p4, 1, 0 }
  0x14   : > { %s10710_s12 = scalar_select %p9048_p6, 1, 0 }
  0x15   : > { %p9053_p8 = pnand %p7404_p5, %p237_p7  ;;  %s249_s15 = sshll.u32 %s8948_s14, 4  ;;  %s250_s15 = int_to_ptr.vmem [resolvable:$true] %s249_s15 }
  0x16   : > { %s8949_s17 = smov [#allocation8]   ;;  %s8747_s19 = scalar_lea.vmem %s250_s15, 2048 }
  0x17   : > { %p8262_p9 = pneg %p9053_p8  ;;  %s265_s18 = sshll.u32 %s8949_s17, 4  ;;  %s266_s18 = int_to_ptr.vmem [resolvable:$true] %s265_s18 }
  0x18   : > { %p8748_p13 = scmp.ne.s32.totalorder %s250_s15, %s8747_s19  ;;  %p8755_p5 = scmp.lt.s32.totalorder %s250_s15, %s250_s15 }
  0x19   : > { %p9062_p11 = pnand %p8262_p9, %p10678_p1  ;;  %p8756_p7 = scmp.lt.s32.totalorder %s8747_s19, %s8747_s19 }
  0x1b   : > { %p8738_p12 = pneg %p9062_p11  ;;  %p8757_p10 = por %p8756_p7, %p8755_p5 }
  0x1d   : > { %p8750_p0 = pnand %p8748_p13, %p8738_p12 }
  0x1f   : > { %p8751_p3 = pneg %p8750_p0 }
  0x21   : > { %p8758_p9 = pnand %p8757_p10, %p8751_p3 }
  0x23   : > { %8761 = shalt.err (!%p8758_p9)
}
  0x24   : > { %s10674_s20 = smov 128   ;;  %s10676_s21 = smov 8  }
  0x25   : > { %s10713_s2 = sld [smem:[#allocation86_spill]]  ;;  %s8773_s24 = scalar_lea.vmem %s266_s18, 4096 }
  0x26   : > { %p8774_p13 = scmp.ne.s32.totalorder %s266_s18, %s8773_s24  ;;  %p8781_p10 = scmp.lt.s32.totalorder %s266_s18, %s266_s18 }
  0x27   : > { %p8782_p3 = scmp.lt.s32.totalorder %s8773_s24, %s8773_s24 }
  0x28   : > { %p8776_p0 = pnand %p8774_p13, %p8738_p12 }
  0x29   : > { %p8783_p7 = por %p8782_p3, %p8781_p10 }
  0x2a   : > { %p8777_p5 = pneg %p8776_p0 }
  0x2b   : > { %8265 = dma.hbm_to_vmem [thread:$0]  (!%p9062_p11), %s10713_s2, 2048, %s250_s15, [#allocation6], %s10674_s20, %s10674_s20, %s10676_s21  }
  0x2c   : > { %p8784_p9 = pnand %p8783_p7, %p8777_p5 }
  0x2e   : > { %8787 = shalt.err (!%p8784_p9)
}
  0x2f   : > { %s8952_s25 = smov 256   ;;  %s8953_s26 = smov 16  }
  0x30   : > { %s10714_s4 = sld [smem:[#allocation87_spill]]  ;;  %s8954_s15 = smov [#allocation10]  }
  0x31   : > { %s281_s17 = sshll.u32 %s8954_s15, 4  ;;  %s9088_s19 = sadd.s32 1, %s8946_s30   ;;  %s282_s17 = int_to_ptr.vmem [resolvable:$true] %s281_s17 }
  0x32   : > { %s8799_s22 = scalar_lea.vmem %s282_s17, 2048  ;;  %p8807_p10 = scmp.lt.s32.totalorder %s282_s17, %s282_s17 }
  0x33   : > { %p8800_p13 = scmp.ne.s32.totalorder %s282_s17, %s8799_s22  ;;  %p8808_p3 = scmp.lt.s32.totalorder %s8799_s22, %s8799_s22 }
  0x35   : > { %p8802_p0 = pnand %p8800_p13, %p8738_p12  ;;  %p8809_p7 = por %p8808_p3, %p8807_p10 }
  0x36   : > { %8268 = dma.hbm_to_vmem [thread:$0]  (!%p9062_p11), %s10714_s4, 4096, %s266_s18, [#allocation9], %s8952_s25, %s8952_s25, %s8953_s26  }
  0x37   : > { %p8803_p5 = pneg %p8802_p0 }
  0x39   : > { %p8810_p9 = pnand %p8809_p7, %p8803_p5 }
  0x3b   : > { %8813 = shalt.err (!%p8810_p9)
}
  0x3c   : > { %s10715_s6 = sld [smem:[#allocation88_spill]]  ;;  %s32_s24 = ssub.s32 %s8946_s30, %s9088_s19 }
  0x3d   : > { %s35_s16 = sadd.s32 1, %s8942_s29  ;;  %p33_p12 = scmp.eq.s32.totalorder %s32_s24, 0 }
  0x3e   : > { %p42_p13 = scmp.ne.s32.totalorder %s8942_s29, %s8938_s28  ;;  %p43_p0 = scmp.eq.s32.totalorder %s8946_s30, 0 }
  0x3f   : > { %p8286_p5 = scmp.lt.s32.totalorder %s8946_s30, 2  ;;  %s9118_s10 = sand.u32 1, %s8942_s29  }
  0x40   : > { %s9109_s25 = scalar_select %p33_p12, %s8942_s29, %s35_s16  }
  0x41   : > { %p44_p10 = por %p43_p0, %p42_p13  ;;  %p9113_p3 = por %p224_p2, %p42_p13 }
  0x42   : > { %8271 = dma.hbm_to_vmem [thread:$0]  (!%p9062_p11), %s10715_s6, 2048, %s282_s17, [#allocation9], %s10674_s20, %s10674_s20, %s10676_s21  }
  0x43   : > { %10716 = sst [smem:[#allocation18_spill]] %s9109_s25  ;;  %s7592_s14 = sshll.u32 %s8946_s30, 10 }
  0x44   : > { %s10717_s26 = scalar_select %p9113_p3, 1, 0 }
  0x45   : > { %s7409_s15 = sshll.u32 %s9118_s10, 6  ;;  %s10718_s0 = sld [smem:[#allocation85_spill]] }
  0x46   : > { %s302_s23 = scalar_lea.vmem [#allocation2], %s7409_s15  ;;  %p9127_p2 = pnand %p8286_p5, %p44_p10 }
  0x47   : > { %s310_s24 = sshll.u32 %s302_s23, 4  ;;  %s9131_s24 = int_to_ptr.vmem [resolvable:$true] %s310_s24 }
  0x48   : > { %p8816_p7 = pneg %p9127_p2 }
  0x4b   : > { %s9125_s18 = scalar_lea.hbm %s10718_s0, %s7592_s14  ;;  %s8819_s17 = scalar_lea.hbm %s10718_s0, 2048 }
  0x4c   : > { %s8814_s2 = scalar_lea.hbm %s9125_s18, 1024  ;;  %p8820_p13 = scmp.lt.s32.totalorder %s9125_s18, %s10718_s0 }
  0x4d   : > { %p8815_p11 = scmp.ne.s32.totalorder %s9125_s18, %s8814_s2  ;;  %p8821_p0 = scmp.lt.s32.totalorder %s8819_s17, %s8814_s2 }
  0x4f   : > { %p8817_p9 = pnand %p8816_p7, %p8815_p11  ;;  %p8822_p5 = por %p8821_p0, %p8820_p13 }
  0x51   : > { %p8818_p12 = pneg %p8817_p9 }
  0x53   : > { %p8823_p10 = pnand %p8822_p5, %p8818_p12 }
  0x55   : > { %8826 = shalt.err (!%p8823_p10)
}
  0x56   : > { %s8827_s20 = scalar_lea.vmem %s9131_s24, 1024  ;;  %s8955_s14 = smov [#allocation2]  }
  0x57   : > { %p8828_p1 = scmp.ne.s32.totalorder %s9131_s24, %s8827_s20  ;;  %s8832_s15 = sshll.u32 %s8955_s14, 4  ;;  %s8833_s15 = int_to_ptr.vmem [resolvable:$false] %s8832_s15 }
  0x58   : > { %s8834_s21 = scalar_lea.vmem %s8833_s15, 2048  ;;  %p8835_p6 = scmp.lt.s32.totalorder %s9131_s24, %s8833_s15 }
  0x59   : > { %p8830_p11 = pnand %p8828_p1, %p8816_p7  ;;  %p8836_p3 = scmp.lt.s32.totalorder %s8834_s21, %s8827_s20 }
  0x5b   : > { %p8831_p9 = pneg %p8830_p11  ;;  %p8837_p4 = por %p8836_p3, %p8835_p6 }
  0x5d   : > { %p8838_p13 = pnand %p8837_p4, %p8831_p9 }
  0x5f   : > { %8841 = shalt.err (!%p8838_p13)
}
  0x60   : > { %s10720_s2 = smov 8   ;;  %s10721_s17 = smov 128  }
  0x61   : > { %s10722_s22 = scalar_lea.sflag [#allocation3], %s9118_s10  ;;  %s7413_s23 = sshll.u32 %s9118_s10, 5 }
  0x62   : > { %8275 = dma.hbm_to_vmem [thread:$0]  (!%p9127_p2), %s9125_s18, 1024, %s9131_s24, %s10722_s22, %s10721_s17, %s10721_s17, %s10720_s2  }
  0x63   : > { %s7593_s14 = sshll.u32 %s8946_s30, 9  ;;  %s324_s0 = scalar_lea.vmem [#allocation5], %s7413_s23 }
  0x64   : > { %s9169_s15 = scalar_lea.hbm %s10666_s1, %s7593_s14  ;;  %s331_s4 = sshll.u32 %s324_s0, 4  ;;  %s9171_s4 = int_to_ptr.vmem [resolvable:$true] %s331_s4 }
  0x65   : > { %s10723_s6 = sand.u32 1, %s8946_s30   ;;  %s8842_s29 = scalar_lea.hbm %s9169_s15, 512 }
  0x66   : > { %s321_s25 = scalar_lea.sflag [#allocation6], %s10723_s6  ;;  %p8843_p1 = scmp.ne.s32.totalorder %s9169_s15, %s8842_s29 }
  0x67   : > { %s8847_s24 = scalar_lea.hbm %s10666_s1, 1024  ;;  %p8848_p3 = scmp.lt.s32.totalorder %s9169_s15, %s10666_s1 }
  0x68   : > { %p8845_p4 = pnand %p8843_p1, %p8816_p7  ;;  %p8849_p12 = scmp.lt.s32.totalorder %s8847_s24, %s8842_s29 }
  0x6a   : > { %p8846_p6 = pneg %p8845_p4  ;;  %p8850_p0 = por %p8849_p12, %p8848_p3 }
  0x6c   : > { %p8851_p5 = pnand %p8850_p0, %p8846_p6 }
  0x6e   : > { %8854 = shalt.err (!%p8851_p5)
}
  0x6f   : > { %s8855_s0 = scalar_lea.vmem %s9171_s4, 512  ;;  %s8956_s6 = smov [#allocation5]  }
  0x70   : > { %p8856_p10 = scmp.ne.s32.totalorder %s9171_s4, %s8855_s0  ;;  %s8860_s23 = sshll.u32 %s8956_s6, 4  ;;  %s8861_s23 = int_to_ptr.vmem [resolvable:$false] %s8860_s23 }
  0x71   : > { %s8862_s20 = scalar_lea.vmem %s8861_s23, 1024  ;;  %p8863_p13 = scmp.lt.s32.totalorder %s9171_s4, %s8861_s23 }
  0x72   : > { %p8858_p11 = pnand %p8856_p10, %p8816_p7  ;;  %p8864_p1 = scmp.lt.s32.totalorder %s8862_s20, %s8855_s0 }
  0x74   : > { %p8859_p9 = pneg %p8858_p11  ;;  %p8865_p4 = por %p8864_p1, %p8863_p13 }
  0x76   : > { %p8866_p3 = pnand %p8865_p4, %p8859_p9 }
  0x78   : > { %8869 = shalt.err (!%p8866_p3)
}
  0x79   : > { %8278 = dma.hbm_to_vmem [thread:$0]  (!%p9127_p2), %s9169_s15, 512, %s9171_s4, %s321_s25, %s10721_s17, %s10721_s17, %s10720_s2  }
  0x7a   : > { %343 = sbr.rel (%p9053_p8) target bundleno = 3902 (0xf3e), region = 52 }
  0x7f   : > { %s9203_s29 = sand.u32 1, %s8938_s28   ;;  %p10724_p7 = scmp.ne.s32.totalorder %s10709_s11, 0 }
  0x80   : > { %s7417_s21 = sshll.u32 %s9203_s29, 6  ;;  %s346_s10 = scalar_lea.sflag [#allocation3], %s9203_s29 }
  0x81   : > { %s9209_s16 = scalar_lea.vmem [#allocation2], %s7417_s21 }
  0x82   : > { %8913 = dma.done.wait (%p10724_p7), %s346_s10, 1024  }
  0x83   : > { %8915 = vsyncadd (%p10724_p7), %s346_s10, 4294966272  ;;  %s354_s4 = sand.u32 1, %s9034_s9   ;;  %s7418_s13 = sshll.u32 %s9203_s29, 5 }
  0x84   : > { %s355_s25 = scalar_lea.sflag [#allocation6], %s354_s4  ;;  %s9217_s2 = scalar_lea.vmem [#allocation5], %s7418_s13 }
  0x85   : > { %8917 = dma.done.wait (%p10724_p7), %s355_s25, 512  }
  0x86   : > { %8919 = vsyncadd (%p10724_p7), %s355_s25, 4294966784  ;;  %p10725_p8 = scmp.eq.s32.totalorder %s9034_s9, 0 }
  0x88   : > { %8921 = dma.done.wait (%p10725_p8), [#allocation6], 2048   ;;  %p10726_p2 = pmov %p10725_p8 }
  0x8a   : > { %8923 = vsyncadd (%p10726_p2), [#allocation6], 4294965248  ;;  %p10727_p6 = pmov %p10726_p2 }
  0x8b   : > { %p10728_p12 = pmov %p10726_p2 }
  0x8c   : > { %8925 = dma.done.wait (%p10727_p6), [#allocation9], 6144  }
  0x8d   : > { %8927 = vsyncadd (%p10728_p12), [#allocation9], 4294961152  ;;  %v438_v0 = vld [vmem:[#allocation7 + $0x78] sm:$0xff]  ;;  %v437_v1 = vld [vmem:[#allocation7 + $0x70] sm:$0xff]  ;;  %v8957_v41 = vmov 0.0   ;;  %vm684_vm0 = vcmask 130048  }
  0x8e   : > { %7836 = vmatprep.subr.mxu1 %v438_v0  ;;  %v436_v2 = vld [vmem:[#allocation7 + $0x68] sm:$0xff]  ;;  %v435_v3 = vld [vmem:[#allocation7 + $0x60] sm:$0xff]  ;;  %v434_v5 = vld [vmem:[#allocation7 + $0x58] sm:$0xff]  ;;  %s8958_s15 = smov 112   ;;  %vm1021_vm1 = vcmask 64512   ;;  %s8959_s22 = smov 96  }
  0x8f   : > { %7837 = vmatpush3.msra.mxu1 %v438_v0  ;;  %v411_v4 = vld [vmem:[%s9209_s16] sm:$0xff]  ;;  %v433_v6 = vld [vmem:[#allocation7 + $0x50] sm:$0xff]  ;;  %v432_v7 = vld [vmem:[#allocation7 + $0x48] sm:$0xff]  ;;  %s8960_s14 = smov 80   ;;  %s8961_s0 = smov 64   ;;  %vm7074_vm2 = vcmask 261120  }
  0x90   : > { %7838 = vmatprep.subr.mxu1 %v437_v1  ;;  %7868 = vmatprep.mubr.f32.mxu1 %v411_v4  ;;  %v431_v8 = vld [vmem:[#allocation7 + $0x40] sm:$0xff]  ;;  %v430_v9 = vld [vmem:[#allocation7 + $0x38] sm:$0xff]  ;;  %v429_v10 = vld [vmem:[#allocation7 + $0x30] sm:$0xff]  ;;  %v585_v4 = vlaneseq  ;;  %s8962_s6 = smov 48   ;;  %s8963_s23 = smov 32   ;;  %vm7083_vm3 = vcmask 392192  }
  0x91   : > { %7839 = vmatpush3.msra.mxu1 %v437_v1  ;;  %v428_v11 = vld [vmem:[#allocation7 + $0x28] sm:$0xff]  ;;  %v427_v12 = vld [vmem:[#allocation7 + $0x20] sm:$0xff]  ;;  %v426_v13 = vld [vmem:[#allocation7 + $0x18] sm:$0xff]  ;;  %s8964_s20 = smov 16   ;;  %vm7092_vm4 = vcmask 523264   ;;  %vm7101_vm5 = vcmask 654336  }
  0x92   : > { %7840 = vmatprep.subr.mxu1 %v436_v2  ;;  %v425_v14 = vld [vmem:[#allocation7 + $0x10] sm:$0xff]  ;;  %v424_v15 = vld [vmem:[#allocation7 + $0x8] sm:$0xff]  ;;  %v423_v16 = vld [vmem:[#allocation7] sm:$0xff]  ;;  %vm7110_vm6 = vcmask 785408   ;;  %vm7119_vm7 = vcmask 916480   ;;  %s407_s4 = scalar_lea.vmem [#allocation11], %s7417_s21 }
  0x93   : > { %7841 = vmatpush3.msra.mxu1 %v436_v2  ;;  %v412_v17 = vld [vmem:[%s9209_s16 + $0x8] sm:$0xff]  ;;  %v582_v18 = vld [vmem:[#allocation8 + $0xf8] sm:$0xff]  ;;  %v581_v19 = vld [vmem:[#allocation8 + $0xf0] sm:$0xff]  ;;  %s7279_s13 = sshll.u32 %s407_s4, 4  ;;  %s7595_s25 = sshll.u32 %s9034_s9, 10  ;;  %s10617_s13 = int_to_ptr.vmem [resolvable:$true] %s7279_s13 }
  0x94   : > { %7842 = vmatprep.subr.mxu1 %v435_v3  ;;  %v413_v20 = vld [vmem:[%s9209_s16 + $0x10] sm:$0xff]  ;;  %v580_v21 = vld [vmem:[#allocation8 + $0xe8] sm:$0xff]  ;;  %v579_v22 = vld [vmem:[#allocation8 + $0xe0] sm:$0xff]  ;;  %s10622_s11 = scalar_lea.hbm %s10673_s8, %s7595_s25  ;;  %s7265_s17 = scalar_lea.sflag [#allocation4], %s9203_s29 }
  0x95   : > { %7843 = vmatpush3.msra.mxu1 %v435_v3  ;;  %v578_v23 = vld [vmem:[#allocation8 + $0xd8] sm:$0xff]  ;;  %v577_v25 = vld [vmem:[#allocation8 + $0xd0] sm:$0xff]  ;;  %v415_v26 = vld [vmem:[%s9209_s16 + $0x20] sm:$0xff]  ;;  %p10861_p5 = scmp.ne.s32.totalorder %s10717_s26, 0  ;;  %s8965_s9 = smov [#allocation11]  }
  0x96   : > { %7844 = vmatprep.subr.mxu1 %v434_v5  ;;  %v414_v24 = vld [vmem:[%s9209_s16 + $0x18] sm:$0xff]  ;;  %v576_v27 = vld [vmem:[#allocation8 + $0xc8] sm:$0xff]  ;;  %v575_v28 = vld [vmem:[#allocation8 + $0xc0] sm:$0xff]  ;;  %s8874_s18 = sshll.u32 %s8965_s9, 4  ;;  %s8875_s18 = int_to_ptr.vmem [resolvable:$false] %s8874_s18 }
  0x97   : > { %7845 = vmatpush3.msra.mxu1 %v434_v5  ;;  %v574_v29 = vld [vmem:[#allocation8 + $0xb8] sm:$0xff]  ;;  %v416_v30 = vld [vmem:[%s9209_s16 + $0x28] sm:$0xff]  ;;  %v573_v31 = vld [vmem:[#allocation8 + $0xb0] sm:$0xff]  ;;  %s8876_s24 = scalar_lea.vmem %s8875_s18, 2048  ;;  %p8877_p9 = scmp.lt.s32.totalorder %s10617_s13, %s8875_s18 }
  0x98   : > { %7846 = vmatprep.subr.mxu1 %v433_v6  ;;  %v417_v32 = vld [vmem:[%s9209_s16 + $0x30] sm:$0xff]  ;;  %v572_v33 = vld [vmem:[#allocation8 + $0xa8] sm:$0xff]  ;;  %v571_v34 = vld [vmem:[#allocation8 + $0xa0] sm:$0xff] }
  0x99   : > { %7847 = vmatpush3.msra.mxu1 %v433_v6  ;;  %v570_v35 = vld [vmem:[#allocation8 + $0x98] sm:$0xff]  ;;  %v569_v37 = vld [vmem:[#allocation8 + $0x90] sm:$0xff]  ;;  %v568_v38 = vld [vmem:[#allocation8 + $0x88] sm:$0xff]  ;;  %v586_v6 = vshrl.u32 %v585_v4, 7 }
  0x9a   : > { %7848 = vmatprep.subr.mxu1 %v432_v7  ;;  %v418_v36 = vld [vmem:[%s9209_s16 + $0x38] sm:$0xff]  ;;  %v567_v39 = vld [vmem:[#allocation8 + $0x80] sm:$0xff]  ;;  %v565_v42 = vld [vmem:[#allocation8 + $0x70] sm:$0xff] }
  0x9b   : > { %7849 = vmatpush3.msra.mxu1 %v432_v7  ;;  %v566_v40 = vld [vmem:[#allocation8 + $0x78] sm:$0xff]  ;;  %v564_v43 = vld [vmem:[#allocation8 + $0x68] sm:$0xff]  ;;  %v563_v44 = vld [vmem:[#allocation8 + $0x60] sm:$0xff] }
  0x9c   : > { %7850 = vmatprep.subr.mxu1 %v431_v8  ;;  %v562_v45 = vld [vmem:[#allocation8 + $0x58] sm:$0xff]  ;;  %v561_v46 = vld [vmem:[#allocation8 + $0x50] sm:$0xff]  ;;  %v560_v47 = vld [vmem:[#allocation8 + $0x48] sm:$0xff] }
  0x9d   : > { %7851 = vmatpush3.msra.mxu1 %v431_v8  ;;  %v559_v48 = vld [vmem:[#allocation8 + $0x40] sm:$0xff]  ;;  %v558_v49 = vld [vmem:[#allocation8 + $0x38] sm:$0xff]  ;;  %v557_v50 = vld [vmem:[#allocation8 + $0x30] sm:$0xff]  ;;  %v587_v8 = vsub.s32 0, %v586_v6 }
  0x9e   : > { %7852 = vmatprep.subr.mxu1 %v430_v9  ;;  %v556_v51 = vld [vmem:[#allocation8 + $0x28] sm:$0xff]  ;;  %v555_v52 = vld [vmem:[#allocation8 + $0x20] sm:$0xff]  ;;  %v554_v53 = vld [vmem:[#allocation8 + $0x18] sm:$0xff] }
  0x9f   : > { %7853 = vmatpush3.msra.mxu1 %v430_v9  ;;  %v553_v54 = vld [vmem:[#allocation8 + $0x10] sm:$0xff]  ;;  %v552_v55 = vld [vmem:[#allocation8 + $0x8] sm:$0xff]  ;;  %v551_v56 = vld [vmem:[#allocation8] sm:$0xff] }
  0xa0   : > { %7854 = vmatprep.subr.mxu1 %v429_v10  ;;  %v419_v57 = vld [vmem:[%s9217_s2] sm:$0xff]  ;;  %v420_v58 = vld [vmem:[%s9217_s2 + $0x8] sm:$0xff]  ;;  %v421_v59 = vld [vmem:[%s9217_s2 + $0x10] sm:$0xff] }
  0xa1   : > { %7855 = vmatpush3.msra.mxu1 %v429_v10  ;;  %v422_v60 = vld [vmem:[%s9217_s2 + $0x18] sm:$0xff]  ;;  %v7423_v62 = vld [vmem:[%s10668_s3] ss:$0 sm:$0xff] }
  0xa2   : > { %7856 = vmatprep.subr.mxu1 %v428_v11  ;;  %v583_v10 = vld [vmem:[%s10670_s5] sm:$0x3] }
  0xa3   : > { %7857 = vmatpush3.msra.mxu1 %v428_v11  ;;  %v588_v11 = vrot.slane %v583_v10, %v587_v8 }
  0xa4   : > { %7858 = vmatprep.subr.mxu1 %v427_v12 }
  0xa5   : > { %7859 = vmatpush3.msra.mxu1 %v427_v12 }
  0xa6   : > { %7860 = vmatprep.subr.mxu1 %v426_v13 }
  0xa7   : > { %7861 = vmatpush3.msra.mxu1 %v426_v13 }
  0xa8   : > { %7862 = vmatprep.subr.mxu1 %v425_v14 }
  0xa9   : > { %7863 = vmatpush3.msra.mxu1 %v425_v14 }
  0xaa   : > { %7864 = vmatprep.subr.mxu1 %v424_v15 }
  0xab   : > { %7865 = vmatpush3.msra.mxu1 %v424_v15 }
  0xac   : > { %7866 = vmatprep.subr.mxu1 %v423_v16 }
  0xad   : > { %7867 = vmatpush3.msra.mxu1 %v423_v16 }
  0xae   : > { %7869 = vmatmul.mubr.f32.vlgmr.msra.gmra.mxu1 %v412_v17  ;;  %595 = vmatprep.subr.mxu1 %v582_v18  ;;  %v591_v17 = vsub.s32 1, %v586_v6 }
  0xaf   : > { %596 = vmatpush1.msra.mxu1 %v581_v19  ;;  %7871 = vmatprep.mubr.f32.mxu1 %v413_v20 }
  0xb0   : > { %597 = vmatprep.subr.mxu1 %v580_v21 }
  0xb1   : > { %598 = vmatpush1.msra.mxu1 %v579_v22 }
  0xb2   : > { %599 = vmatprep.subr.mxu1 %v578_v23  ;;  %7872 = vmatmul.mubr.f32.gmra.mxu1 %v414_v24  ;;  %v9279_v23 = vrot.slane %v583_v10, %v591_v17 }
  0xb3   : > { %600 = vmatpush1.msra.mxu1 %v577_v25  ;;  %7874 = vmatprep.mubr.f32.mxu1 %v415_v26 }
  0xb4   : > { %601 = vmatprep.subr.mxu1 %v576_v27 }
  0xb5   : > { %602 = vmatpush1.msra.mxu1 %v575_v28 }
  0xb6   : > { %603 = vmatprep.subr.mxu1 %v574_v29  ;;  %7875 = vmatmul.mubr.f32.gmra.mxu1 %v416_v30 }
  0xb7   : > { %604 = vmatpush1.msra.mxu1 %v573_v31  ;;  %7877 = vmatprep.mubr.f32.mxu1 %v417_v32 }
  0xb8   : > { %605 = vmatprep.subr.mxu1 %v572_v33 }
  0xb9   : > { %606 = vmatpush1.msra.mxu1 %v571_v34 }
  0xba   : > { %607 = vmatprep.subr.mxu1 %v570_v35  ;;  %7878 = vmatmul.mubr.f32.gmra.mxu1 %v418_v36 }
  0xbb   : > { %608 = vmatpush1.msra.mxu1 %v569_v37  ;;  %659 = vmatprep.mubr.f32.mxu1 %v8957_v41 }
  0xbc   : > { %609 = vmatprep.subr.mxu1 %v568_v38 }
  0xbd   : > { %610 = vmatpush1.msra.mxu1 %v567_v39 }
  0xbe   : > { %611 = vmatprep.subr.mxu1 %v566_v40 }
  0xbf   : > { %612 = vmatpush1.msra.mxu1 %v565_v42 }
  0xc0   : > { %613 = vmatprep.subr.mxu1 %v564_v43 }
  0xc1   : > { %614 = vmatpush1.msra.mxu1 %v563_v44 }
  0xc2   : > { %615 = vmatprep.subr.mxu1 %v562_v45 }
  0xc3   : > { %616 = vmatpush1.msra.mxu1 %v561_v46 }
  0xc4   : > { %617 = vmatprep.subr.mxu1 %v560_v47 }
  0xc5   : > { %618 = vmatpush1.msra.mxu1 %v559_v48 }
  0xc6   : > { %619 = vmatprep.subr.mxu1 %v558_v49 }
  0xc7   : > { %620 = vmatpush1.msra.mxu1 %v557_v50 }
  0xc8   : > { %621 = vmatprep.subr.mxu1 %v556_v51 }
  0xc9   : > { %622 = vmatpush1.msra.mxu1 %v555_v52 }
  0xca   : > { %623 = vmatprep.subr.mxu1 %v554_v53 }
  0xcb   : > { %624 = vmatpush1.msra.mxu1 %v553_v54 }
  0xcc   : > { %625 = vmatprep.subr.mxu1 %v552_v55 }
  0xcd   : > { %626 = vmatpush1.msra.mxu1 %v551_v56 }
  0xce   : > { %660 = vmatmul.mubr.f32.vlgmr.msra.gmra.mxu1 %v419_v57 }
  0xcf   : > { %665 = vmatprep.mubr.f32.mxu1 %v8957_v41 }
  0xd2   : > { %666 = vmatmul.mubr.f32.gmra.mxu1 %v420_v58 }
  0xd3   : > { %671 = vmatprep.mubr.f32.mxu1 %v8957_v41 }
  0xd6   : > { %672 = vmatmul.mubr.f32.gmra.mxu1 %v421_v59 }
  0xd7   : > { %677 = vmatprep.mubr.f32.mxu1 %v8957_v41 }
  0xda   : > { %678 = vmatmul.mubr.f32.gmra.mxu1 %v422_v60 }
 0x16e   : > { %v7870_v61 = vpop.f32.mrf.mxu1 }
 0x16f   : > { %v9252_v1 = vadd.f32 %v7870_v61, %v7423_v62 }
 0x170   : > { %v512_v63 = vpop.f32.mrf.mxu1 }
 0x171   : > { %v9246_v0 = vadd.f32 %v7423_v62, %v512_v63 }
 0x172   : > { %v7873_v2 = vpop.f32.mrf.mxu1 }
 0x173   : > { %1434 = vrot.lane.b32.xlu1 %v9246_v0, %s8958_s15  ;;  %7882 = vmatprep.mubr.msk.f32.mxu0 %vm684_vm0, %v9246_v0  ;;  %v9277_v22 = vadd.f32 %v7873_v2, %v7423_v62 }
 0x174   : > { %v522_v3 = vpop.f32.mrf.mxu1 }
 0x175   : > { %v9267_v19 = vadd.f32 %v7423_v62, %v522_v3 }
 0x176   : > { %v7876_v5 = vpop.f32.mrf.mxu1 }
 0x177   : > { %1436 = vrot.lane.b32.xlu1 %v9252_v1, %s8958_s15  ;;  %v9298_v29 = vadd.f32 %v7876_v5, %v7423_v62 }
 0x178   : > { %v532_v7 = vpop.f32.mrf.mxu1 }
 0x179   : > { %v9285_v25 = vadd.f32 %v7423_v62, %v532_v7 }
 0x17a   : > { %v7879_v9 = vpop.f32.mrf.mxu1 }
 0x17b   : > { %v9315_v33 = vadd.f32 %v7879_v9, %v7423_v62 }
 0x17c   : > { %v542_v12 = vpop.f32.mrf.mxu1 }
 0x17d   : > { %v9302_v31 = vadd.f32 %v7423_v62, %v542_v12 }
 0x18e   : > { %v661_v13 = vpop.f32.mrf.mxu1 }
 0x18f   : > { %v9259_v14 = vadd.f32 %v661_v13, %v588_v11 }
 0x190   : > { %v663_v15 = vpop.f32.mrf.mxu1 }
 0x191   : > { %7880 = vmatprep.subr.msk.mxu0 %vm684_vm0, %v9259_v14  ;;  %v9305_v32 = vadd.f32 %v663_v15, %v9279_v23 }
 0x192   : > { %v667_v16 = vpop.f32.mrf.mxu1  ;;  %7881 = vmatpush3.xpose.msk.msra.mxu0 %vm684_vm0, %v9259_v14 }
 0x193   : > { %v9265_v18 = vadd.f32 %v667_v16, %v588_v11 }
 0x194   : > { %v669_v20 = vpop.f32.mrf.mxu1 }
 0x195   : > { %7883 = vmatmul.mubr.msk.f32.vlgmr.msra.gmra.mxu0 %vm684_vm0, %v9252_v1  ;;  %7885 = vmatprep.subr.msk.mxu0 %vm684_vm0, %v9265_v18  ;;  %v9318_v34 = vadd.f32 %v669_v20, %v9279_v23 }
 0x196   : > { %v673_v21 = vpop.f32.mrf.mxu1  ;;  %7886 = vmatpush3.xpose.msk.msra.mxu0 %vm684_vm0, %v9265_v18  ;;  %7887 = vmatprep.mubr.msk.f32.mxu0 %vm684_vm0, %v9267_v19 }
 0x197   : > { %v9281_v24 = vadd.f32 %v673_v21, %v588_v11  ;;  %1525 = vrot.lane.b32.xlu1 %v9265_v18, %s8958_s15 }
 0x198   : > { %v675_v26 = vpop.f32.mrf.mxu1 }
 0x199   : > { %v9288_v27 = vadd.f32 %v675_v26, %v9279_v23  ;;  %7888 = vmatmul.mubr.msk.f32.vlgmr.msra.gmra.mxu0 %vm684_vm0, %v9277_v22  ;;  %7890 = vmatprep.subr.msk.mxu0 %vm684_vm0, %v9281_v24 }
 0x19a   : > { %v679_v28 = vpop.f32.mrf.mxu1  ;;  %7891 = vmatpush3.xpose.msk.msra.mxu0 %vm684_vm0, %v9281_v24  ;;  %7892 = vmatprep.mubr.msk.f32.mxu0 %vm684_vm0, %v9285_v25 }
 0x19b   : > { %v9300_v30 = vadd.f32 %v679_v28, %v588_v11 }
 0x19c   : > { %v681_v54 = vpop.f32.mrf.mxu1 }
 0x19d   : > { %7893 = vmatmul.mubr.msk.f32.vlgmr.msra.gmra.mxu0 %vm684_vm0, %v9298_v29  ;;  %7895 = vmatprep.subr.msk.mxu0 %vm684_vm0, %v9300_v30  ;;  %v9382_v55 = vadd.f32 %v681_v54, %v9279_v23 }
 0x19e   : > { %7896 = vmatpush3.xpose.msk.msra.mxu0 %vm684_vm0, %v9300_v30  ;;  %7897 = vmatprep.mubr.msk.f32.mxu0 %vm684_vm0, %v9302_v31 }
 0x19f   : > { %7900 = vmatprep.subr.mxu0 %v9305_v32 }
 0x1a1   : > { %7898 = vmatmul.mubr.msk.f32.vlgmr.msra.gmra.mxu0 %vm684_vm0, %v9315_v33 }
 0x1a2   : > { %7901 = vmatpush3.msra.mxu0 %v9305_v32 }
 0x1a3   : > { %7905 = vmatprep.subr.mxu0 %v9318_v34 }
 0x1e5   : > { %v9325_v35 = vpop.permute.xlu1 %1434 }
 0x1e9   : > { %v9327_v36 = vpop.permute.xlu1 %1436 }
 0x209   : > { %v1526_v37 = vpop.permute.xlu1 %1525 }
 0x20a   : > { %7925 = vmatprep.subr.msk.mxu1 %vm684_vm0, %v1526_v37 }
 0x20b   : > { %7926 = vmatpush3.xpose.msk.msra.mxu1 %vm684_vm0, %v1526_v37 }
 0x255   : > { %v7884_v38 = vpop.f32.mrf.mxu0 }
 0x256   : > { %v1025_v39 = vsel %vm1021_vm1, %v7884_v38, -inf }
 0x257   : > { %1026 = vmax.xlane.f32.xlu0 %v1025_v39  ;;  %v760_v40 = vpop.f32.mrf.mxu0 }
 0x258   : > { %v1022_v42 = vsel %vm1021_vm1, %v760_v40, -inf }
 0x259   : > { %v7889_v41 = vpop.f32.mrf.mxu0 }
 0x25a   : > { %v1031_v43 = vsel %vm1021_vm1, %v7889_v41, -inf }
 0x25b   : > { %1023 = vmax.xlane.f32.xlu0 %v1022_v42  ;;  %1032 = vmax.xlane.f32.xlu1 %v1031_v43  ;;  %v844_v44 = vpop.f32.mrf.mxu0 }
 0x25c   : > { %v1028_v46 = vsel %vm1021_vm1, %v844_v44, -inf }
 0x25d   : > { %v9334_v45 = vpop.f32.mrf.mxu0 }
 0x25e   : > { %v1037_v48 = vsel %vm1021_vm1, %v9334_v45, -inf }
 0x25f   : > { %1029 = vmax.xlane.f32.xlu1 %v1028_v46  ;;  %v9337_v47 = vpop.f32.mrf.mxu0 }
 0x260   : > { %v1034_v51 = vsel %vm1021_vm1, %v9337_v47, -inf }
 0x261   : > { %v9341_v49 = vpop.f32.mrf.mxu0 }
 0x262   : > { %v1043_v50 = vsel %vm1021_vm1, %v9341_v49, -inf }
 0x263   : > { %1038 = vmax.xlane.f32.xlu1 %v1037_v48  ;;  %v9361_v52 = vpop.f32.mrf.mxu0 }
 0x264   : > { %v1040_v53 = vsel %vm1021_vm1, %v9361_v52, -inf }
 0x267   : > { %1044 = vmax.xlane.f32.xlu1 %v1043_v50 }
 0x271   : > { %1438 = vrot.lane.b32.xlu0 %v9259_v14, %s8958_s15 }
 0x278   : > { %1521 = vrot.lane.b32.xlu1 %v9267_v19, %s8958_s15 }
 0x27c   : > { %1523 = vrot.lane.b32.xlu1 %v9277_v22, %s8958_s15 }
 0x280   : > { %1699 = vrot.lane.b32.xlu1 %v9300_v30, %s8958_s15 }
 0x284   : > { %1697 = vrot.lane.b32.xlu1 %v9315_v33, %s8958_s15 }
 0x288   : > { %1948 = vrot.lane.b32.xlu1 %v9318_v34, %s8958_s15 }
 0x28c   : > { %2033 = vrot.lane.b32.xlu1 %v9288_v27, %s8958_s15 }
 0x290   : > { %1035 = vmax.xlane.f32.xlu0 %v1034_v51  ;;  %2214 = vrot.lane.b32.xlu1 %v9259_v14, %s8959_s22 }
 0x294   : > { %2210 = vrot.lane.b32.xlu1 %v9246_v0, %s8959_s22  ;;  %1041 = vmax.xlane.f32.xlu0 %v1040_v53 }
 0x298   : > { %2301 = vrot.lane.b32.xlu1 %v9265_v18, %s8959_s22 }
 0x2aa   : > { %1612 = vrot.lane.b32.xlu0 %v9281_v24, %s8958_s15 }
 0x2ae   : > { %1608 = vrot.lane.b32.xlu0 %v9285_v25, %s8958_s15 }
 0x2b2   : > { %1610 = vrot.lane.b32.xlu0 %v9298_v29, %s8958_s15 }
 0x2b6   : > { %1695 = vrot.lane.b32.xlu0 %v9302_v31, %s8958_s15 }
 0x2ba   : > { %1863 = vrot.lane.b32.xlu0 %v9305_v32, %s8958_s15 }
 0x2be   : > { %2118 = vrot.lane.b32.xlu0 %v9382_v55, %s8958_s15 }
 0x2c2   : > { %2212 = vrot.lane.b32.xlu0 %v9252_v1, %s8959_s22 }
 0x2e0   : > { %v1027_v56 = vpop.xlane.xlu0 %1026 }
 0x2e1   : > { %v1047_v57 = vsub.f32 %v7884_v38, %v1027_v56 }
 0x2e3   : > { %v1056_v61 = vmul.f32 1.442695, %v1047_v57 }
 0x2e4   : > { %v1024_v58 = vpop.xlane.xlu0 %1023  ;;  %v1033_v59 = vpop.xlane.xlu1 %1032 }
 0x2e5   : > { %v1046_v60 = vsub.f32 %v760_v40, %v1024_v58  ;;  %v1049_v62 = vsub.f32 %v7889_v41, %v1033_v59 }
 0x2e7   : > { %v1054_v63 = vmul.f32 1.442695, %v1046_v60  ;;  %v1060_v4 = vmul.f32 1.442695, %v1049_v62 }
 0x2e8   : > { %v1030_v2 = vpop.xlane.xlu1 %1029  ;;  %v1439_v20 = vpop.permute.xlu0 %1438 }
 0x2e9   : > { %8480 = vpow2.f32 %v1054_v63  ;;  %v1048_v3 = vsub.f32 %v844_v44, %v1030_v2 }
 0x2ea   : > { %8482 = vpow2.f32 %v1056_v61 }
 0x2eb   : > { %v1058_v5 = vmul.f32 1.442695, %v1048_v3 }
 0x2ec   : > { %v1039_v6 = vpop.xlane.xlu1 %1038 }
 0x2ed   : > { %8484 = vpow2.f32 %v1058_v5  ;;  %v1051_v21 = vsub.f32 %v9334_v45, %v1039_v6 }
 0x2ee   : > { %8486 = vpow2.f32 %v1060_v4 }
 0x2ef   : > { %v1064_v28 = vmul.f32 1.442695, %v1051_v21 }
 0x2f0   : > { %v1045_v7 = vpop.xlane.xlu1 %1044 }
 0x2f1   : > { %v1053_v37 = vsub.f32 %v9341_v49, %v1045_v7 }
 0x2f3   : > { %v1068_v41 = vmul.f32 1.442695, %v1053_v37 }
 0x2f4   : > { %v1522_v8 = vpop.permute.xlu1 %1521 }
 0x2f5   : > { %7927 = vmatprep.mubr.msk.f32.mxu1 %vm684_vm0, %v1522_v8 }
 0x2f6   : > { %v9389_v9 = vpop.eup %8480 }
 0x2f7   : > { %10729 = vst [vmem:[#allocation19_spill] sm:$0xff] %v9389_v9  ;;  %v9391_v10 = vpop.eup %8482  ;;  %7902 = vmatprep.mubr.msk.f32.mxu0 %vm1021_vm1, %v9389_v9 }
 0x2f8   : > { %10730 = vst [vmem:[#allocation20_spill] sm:$0xff] %v9391_v10  ;;  %7903 = vmatmul.mubr.msk.f32.vlgmr.msra.gmra.mxu0 %vm1021_vm1, %v9391_v10  ;;  %v1524_v11 = vpop.permute.xlu1 %1523 }
 0x2f9   : > { %7906 = vmatpush3.msra.mxu0 %v9318_v34  ;;  %7928 = vmatmul.mubr.msk.f32.vlgmr.msra.gmra.mxu1 %vm684_vm0, %v1524_v11 }
 0x2fa   : > { %v9399_v12 = vpop.eup %8484  ;;  %7910 = vmatprep.subr.mxu0 %v9288_v27 }
 0x2fb   : > { %10731 = vst [vmem:[#allocation21_spill] sm:$0xff] %v9399_v12  ;;  %v9402_v13 = vpop.eup %8486  ;;  %7907 = vmatprep.mubr.msk.f32.mxu0 %vm1021_vm1, %v9399_v12 }
 0x2fc   : > { %10732 = vst [vmem:[#allocation22_spill] sm:$0xff] %v9402_v13  ;;  %7908 = vmatmul.mubr.msk.f32.vlgmr.msra.gmra.mxu0 %vm1021_vm1, %v9402_v13  ;;  %v1700_v15 = vpop.permute.xlu1 %1699 }
 0x2fd   : > { %7911 = vmatpush3.msra.mxu0 %v9288_v27  ;;  %7935 = vmatprep.subr.msk.mxu1 %vm684_vm0, %v1700_v15 }
 0x2fe   : > { %7915 = vmatprep.subr.mxu0 %v9382_v55  ;;  %7936 = vmatpush3.xpose.msk.msra.mxu1 %vm684_vm0, %v1700_v15 }
 0x300   : > { %v1698_v16 = vpop.permute.xlu1 %1697 }
 0x304   : > { %v1949_v17 = vpop.permute.xlu1 %1948 }
 0x305   : > { %7945 = vmatprep.subr.mxu1 %v1949_v17 }
 0x308   : > { %v9448_v53 = vpop.permute.xlu1 %2033 }
 0x319   : > { %v1036_v23 = vpop.xlane.xlu0 %1035 }
 0x31a   : > { %v1050_v26 = vsub.f32 %v9337_v47, %v1036_v23 }
 0x31c   : > { %v1062_v38 = vmul.f32 1.442695, %v1050_v26 }
 0x31d   : > { %v1042_v39 = vpop.xlane.xlu0 %1041 }
 0x31e   : > { %8488 = vpow2.f32 %v1062_v38  ;;  %v1052_v40 = vsub.f32 %v9361_v52, %v1042_v39 }
 0x31f   : > { %8490 = vpow2.f32 %v1064_v28 }
 0x320   : > { %v1066_v42 = vmul.f32 1.442695, %v1052_v40 }
 0x321   : > { %v1613_v43 = vpop.permute.xlu0 %1612 }
 0x322   : > { %8492 = vpow2.f32 %v1066_v42 }
 0x323   : > { %8494 = vpow2.f32 %v1068_v41  ;;  %v9509_v41 = vpop.permute.xlu1 %2214 }
 0x325   : > { %v1609_v44 = vpop.permute.xlu0 %1608 }
 0x327   : > { %v9511_v42 = vpop.permute.xlu1 %2210 }
 0x329   : > { %v1611_v46 = vpop.permute.xlu0 %1610 }
 0x32b   : > { %v9416_v45 = vpop.eup %8488 }
 0x32c   : > { %10733 = vst [vmem:[#allocation23_spill] sm:$0xff] %v9416_v45  ;;  %v9418_v48 = vpop.eup %8490  ;;  %7912 = vmatprep.mubr.msk.f32.mxu0 %vm1021_vm1, %v9416_v45 }
 0x32d   : > { %10734 = vst [vmem:[#allocation24_spill] sm:$0xff] %v9418_v48  ;;  %7913 = vmatmul.mubr.msk.f32.vlgmr.msra.gmra.mxu0 %vm1021_vm1, %v9418_v48  ;;  %v1696_v47 = vpop.permute.xlu0 %1695 }
 0x32e   : > { %7916 = vmatpush3.msra.mxu0 %v9382_v55  ;;  %7937 = vmatprep.mubr.msk.f32.mxu1 %vm684_vm0, %v1696_v47 }
 0x32f   : > { %v9426_v49 = vpop.eup %8492  ;;  %7920 = vmatprep.subr.msk.mxu0 %vm684_vm0, %v1439_v20  ;;  %7938 = vmatmul.mubr.msk.f32.vlgmr.msra.gmra.mxu1 %vm684_vm0, %v1698_v16 }
 0x330   : > { %10735 = vst [vmem:[#allocation25_spill] sm:$0xff] %v9426_v49  ;;  %v9430_v50 = vpop.eup %8494  ;;  %7946 = vmatpush3.msra.mxu1 %v1949_v17  ;;  %7917 = vmatprep.mubr.msk.f32.mxu0 %vm1021_vm1, %v9426_v49 }
 0x331   : > { %10736 = vst [vmem:[#allocation26_spill] sm:$0xff] %v9430_v50  ;;  %7918 = vmatmul.mubr.msk.f32.vlgmr.msra.gmra.mxu0 %vm1021_vm1, %v9430_v50  ;;  %v1864_v51 = vpop.permute.xlu0 %1863 }
 0x332   : > { %7921 = vmatpush3.xpose.msk.msra.mxu0 %vm684_vm0, %v1439_v20  ;;  %7922 = vmatprep.mubr.msk.f32.mxu0 %vm684_vm0, %v9325_v35 }
 0x333   : > { %7930 = vmatprep.subr.msk.mxu0 %vm684_vm0, %v1613_v43 }
 0x335   : > { %7923 = vmatmul.mubr.msk.f32.vlgmr.msra.gmra.mxu0 %vm684_vm0, %v9327_v36  ;;  %v9442_v52 = vpop.permute.xlu0 %2118 }
 0x336   : > { %7931 = vmatpush3.xpose.msk.msra.mxu0 %vm684_vm0, %v1613_v43  ;;  %7932 = vmatprep.mubr.msk.f32.mxu0 %vm684_vm0, %v1609_v44 }
 0x337   : > { %7940 = vmatprep.subr.mxu0 %v1864_v51  ;;  %7955 = vmatprep.subr.mxu1 %v9442_v52 }
 0x339   : > { %7933 = vmatmul.mubr.msk.f32.vlgmr.msra.gmra.mxu0 %vm684_vm0, %v1611_v46  ;;  %v9507_v23 = vpop.permute.xlu0 %2212  ;;  %v2302_v46 = vpop.permute.xlu1 %2301 }
 0x33a   : > { %7941 = vmatpush3.msra.mxu0 %v1864_v51 }
 0x33b   : > { %7950 = vmatprep.subr.mxu0 %v9448_v53 }
 0x3b8   : > { %v9453_v57 = vpop.f32.mrf.mxu0 }
 0x3b9   : > { %v7929_v35 = vpop.f32.mrf.mxu1  ;;  %10737 = vst [vmem:[#allocation27_spill] sm:$0xff] %v9453_v57 }
 0x3ba   : > { %v1791_v54 = vsel %vm1021_vm1, %v7929_v35, -inf  ;;  %v9455_v58 = vpop.f32.mrf.mxu0 }
 0x3bb   : > { %v1599_v36 = vpop.f32.mrf.mxu1  ;;  %1792 = vmax.xlane.f32.xlu0 %v1791_v54  ;;  %10738 = vst [vmem:[#allocation28_spill] sm:$0xff] %v9455_v58 }
 0x3bc   : > { %v1788_v56 = vsel %vm1021_vm1, %v1599_v36, -inf  ;;  %v9457_v59 = vpop.f32.mrf.mxu0 }
 0x3bd   : > { %10739 = vst [vmem:[#allocation29_spill] sm:$0xff] %v9457_v59 }
 0x3be   : > { %v9459_v60 = vpop.f32.mrf.mxu0 }
 0x3bf   : > { %1789 = vmax.xlane.f32.xlu0 %v1788_v56  ;;  %10740 = vst [vmem:[#allocation30_spill] sm:$0xff] %v9459_v60 }
 0x3ed   : > { %v9461_v61 = vpop.f32.mrf.mxu0 }
 0x3ee   : > { %10741 = vst [vmem:[#allocation31_spill] sm:$0xff] %v9461_v61 }
 0x3ef   : > { %v9463_v62 = vpop.f32.mrf.mxu0  ;;  %v7939_v63 = vpop.f32.mrf.mxu1 }
 0x3f0   : > { %10742 = vst [vmem:[#allocation32_spill] sm:$0xff] %v9463_v62  ;;  %v1803_v2 = vsel %vm1021_vm1, %v7939_v63, -inf }
 0x3f1   : > { %v9466_v3 = vpop.f32.mrf.mxu0  ;;  %1804 = vmax.xlane.f32.xlu1 %v1803_v2  ;;  %v1773_v4 = vpop.f32.mrf.mxu1 }
 0x3f2   : > { %10743 = vst [vmem:[#allocation33_spill] sm:$0xff] %v9466_v3  ;;  %v1800_v5 = vsel %vm1021_vm1, %v1773_v4, -inf }
 0x3f3   : > { %v9469_v6 = vpop.f32.mrf.mxu0  ;;  %1801 = vmax.xlane.f32.xlu0 %v1800_v5 }
 0x3f4   : > { %10744 = vst [vmem:[#allocation34_spill] sm:$0xff] %v9469_v6 }
 0x3f5   : > { %v7924_v7 = vpop.f32.mrf.mxu0 }
 0x3f6   : > { %v1785_v8 = vsel %vm1021_vm1, %v7924_v7, -inf }
 0x3f7   : > { %v1512_v11 = vpop.f32.mrf.mxu0  ;;  %1786 = vmax.xlane.f32.xlu1 %v1785_v8 }
 0x3f8   : > { %v1782_v15 = vsel %vm1021_vm1, %v1512_v11, -inf }
 0x3f9   : > { %v7934_v16 = vpop.f32.mrf.mxu0  ;;  %1783 = vmax.xlane.f32.xlu0 %v1782_v15 }
 0x3fa   : > { %v1797_v17 = vsel %vm1021_vm1, %v7934_v16, -inf }
 0x3fb   : > { %v1686_v20 = vpop.f32.mrf.mxu0  ;;  %1798 = vmax.xlane.f32.xlu1 %v1797_v17 }
 0x3fc   : > { %v1794_v21 = vsel %vm1021_vm1, %v1686_v20, -inf }
 0x3fd   : > { %1795 = vmax.xlane.f32.xlu0 %v1794_v21 }
 0x40c   : > { %2297 = vrot.lane.b32.xlu1 %v9267_v19, %s8959_s22 }
 0x410   : > { %2299 = vrot.lane.b32.xlu1 %v9277_v22, %s8959_s22 }
 0x413   : > { %2388 = vrot.lane.b32.xlu0 %v9281_v24, %s8959_s22 }
 0x414   : > { %2475 = vrot.lane.b32.xlu1 %v9300_v30, %s8959_s22 }
 0x417   : > { %2384 = vrot.lane.b32.xlu0 %v9285_v25, %s8959_s22 }
 0x418   : > { %2473 = vrot.lane.b32.xlu1 %v9315_v33, %s8959_s22 }
 0x41b   : > { %2386 = vrot.lane.b32.xlu0 %v9298_v29, %s8959_s22 }
 0x41c   : > { %2722 = vrot.lane.b32.xlu1 %v9318_v34, %s8959_s22 }
 0x41f   : > { %2471 = vrot.lane.b32.xlu0 %v9302_v31, %s8959_s22 }
 0x420   : > { %2806 = vrot.lane.b32.xlu1 %v9288_v27, %s8959_s22 }
 0x423   : > { %2638 = vrot.lane.b32.xlu0 %v9305_v32, %s8959_s22 }
 0x424   : > { %2986 = vrot.lane.b32.xlu1 %v9259_v14, %s8960_s14 }
 0x427   : > { %2890 = vrot.lane.b32.xlu0 %v9382_v55, %s8959_s22 }
 0x428   : > { %2982 = vrot.lane.b32.xlu1 %v9246_v0, %s8960_s14 }
 0x42b   : > { %2984 = vrot.lane.b32.xlu0 %v9252_v1, %s8960_s14 }
 0x42c   : > { %3073 = vrot.lane.b32.xlu1 %v9265_v18, %s8960_s14 }
 0x444   : > { %v1793_v26 = vpop.xlane.xlu0 %1792 }
 0x445   : > { %v1809_v28 = vsub.f32 %v7929_v35, %v1793_v26 }
 0x447   : > { %v1820_v39 = vmul.f32 1.442695, %v1809_v28 }
 0x448   : > { %v1790_v37 = vpop.xlane.xlu0 %1789 }
 0x449   : > { %v1808_v38 = vsub.f32 %v1599_v36, %v1790_v37 }
 0x44b   : > { %v1818_v40 = vmul.f32 1.442695, %v1808_v38 }
 0x44d   : > { %8496 = vpow2.f32 %v1818_v40 }
 0x44e   : > { %8498 = vpow2.f32 %v1820_v39 }
 0x45a   : > { %v9513_v43 = vpop.eup %8496 }
 0x45b   : > { %v9515_v44 = vpop.eup %8498  ;;  %7947 = vmatprep.mubr.msk.f32.mxu1 %vm1021_vm1, %v9513_v43 }
 0x45c   : > { %7948 = vmatmul.mubr.msk.f32.vlgmr.msra.gmra.mxu1 %vm1021_vm1, %v9515_v44 }
 0x45d   : > { %7956 = vmatpush3.msra.mxu1 %v9442_v52 }
 0x45e   : > { %7965 = vmatprep.subr.msk.mxu1 %vm684_vm0, %v2302_v46 }
 0x47a   : > { %v1805_v47 = vpop.xlane.xlu1 %1804 }
 0x47b   : > { %v1813_v51 = vsub.f32 %v7939_v63, %v1805_v47 }
 0x47c   : > { %v1802_v35 = vpop.xlane.xlu0 %1801 }
 0x47d   : > { %v1812_v54 = vsub.f32 %v1773_v4, %v1802_v35  ;;  %v1828_v36 = vmul.f32 1.442695, %v1813_v51 }
 0x47f   : > { %v1826_v56 = vmul.f32 1.442695, %v1812_v54 }
 0x480   : > { %v1787_v2 = vpop.xlane.xlu1 %1786 }
 0x481   : > { %8500 = vpow2.f32 %v1826_v56  ;;  %v1807_v5 = vsub.f32 %v7924_v7, %v1787_v2 }
 0x482   : > { %8502 = vpow2.f32 %v1828_v36  ;;  %v1784_v8 = vpop.xlane.xlu0 %1783 }
 0x483   : > { %v1806_v15 = vsub.f32 %v1512_v11, %v1784_v8  ;;  %v1816_v17 = vmul.f32 1.442695, %v1807_v5 }
 0x484   : > { %v1799_v21 = vpop.xlane.xlu1 %1798 }
 0x485   : > { %v1814_v26 = vmul.f32 1.442695, %v1806_v15  ;;  %v1811_v28 = vsub.f32 %v7934_v16, %v1799_v21 }
 0x486   : > { %v1796_v37 = vpop.xlane.xlu0 %1795 }
 0x487   : > { %8504 = vpow2.f32 %v1814_v26  ;;  %v1810_v52 = vsub.f32 %v1686_v20, %v1796_v37  ;;  %v1824_v38 = vmul.f32 1.442695, %v1811_v28 }
 0x488   : > { %8506 = vpow2.f32 %v1816_v17  ;;  %v2298_v63 = vpop.permute.xlu1 %2297 }
 0x489   : > { %v1822_v39 = vmul.f32 1.442695, %v1810_v52 }
 0x48a   : > { %v2389_v4 = vpop.permute.xlu0 %2388 }
 0x48b   : > { %8508 = vpow2.f32 %v1822_v39 }
 0x48c   : > { %8510 = vpow2.f32 %v1824_v38  ;;  %v2300_v40 = vpop.permute.xlu1 %2299 }
 0x48e   : > { %v9523_v47 = vpop.eup %8500  ;;  %v2385_v7 = vpop.permute.xlu0 %2384 }
 0x48f   : > { %10745 = vst [vmem:[#allocation35_spill] sm:$0xff] %v9523_v47  ;;  %v9525_v51 = vpop.eup %8502  ;;  %7957 = vmatprep.mubr.msk.f32.mxu1 %vm1021_vm1, %v9523_v47 }
 0x490   : > { %10746 = vst [vmem:[#allocation36_spill] sm:$0xff] %v9525_v51  ;;  %v2476_v11 = vpop.permute.xlu1 %2475  ;;  %7958 = vmatmul.mubr.msk.f32.vlgmr.msra.gmra.mxu1 %vm1021_vm1, %v9525_v51 }
 0x491   : > { %7966 = vmatpush3.xpose.msk.msra.mxu1 %vm684_vm0, %v2302_v46  ;;  %7967 = vmatprep.mubr.msk.f32.mxu1 %vm684_vm0, %v2298_v63 }
 0x492   : > { %7975 = vmatprep.subr.msk.mxu1 %vm684_vm0, %v2476_v11  ;;  %v2387_v16 = vpop.permute.xlu0 %2386 }
 0x494   : > { %v9534_v20 = vpop.eup %8504  ;;  %v2474_v35 = vpop.permute.xlu1 %2473  ;;  %7968 = vmatmul.mubr.msk.f32.vlgmr.msra.gmra.mxu1 %vm684_vm0, %v2300_v40 }
 0x495   : > { %v9537_v54 = vpop.eup %8506  ;;  %7976 = vmatpush3.xpose.msk.msra.mxu1 %vm684_vm0, %v2476_v11  ;;  %7942 = vmatprep.mubr.msk.f32.mxu0 %vm1021_vm1, %v9534_v20 }
 0x496   : > { %7943 = vmatmul.mubr.msk.f32.vlgmr.msra.gmra.mxu0 %vm1021_vm1, %v9537_v54  ;;  %v2472_v46 = vpop.permute.xlu0 %2471 }
 0x497   : > { %7951 = vmatpush3.msra.mxu0 %v9448_v53  ;;  %7977 = vmatprep.mubr.msk.f32.mxu1 %vm684_vm0, %v2472_v46 }
 0x498   : > { %v9546_v36 = vpop.eup %8508  ;;  %7960 = vmatprep.subr.msk.mxu0 %vm684_vm0, %v9509_v41  ;;  %v2723_v56 = vpop.permute.xlu1 %2722  ;;  %7978 = vmatmul.mubr.msk.f32.vlgmr.msra.gmra.mxu1 %vm684_vm0, %v2474_v35 }
 0x499   : > { %v9551_v2 = vpop.eup %8510  ;;  %7952 = vmatprep.mubr.msk.f32.mxu0 %vm1021_vm1, %v9546_v36  ;;  %7985 = vmatprep.subr.mxu1 %v2723_v56 }
 0x49a   : > { %10747 = vst [vmem:[#allocation37_spill] sm:$0xff] %v9551_v2  ;;  %7953 = vmatmul.mubr.msk.f32.vlgmr.msra.gmra.mxu0 %vm1021_vm1, %v9551_v2  ;;  %7986 = vmatpush3.msra.mxu1 %v2723_v56  ;;  %v2639_v53 = vpop.permute.xlu0 %2638 }
 0x49b   : > { %7961 = vmatpush3.xpose.msk.msra.mxu0 %vm684_vm0, %v9509_v41  ;;  %7962 = vmatprep.mubr.msk.f32.mxu0 %vm684_vm0, %v9511_v42 }
 0x49c   : > { %7970 = vmatprep.subr.msk.mxu0 %vm684_vm0, %v2389_v4  ;;  %v9570_v41 = vpop.permute.xlu1 %2806 }
 0x49e   : > { %7963 = vmatmul.mubr.msk.f32.vlgmr.msra.gmra.mxu0 %vm684_vm0, %v9507_v23  ;;  %v9564_v5 = vpop.permute.xlu0 %2890 }
 0x49f   : > { %7971 = vmatpush3.xpose.msk.msra.mxu0 %vm684_vm0, %v2389_v4  ;;  %7972 = vmatprep.mubr.msk.f32.mxu0 %vm684_vm0, %v2385_v7 }
 0x4a0   : > { %7980 = vmatprep.subr.mxu0 %v2639_v53  ;;  %7995 = vmatprep.subr.mxu1 %v9564_v5 }
 0x4a2   : > { %7973 = vmatmul.mubr.msk.f32.vlgmr.msra.gmra.mxu0 %vm684_vm0, %v2387_v16 }
 0x4a3   : > { %7981 = vmatpush3.msra.mxu0 %v2639_v53 }
 0x4a4   : > { %7990 = vmatprep.subr.mxu0 %v9570_v41 }
 0x51c   : > { %v9573_v42 = vpop.f32.mrf.mxu1 }
 0x51d   : > { %10748 = vst [vmem:[#allocation38_spill] sm:$0xff] %v9573_v42 }
 0x51e   : > { %v9575_v8 = vpop.f32.mrf.mxu1 }
 0x51f   : > { %10749 = vst [vmem:[#allocation39_spill] sm:$0xff] %v9575_v8 }
 0x550   : > { %v9577_v23 = vpop.f32.mrf.mxu1 }
 0x551   : > { %10750 = vst [vmem:[#allocation40_spill] sm:$0xff] %v9577_v23 }
 0x552   : > { %v9579_v15 = vpop.f32.mrf.mxu1 }
 0x553   : > { %10751 = vst [vmem:[#allocation41_spill] sm:$0xff] %v9579_v15 }
 0x554   : > { %v7969_v17 = vpop.f32.mrf.mxu1 }
 0x555   : > { %v2567_v21 = vsel %vm1021_vm1, %v7969_v17, -inf }
 0x556   : > { %2568 = vmax.xlane.f32.xlu0 %v2567_v21  ;;  %v9582_v26 = vpop.f32.mrf.mxu0  ;;  %v2375_v28 = vpop.f32.mrf.mxu1 }
 0x557   : > { %10752 = vst [vmem:[#allocation42_spill] sm:$0xff] %v9582_v26  ;;  %v2564_v38 = vsel %vm1021_vm1, %v2375_v28, -inf }
 0x558   : > { %v9584_v37 = vpop.f32.mrf.mxu0  ;;  %v7979_v52 = vpop.f32.mrf.mxu1 }
 0x559   : > { %10753 = vst [vmem:[#allocation43_spill] sm:$0xff] %v9584_v37  ;;  %v2579_v63 = vsel %vm1021_vm1, %v7979_v52, -inf }
 0x55a   : > { %2565 = vmax.xlane.f32.xlu0 %v2564_v38  ;;  %v9588_v39 = vpop.f32.mrf.mxu0  ;;  %2580 = vmax.xlane.f32.xlu1 %v2579_v63  ;;  %v2549_v4 = vpop.f32.mrf.mxu1 }
 0x55b   : > { %10754 = vst [vmem:[#allocation44_spill] sm:$0xff] %v9588_v39  ;;  %v2576_v7 = vsel %vm1021_vm1, %v2549_v4, -inf  ;;  %v9629_v63 = vpop.permute.xlu1 %2986 }
 0x55c   : > { %v9590_v40 = vpop.f32.mrf.mxu0 }
 0x55d   : > { %10755 = vst [vmem:[#allocation45_spill] sm:$0xff] %v9590_v40 }
 0x55e   : > { %v7964_v11 = vpop.f32.mrf.mxu0  ;;  %2577 = vmax.xlane.f32.xlu0 %v2576_v7 }
 0x55f   : > { %v2561_v16 = vsel %vm1021_vm1, %v7964_v11, -inf  ;;  %v9631_v7 = vpop.permute.xlu1 %2982 }
 0x560   : > { %v2288_v35 = vpop.f32.mrf.mxu0  ;;  %2562 = vmax.xlane.f32.xlu1 %v2561_v16  ;;  %v9633_v16 = vpop.permute.xlu0 %2984 }
 0x561   : > { %v2558_v46 = vsel %vm1021_vm1, %v2288_v35, -inf }
 0x562   : > { %v7974_v56 = vpop.f32.mrf.mxu0  ;;  %2559 = vmax.xlane.f32.xlu0 %v2558_v46 }
 0x563   : > { %v2573_v53 = vsel %vm1021_vm1, %v7974_v56, -inf  ;;  %v3074_v46 = vpop.permute.xlu1 %3073 }
 0x564   : > { %v2462_v21 = vpop.f32.mrf.mxu0  ;;  %2574 = vmax.xlane.f32.xlu1 %v2573_v53 }
 0x565   : > { %v2570_v38 = vsel %vm1021_vm1, %v2462_v21, -inf }
 0x566   : > { %2571 = vmax.xlane.f32.xlu0 %v2570_v38 }
 0x575   : > { %3069 = vrot.lane.b32.xlu1 %v9267_v19, %s8960_s14 }
 0x579   : > { %3071 = vrot.lane.b32.xlu1 %v9277_v22, %s8960_s14 }
 0x57c   : > { %3160 = vrot.lane.b32.xlu0 %v9281_v24, %s8960_s14 }
 0x57d   : > { %3247 = vrot.lane.b32.xlu1 %v9300_v30, %s8960_s14 }
 0x580   : > { %3156 = vrot.lane.b32.xlu0 %v9285_v25, %s8960_s14 }
 0x581   : > { %3245 = vrot.lane.b32.xlu1 %v9315_v33, %s8960_s14 }
 0x584   : > { %3158 = vrot.lane.b32.xlu0 %v9298_v29, %s8960_s14 }
 0x585   : > { %3494 = vrot.lane.b32.xlu1 %v9318_v34, %s8960_s14 }
 0x588   : > { %3243 = vrot.lane.b32.xlu0 %v9302_v31, %s8960_s14 }
 0x589   : > { %3578 = vrot.lane.b32.xlu1 %v9288_v27, %s8960_s14 }
 0x58c   : > { %3410 = vrot.lane.b32.xlu0 %v9305_v32, %s8960_s14 }
 0x58d   : > { %3758 = vrot.lane.b32.xlu1 %v9259_v14, %s8961_s0 }
 0x590   : > { %3662 = vrot.lane.b32.xlu0 %v9382_v55, %s8960_s14 }
 0x591   : > { %3754 = vrot.lane.b32.xlu1 %v9246_v0, %s8961_s0 }
 0x594   : > { %3756 = vrot.lane.b32.xlu0 %v9252_v1, %s8961_s0 }
 0x595   : > { %3845 = vrot.lane.b32.xlu1 %v9265_v18, %s8961_s0 }
 0x5df   : > { %v2569_v53 = vpop.xlane.xlu0 %2568 }
 0x5e0   : > { %v2585_v38 = vsub.f32 %v7969_v17, %v2569_v53 }
 0x5e2   : > { %v2596_v61 = vmul.f32 1.442695, %v2585_v38 }
 0x5e3   : > { %v2581_v3 = vpop.xlane.xlu1 %2580  ;;  %v2566_v6 = vpop.xlane.xlu0 %2565 }
 0x5e4   : > { %v2584_v62 = vsub.f32 %v2375_v28, %v2566_v6  ;;  %v2589_v60 = vsub.f32 %v7979_v52, %v2581_v3 }
 0x5e6   : > { %v2594_v59 = vmul.f32 1.442695, %v2584_v62  ;;  %v2604_v15 = vmul.f32 1.442695, %v2589_v60 }
 0x5e7   : > { %v2578_v57 = vpop.xlane.xlu0 %2577 }
 0x5e8   : > { %v2588_v58 = vsub.f32 %v2549_v4, %v2578_v57  ;;  %8512 = vpow2.f32 %v2594_v59 }
 0x5e9   : > { %v2563_v23 = vpop.xlane.xlu1 %2562  ;;  %8514 = vpow2.f32 %v2596_v61 }
 0x5ea   : > { %v2602_v39 = vmul.f32 1.442695, %v2588_v58  ;;  %v2583_v40 = vsub.f32 %v7964_v11, %v2563_v23 }
 0x5eb   : > { %v2560_v42 = vpop.xlane.xlu0 %2559 }
 0x5ec   : > { %8516 = vpow2.f32 %v2602_v39  ;;  %v2582_v8 = vsub.f32 %v2288_v35, %v2560_v42  ;;  %v2592_v37 = vmul.f32 1.442695, %v2583_v40 }
 0x5ed   : > { %v2575_v26 = vpop.xlane.xlu1 %2574  ;;  %8518 = vpow2.f32 %v2604_v15 }
 0x5ee   : > { %v2590_v17 = vmul.f32 1.442695, %v2582_v8  ;;  %v2587_v53 = vsub.f32 %v7974_v56, %v2575_v26 }
 0x5ef   : > { %v2572_v6 = vpop.xlane.xlu0 %2571 }
 0x5f0   : > { %8520 = vpow2.f32 %v2590_v17  ;;  %v2586_v3 = vsub.f32 %v2462_v21, %v2572_v6  ;;  %v2600_v62 = vmul.f32 1.442695, %v2587_v53 }
 0x5f1   : > { %8522 = vpow2.f32 %v2592_v37  ;;  %v3070_v57 = vpop.permute.xlu1 %3069 }
 0x5f2   : > { %v2598_v59 = vmul.f32 1.442695, %v2586_v3 }
 0x5f3   : > { %v3161_v28 = vpop.permute.xlu0 %3160 }
 0x5f4   : > { %8524 = vpow2.f32 %v2598_v59 }
 0x5f5   : > { %8526 = vpow2.f32 %v2600_v62  ;;  %v3072_v58 = vpop.permute.xlu1 %3071  ;;  %v9635_v60 = vpop.eup %8512 }
 0x5f6   : > { %v9637_v61 = vpop.eup %8514  ;;  %7987 = vmatprep.mubr.msk.f32.mxu1 %vm1021_vm1, %v9635_v60 }
 0x5f7   : > { %v3157_v42 = vpop.permute.xlu0 %3156  ;;  %7988 = vmatmul.mubr.msk.f32.vlgmr.msra.gmra.mxu1 %vm1021_vm1, %v9637_v61 }
 0x5f8   : > { %7996 = vmatpush3.msra.mxu1 %v9564_v5 }
 0x5f9   : > { %v9643_v8 = vpop.eup %8516  ;;  %v3248_v23 = vpop.permute.xlu1 %3247  ;;  %8005 = vmatprep.subr.msk.mxu1 %vm684_vm0, %v3074_v46 }
 0x5fa   : > { %10756 = vst [vmem:[#allocation46_spill] sm:$0xff] %v9643_v8  ;;  %7997 = vmatprep.mubr.msk.f32.mxu1 %vm1021_vm1, %v9643_v8  ;;  %v9649_v15 = vpop.eup %8518 }
 0x5fb   : > { %10757 = vst [vmem:[#allocation47_spill] sm:$0xff] %v9649_v15  ;;  %v3159_v26 = vpop.permute.xlu0 %3158  ;;  %7998 = vmatmul.mubr.msk.f32.vlgmr.msra.gmra.mxu1 %vm1021_vm1, %v9649_v15 }
 0x5fc   : > { %8006 = vmatpush3.xpose.msk.msra.mxu1 %vm684_vm0, %v3074_v46  ;;  %8007 = vmatprep.mubr.msk.f32.mxu1 %vm684_vm0, %v3070_v57 }
 0x5fd   : > { %v9653_v37 = vpop.eup %8520  ;;  %v3246_v52 = vpop.permute.xlu1 %3245  ;;  %8015 = vmatprep.subr.msk.mxu1 %vm684_vm0, %v3248_v23 }
 0x5fe   : > { %v9657_v5 = vpop.eup %8522  ;;  %7982 = vmatprep.mubr.msk.f32.mxu0 %vm1021_vm1, %v9653_v37 }
 0x5ff   : > { %7983 = vmatmul.mubr.msk.f32.vlgmr.msra.gmra.mxu0 %vm1021_vm1, %v9657_v5  ;;  %v3244_v39 = vpop.permute.xlu0 %3243  ;;  %8008 = vmatmul.mubr.msk.f32.vlgmr.msra.gmra.mxu1 %vm684_vm0, %v3072_v58 }
 0x600   : > { %7991 = vmatpush3.msra.mxu0 %v9570_v41  ;;  %8016 = vmatpush3.xpose.msk.msra.mxu1 %vm684_vm0, %v3248_v23 }
 0x601   : > { %v9666_v4 = vpop.eup %8524  ;;  %8000 = vmatprep.subr.msk.mxu0 %vm684_vm0, %v9629_v63  ;;  %v3495_v40 = vpop.permute.xlu1 %3494  ;;  %8017 = vmatprep.mubr.msk.f32.mxu1 %vm684_vm0, %v3244_v39 }
 0x602   : > { %v9671_v11 = vpop.eup %8526  ;;  %7992 = vmatprep.mubr.msk.f32.mxu0 %vm1021_vm1, %v9666_v4  ;;  %8025 = vmatprep.subr.mxu1 %v3495_v40 }
 0x603   : > { %10758 = vst [vmem:[#allocation48_spill] sm:$0xff] %v9671_v11  ;;  %7993 = vmatmul.mubr.msk.f32.vlgmr.msra.gmra.mxu0 %vm1021_vm1, %v9671_v11  ;;  %v3411_v41 = vpop.permute.xlu0 %3410  ;;  %8018 = vmatmul.mubr.msk.f32.vlgmr.msra.gmra.mxu1 %vm684_vm0, %v3246_v52 }
 0x604   : > { %8001 = vmatpush3.xpose.msk.msra.mxu0 %vm684_vm0, %v9629_v63  ;;  %8026 = vmatpush3.msra.mxu1 %v3495_v40 }
 0x605   : > { %8002 = vmatprep.mubr.msk.f32.mxu0 %vm684_vm0, %v9631_v7  ;;  %8010 = vmatprep.subr.msk.mxu0 %vm684_vm0, %v3161_v28  ;;  %v9692_v56 = vpop.permute.xlu1 %3578 }
 0x607   : > { %8003 = vmatmul.mubr.msk.f32.vlgmr.msra.gmra.mxu0 %vm684_vm0, %v9633_v16  ;;  %v9686_v35 = vpop.permute.xlu0 %3662 }
 0x608   : > { %8011 = vmatpush3.xpose.msk.msra.mxu0 %vm684_vm0, %v3161_v28  ;;  %8012 = vmatprep.mubr.msk.f32.mxu0 %vm684_vm0, %v3157_v42 }
 0x609   : > { %8020 = vmatprep.subr.mxu0 %v3411_v41  ;;  %8035 = vmatprep.subr.mxu1 %v9686_v35 }
 0x60b   : > { %8013 = vmatmul.mubr.msk.f32.vlgmr.msra.gmra.mxu0 %vm684_vm0, %v3159_v26 }
 0x60c   : > { %8021 = vmatpush3.msra.mxu0 %v3411_v41 }
 0x60d   : > { %8030 = vmatprep.subr.mxu0 %v9692_v56 }
 0x6b7   : > { %v9695_v21 = vpop.f32.mrf.mxu1 }
 0x6b8   : > { %10759 = vst [vmem:[#allocation49_spill] sm:$0xff] %v9695_v21 }
 0x6b9   : > { %v9697_v63 = vpop.f32.mrf.mxu1 }
 0x6ba   : > { %10760 = vst [vmem:[#allocation50_spill] sm:$0xff] %v9697_v63 }
 0x6bb   : > { %v9699_v7 = vpop.f32.mrf.mxu1 }
 0x6bc   : > { %10761 = vst [vmem:[#allocation51_spill] sm:$0xff] %v9699_v7 }
 0x6bd   : > { %v9701_v16 = vpop.f32.mrf.mxu1 }
 0x6be   : > { %10762 = vst [vmem:[#allocation52_spill] sm:$0xff] %v9701_v16 }
 0x6bf   : > { %v9703_v46 = vpop.f32.mrf.mxu0  ;;  %v8009_v38 = vpop.f32.mrf.mxu1 }
 0x6c0   : > { %10763 = vst [vmem:[#allocation53_spill] sm:$0xff] %v9703_v46  ;;  %v3339_v17 = vsel %vm1021_vm1, %v8009_v38, -inf }
 0x6c1   : > { %v9706_v53 = vpop.f32.mrf.mxu0  ;;  %3340 = vmax.xlane.f32.xlu0 %v3339_v17  ;;  %v3147_v6 = vpop.f32.mrf.mxu1 }
 0x6c2   : > { %10764 = vst [vmem:[#allocation54_spill] sm:$0xff] %v9706_v53  ;;  %v3336_v57 = vsel %vm1021_vm1, %v3147_v6, -inf }
 0x6c3   : > { %v9708_v3 = vpop.f32.mrf.mxu0  ;;  %v8019_v62 = vpop.f32.mrf.mxu1 }
 0x6c4   : > { %10765 = vst [vmem:[#allocation55_spill] sm:$0xff] %v9708_v3  ;;  %v3351_v28 = vsel %vm1021_vm1, %v8019_v62, -inf }
 0x6c5   : > { %v9711_v59 = vpop.f32.mrf.mxu0  ;;  %3337 = vmax.xlane.f32.xlu0 %v3336_v57  ;;  %3352 = vmax.xlane.f32.xlu1 %v3351_v28  ;;  %v3321_v58 = vpop.f32.mrf.mxu1 }
 0x6c6   : > { %10766 = vst [vmem:[#allocation56_spill] sm:$0xff] %v9711_v59  ;;  %v3348_v52 = vsel %vm1021_vm1, %v3321_v58, -inf  ;;  %v9751_v28 = vpop.permute.xlu1 %3758 }
 0x6c7   : > { %v8004_v42 = vpop.f32.mrf.mxu0 }
 0x6c8   : > { %v3333_v23 = vsel %vm1021_vm1, %v8004_v42, -inf }
 0x6c9   : > { %v3060_v26 = vpop.f32.mrf.mxu0  ;;  %3334 = vmax.xlane.f32.xlu1 %v3333_v23  ;;  %3349 = vmax.xlane.f32.xlu0 %v3348_v52  ;;  %v9755_v52 = vpop.permute.xlu0 %3756 }
 0x6ca   : > { %v3330_v41 = vsel %vm1021_vm1, %v3060_v26, -inf  ;;  %v9753_v23 = vpop.permute.xlu1 %3754 }
 0x6cb   : > { %v8014_v39 = vpop.f32.mrf.mxu0 }
 0x6cc   : > { %v3345_v40 = vsel %vm1021_vm1, %v8014_v39, -inf }
 0x6cd   : > { %v3234_v17 = vpop.f32.mrf.mxu0  ;;  %3346 = vmax.xlane.f32.xlu1 %v3345_v40  ;;  %3331 = vmax.xlane.f32.xlu0 %v3330_v41 }
 0x6ce   : > { %v3342_v57 = vsel %vm1021_vm1, %v3234_v17, -inf  ;;  %v3846_v40 = vpop.permute.xlu1 %3845 }
 0x6d1   : > { %3343 = vmax.xlane.f32.xlu0 %v3342_v57 }
 0x6de   : > { %3841 = vrot.lane.b32.xlu1 %v9267_v19, %s8961_s0 }
 0x6e2   : > { %3843 = vrot.lane.b32.xlu1 %v9277_v22, %s8961_s0 }
 0x6e6   : > { %4019 = vrot.lane.b32.xlu1 %v9300_v30, %s8961_s0 }
 0x6e7   : > { %3932 = vrot.lane.b32.xlu0 %v9281_v24, %s8961_s0 }
 0x6ea   : > { %4017 = vrot.lane.b32.xlu1 %v9315_v33, %s8961_s0 }
 0x6eb   : > { %3928 = vrot.lane.b32.xlu0 %v9285_v25, %s8961_s0 }
 0x6ee   : > { %4266 = vrot.lane.b32.xlu1 %v9318_v34, %s8961_s0 }
 0x6ef   : > { %3930 = vrot.lane.b32.xlu0 %v9298_v29, %s8961_s0 }
 0x6f2   : > { %4350 = vrot.lane.b32.xlu1 %v9288_v27, %s8961_s0 }
 0x6f3   : > { %4015 = vrot.lane.b32.xlu0 %v9302_v31, %s8961_s0 }
 0x6f6   : > { %4530 = vrot.lane.b32.xlu1 %v9259_v14, %s8962_s6 }
 0x6f7   : > { %4182 = vrot.lane.b32.xlu0 %v9305_v32, %s8961_s0 }
 0x6fa   : > { %4526 = vrot.lane.b32.xlu1 %v9246_v0, %s8962_s6 }
 0x6fb   : > { %4434 = vrot.lane.b32.xlu0 %v9382_v55, %s8961_s0 }
 0x6fe   : > { %4617 = vrot.lane.b32.xlu1 %v9265_v18, %s8962_s6 }
 0x6ff   : > { %4528 = vrot.lane.b32.xlu0 %v9252_v1, %s8962_s6 }
 0x74a   : > { %v3341_v41 = vpop.xlane.xlu0 %3340 }
 0x74b   : > { %v3357_v57 = vsub.f32 %v8009_v38, %v3341_v41 }
 0x74d   : > { %v3368_v59 = vmul.f32 1.442695, %v3357_v57 }
 0x74e   : > { %v3353_v7 = vpop.xlane.xlu1 %3352  ;;  %v3338_v16 = vpop.xlane.xlu0 %3337 }
 0x74f   : > { %v3356_v3 = vsub.f32 %v3147_v6, %v3338_v16  ;;  %v3361_v21 = vsub.f32 %v8019_v62, %v3353_v7 }
 0x751   : > { %v3366_v63 = vmul.f32 1.442695, %v3356_v3  ;;  %v3376_v48 = vmul.f32 1.442695, %v3361_v21 }
 0x752   : > { %v3335_v53 = vpop.xlane.xlu1 %3334  ;;  %v3350_v46 = vpop.xlane.xlu0 %3349 }
 0x753   : > { %v3360_v50 = vsub.f32 %v3321_v58, %v3350_v46  ;;  %8528 = vpow2.f32 %v3366_v63  ;;  %v3355_v13 = vsub.f32 %v8004_v42, %v3335_v53 }
 0x754   : > { %8530 = vpow2.f32 %v3368_v59 }
 0x755   : > { %v3374_v49 = vmul.f32 1.442695, %v3360_v50  ;;  %v3364_v38 = vmul.f32 1.442695, %v3355_v13 }
 0x756   : > { %v3347_v45 = vpop.xlane.xlu1 %3346  ;;  %v3332_v10 = vpop.xlane.xlu0 %3331 }
 0x757   : > { %v3354_v12 = vsub.f32 %v3060_v26, %v3332_v10  ;;  %8532 = vpow2.f32 %v3374_v49  ;;  %v3359_v41 = vsub.f32 %v8014_v39, %v3347_v45 }
 0x758   : > { %8534 = vpow2.f32 %v3376_v48 }
 0x759   : > { %v3362_v9 = vmul.f32 1.442695, %v3354_v12  ;;  %v3372_v3 = vmul.f32 1.442695, %v3359_v41 }
 0x75a   : > { %v3842_v16 = vpop.permute.xlu1 %3841  ;;  %v3344_v6 = vpop.xlane.xlu0 %3343 }
 0x75b   : > { %v3358_v7 = vsub.f32 %v3234_v17, %v3344_v6  ;;  %8536 = vpow2.f32 %v3362_v9 }
 0x75c   : > { %8538 = vpow2.f32 %v3364_v38 }
 0x75d   : > { %v3370_v46 = vmul.f32 1.442695, %v3358_v7 }
 0x75e   : > { %v3844_v63 = vpop.permute.xlu1 %3843  ;;  %v3933_v62 = vpop.permute.xlu0 %3932 }
 0x75f   : > { %8540 = vpow2.f32 %v3370_v46 }
 0x760   : > { %v9757_v21 = vpop.eup %8528  ;;  %8542 = vpow2.f32 %v3372_v3 }
 0x761   : > { %v9759_v50 = vpop.eup %8530  ;;  %8027 = vmatprep.mubr.msk.f32.mxu1 %vm1021_vm1, %v9757_v21 }
 0x762   : > { %v4020_v10 = vpop.permute.xlu1 %4019  ;;  %v3929_v12 = vpop.permute.xlu0 %3928  ;;  %8028 = vmatmul.mubr.msk.f32.vlgmr.msra.gmra.mxu1 %vm1021_vm1, %v9759_v50 }
 0x763   : > { %8036 = vmatpush3.msra.mxu1 %v9686_v35 }
 0x764   : > { %v9766_v9 = vpop.eup %8532  ;;  %8045 = vmatprep.subr.msk.mxu1 %vm684_vm0, %v3846_v40 }
 0x765   : > { %10767 = vst [vmem:[#allocation57_spill] sm:$0xff] %v9766_v9  ;;  %v9769_v13 = vpop.eup %8534  ;;  %8037 = vmatprep.mubr.msk.f32.mxu1 %vm1021_vm1, %v9766_v9 }
 0x766   : > { %10768 = vst [vmem:[#allocation58_spill] sm:$0xff] %v9769_v13  ;;  %v4018_v45 = vpop.permute.xlu1 %4017  ;;  %v3931_v48 = vpop.permute.xlu0 %3930  ;;  %8038 = vmatmul.mubr.msk.f32.vlgmr.msra.gmra.mxu1 %vm1021_vm1, %v9769_v13 }
 0x767   : > { %8046 = vmatpush3.xpose.msk.msra.mxu1 %vm684_vm0, %v3846_v40  ;;  %8047 = vmatprep.mubr.msk.f32.mxu1 %vm684_vm0, %v3842_v16 }
 0x768   : > { %v9777_v49 = vpop.eup %8536  ;;  %8055 = vmatprep.subr.msk.mxu1 %vm684_vm0, %v4020_v10 }
 0x769   : > { %v9780_v35 = vpop.eup %8538  ;;  %8022 = vmatprep.mubr.msk.f32.mxu0 %vm1021_vm1, %v9777_v49 }
 0x76a   : > { %v4016_v53 = vpop.permute.xlu0 %4015  ;;  %v4267_v59 = vpop.permute.xlu1 %4266  ;;  %8023 = vmatmul.mubr.msk.f32.vlgmr.msra.gmra.mxu0 %vm1021_vm1, %v9780_v35  ;;  %8048 = vmatmul.mubr.msk.f32.vlgmr.msra.gmra.mxu1 %vm684_vm0, %v3844_v63 }
 0x76b   : > { %8031 = vmatpush3.msra.mxu0 %v9692_v56  ;;  %8056 = vmatpush3.xpose.msk.msra.mxu1 %vm684_vm0, %v4020_v10 }
 0x76c   : > { %v9787_v58 = vpop.eup %8540  ;;  %8040 = vmatprep.subr.msk.mxu0 %vm684_vm0, %v9751_v28  ;;  %8057 = vmatprep.mubr.msk.f32.mxu1 %vm684_vm0, %v4016_v53 }
 0x76d   : > { %10769 = vst [vmem:[#allocation59_spill] sm:$0xff] %v9787_v58  ;;  %v9794_v42 = vpop.eup %8542  ;;  %8065 = vmatprep.subr.mxu1 %v4267_v59  ;;  %8032 = vmatprep.mubr.msk.f32.mxu0 %vm1021_vm1, %v9787_v58 }
 0x76e   : > { %10770 = vst [vmem:[#allocation60_spill] sm:$0xff] %v9794_v42  ;;  %v4183_v26 = vpop.permute.xlu0 %4182  ;;  %8033 = vmatmul.mubr.msk.f32.vlgmr.msra.gmra.mxu0 %vm1021_vm1, %v9794_v42  ;;  %8058 = vmatmul.mubr.msk.f32.vlgmr.msra.gmra.mxu1 %vm684_vm0, %v4018_v45  ;;  %v9814_v39 = vpop.permute.xlu1 %4350 }
 0x76f   : > { %8041 = vmatpush3.xpose.msk.msra.mxu0 %vm684_vm0, %v9751_v28  ;;  %8066 = vmatpush3.msra.mxu1 %v4267_v59 }
 0x770   : > { %8042 = vmatprep.mubr.msk.f32.mxu0 %vm684_vm0, %v9753_v23  ;;  %8050 = vmatprep.subr.msk.mxu0 %vm684_vm0, %v3933_v62 }
 0x772   : > { %v9806_v56 = vpop.permute.xlu0 %4434  ;;  %8043 = vmatmul.mubr.msk.f32.vlgmr.msra.gmra.mxu0 %vm684_vm0, %v9755_v52 }
 0x773   : > { %8075 = vmatprep.subr.mxu1 %v9806_v56  ;;  %8051 = vmatpush3.xpose.msk.msra.mxu0 %vm684_vm0, %v3933_v62 }
 0x774   : > { %8052 = vmatprep.mubr.msk.f32.mxu0 %vm684_vm0, %v3929_v12  ;;  %8060 = vmatprep.subr.mxu0 %v4183_v26 }
 0x776   : > { %8053 = vmatmul.mubr.msk.f32.vlgmr.msra.gmra.mxu0 %vm684_vm0, %v3931_v48 }
 0x777   : > { %8061 = vmatpush3.msra.mxu0 %v4183_v26 }
 0x778   : > { %8070 = vmatprep.subr.mxu0 %v9814_v39 }
 0x822   : > { %v9817_v17 = vpop.f32.mrf.mxu1 }
 0x823   : > { %10771 = vst [vmem:[#allocation61_spill] sm:$0xff] %v9817_v17 }
 0x824   : > { %v9819_v28 = vpop.f32.mrf.mxu1 }
 0x825   : > { %10772 = vst [vmem:[#allocation62_spill] sm:$0xff] %v9819_v28 }
 0x826   : > { %v9821_v23 = vpop.f32.mrf.mxu1 }
 0x827   : > { %10773 = vst [vmem:[#allocation63_spill] sm:$0xff] %v9821_v23 }
 0x828   : > { %v9823_v52 = vpop.f32.mrf.mxu1 }
 0x829   : > { %10774 = vst [vmem:[#allocation64_spill] sm:$0xff] %v9823_v52 }
 0x82a   : > { %v9825_v40 = vpop.f32.mrf.mxu0  ;;  %v8049_v57 = vpop.f32.mrf.mxu1 }
 0x82b   : > { %10775 = vst [vmem:[#allocation65_spill] sm:$0xff] %v9825_v40  ;;  %v4111_v38 = vsel %vm1021_vm1, %v8049_v57, -inf }
 0x82c   : > { %4112 = vmax.xlane.f32.xlu0 %v4111_v38  ;;  %v9828_v41 = vpop.f32.mrf.mxu0  ;;  %v3919_v16 = vpop.f32.mrf.mxu1 }
 0x82d   : > { %10776 = vst [vmem:[#allocation66_spill] sm:$0xff] %v9828_v41  ;;  %v4108_v3 = vsel %vm1021_vm1, %v3919_v16, -inf }
 0x82e   : > { %v9830_v6 = vpop.f32.mrf.mxu0  ;;  %v8059_v7 = vpop.f32.mrf.mxu1 }
 0x82f   : > { %10777 = vst [vmem:[#allocation67_spill] sm:$0xff] %v9830_v6  ;;  %v4123_v46 = vsel %vm1021_vm1, %v8059_v7, -inf }
 0x830   : > { %4109 = vmax.xlane.f32.xlu0 %v4108_v3  ;;  %v9834_v63 = vpop.f32.mrf.mxu0  ;;  %4124 = vmax.xlane.f32.xlu1 %v4123_v46  ;;  %v4093_v62 = vpop.f32.mrf.mxu1 }
 0x831   : > { %10778 = vst [vmem:[#allocation68_spill] sm:$0xff] %v9834_v63  ;;  %v4120_v45 = vsel %vm1021_vm1, %v4093_v62, -inf  ;;  %v9873_v46 = vpop.permute.xlu1 %4530 }
 0x832   : > { %v8044_v10 = vpop.f32.mrf.mxu0 }
 0x833   : > { %v4105_v12 = vsel %vm1021_vm1, %v8044_v10, -inf }
 0x834   : > { %v3832_v48 = vpop.f32.mrf.mxu0  ;;  %4106 = vmax.xlane.f32.xlu1 %v4105_v12  ;;  %4121 = vmax.xlane.f32.xlu0 %v4120_v45  ;;  %v9877_v45 = vpop.permute.xlu0 %4528 }
 0x835   : > { %v4102_v26 = vsel %vm1021_vm1, %v3832_v48, -inf  ;;  %v9875_v12 = vpop.permute.xlu1 %4526 }
 0x836   : > { %v8054_v53 = vpop.f32.mrf.mxu0 }
 0x837   : > { %v4117_v59 = vsel %vm1021_vm1, %v8054_v53, -inf }
 0x838   : > { %v4006_v38 = vpop.f32.mrf.mxu0  ;;  %4118 = vmax.xlane.f32.xlu1 %v4117_v59  ;;  %4103 = vmax.xlane.f32.xlu0 %v4102_v26 }
 0x839   : > { %v4114_v3 = vsel %vm1021_vm1, %v4006_v38, -inf  ;;  %v4618_v59 = vpop.permute.xlu1 %4617 }
 0x83c   : > { %4115 = vmax.xlane.f32.xlu0 %v4114_v3 }
 0x849   : > { %4613 = vrot.lane.b32.xlu1 %v9267_v19, %s8962_s6 }
 0x84d   : > { %4615 = vrot.lane.b32.xlu1 %v9277_v22, %s8962_s6 }
 0x851   : > { %4791 = vrot.lane.b32.xlu1 %v9300_v30, %s8962_s6 }
 0x852   : > { %4704 = vrot.lane.b32.xlu0 %v9281_v24, %s8962_s6 }
 0x855   : > { %4789 = vrot.lane.b32.xlu1 %v9315_v33, %s8962_s6 }
 0x856   : > { %4700 = vrot.lane.b32.xlu0 %v9285_v25, %s8962_s6 }
 0x859   : > { %5038 = vrot.lane.b32.xlu1 %v9318_v34, %s8962_s6 }
 0x85a   : > { %4702 = vrot.lane.b32.xlu0 %v9298_v29, %s8962_s6 }
 0x85d   : > { %5122 = vrot.lane.b32.xlu1 %v9288_v27, %s8962_s6 }
 0x85e   : > { %4787 = vrot.lane.b32.xlu0 %v9302_v31, %s8962_s6 }
 0x861   : > { %5302 = vrot.lane.b32.xlu1 %v9259_v14, %s8963_s23 }
 0x862   : > { %4954 = vrot.lane.b32.xlu0 %v9305_v32, %s8962_s6 }
 0x865   : > { %5298 = vrot.lane.b32.xlu1 %v9246_v0, %s8963_s23 }
 0x866   : > { %5206 = vrot.lane.b32.xlu0 %v9382_v55, %s8962_s6 }
 0x869   : > { %5389 = vrot.lane.b32.xlu1 %v9265_v18, %s8963_s23 }
 0x86a   : > { %5300 = vrot.lane.b32.xlu0 %v9252_v1, %s8963_s23 }
 0x8b5   : > { %v4113_v26 = vpop.xlane.xlu0 %4112 }
 0x8b6   : > { %v4129_v3 = vsub.f32 %v8049_v57, %v4113_v26 }
 0x8b8   : > { %v4140_v63 = vmul.f32 1.442695, %v4129_v3 }
 0x8b9   : > { %v4125_v23 = vpop.xlane.xlu1 %4124  ;;  %v4110_v52 = vpop.xlane.xlu0 %4109 }
 0x8ba   : > { %v4128_v6 = vsub.f32 %v3919_v16, %v4110_v52  ;;  %v4133_v17 = vsub.f32 %v8059_v7, %v4125_v23 }
 0x8bc   : > { %v4138_v28 = vmul.f32 1.442695, %v4128_v6  ;;  %v4148_v13 = vmul.f32 1.442695, %v4133_v17 }
 0x8bd   : > { %v4107_v40 = vpop.xlane.xlu1 %4106  ;;  %v4122_v41 = vpop.xlane.xlu0 %4121 }
 0x8be   : > { %v4132_v9 = vsub.f32 %v4093_v62, %v4122_v41  ;;  %8544 = vpow2.f32 %v4138_v28  ;;  %v4127_v8 = vsub.f32 %v8044_v10, %v4107_v40 }
 0x8bf   : > { %8546 = vpow2.f32 %v4140_v63 }
 0x8c0   : > { %v4146_v15 = vmul.f32 1.442695, %v4132_v9  ;;  %v4136_v57 = vmul.f32 1.442695, %v4127_v8 }
 0x8c1   : > { %v4119_v47 = vpop.xlane.xlu1 %4118  ;;  %v4104_v51 = vpop.xlane.xlu0 %4103 }
 0x8c2   : > { %v4126_v42 = vsub.f32 %v3832_v48, %v4104_v51  ;;  %8548 = vpow2.f32 %v4146_v15  ;;  %v4131_v26 = vsub.f32 %v8054_v53, %v4119_v47 }
 0x8c3   : > { %8550 = vpow2.f32 %v4148_v13 }
 0x8c4   : > { %v4134_v11 = vmul.f32 1.442695, %v4126_v42  ;;  %v4144_v6 = vmul.f32 1.442695, %v4131_v26 }
 0x8c5   : > { %v4614_v52 = vpop.permute.xlu1 %4613  ;;  %v4116_v16 = vpop.xlane.xlu0 %4115 }
 0x8c6   : > { %v4130_v23 = vsub.f32 %v4006_v38, %v4116_v16  ;;  %8552 = vpow2.f32 %v4134_v11 }
 0x8c7   : > { %8554 = vpow2.f32 %v4136_v57 }
 0x8c8   : > { %v4142_v41 = vmul.f32 1.442695, %v4130_v23 }
 0x8c9   : > { %v4616_v28 = vpop.permute.xlu1 %4615  ;;  %v4705_v7 = vpop.permute.xlu0 %4704 }
 0x8ca   : > { %8556 = vpow2.f32 %v4142_v41 }
 0x8cb   : > { %v9879_v17 = vpop.eup %8544  ;;  %8558 = vpow2.f32 %v4144_v6 }
 0x8cc   : > { %v9881_v9 = vpop.eup %8546  ;;  %8067 = vmatprep.mubr.msk.f32.mxu1 %vm1021_vm1, %v9879_v17 }
 0x8cd   : > { %v4792_v47 = vpop.permute.xlu1 %4791  ;;  %v4701_v51 = vpop.permute.xlu0 %4700  ;;  %8068 = vmatmul.mubr.msk.f32.vlgmr.msra.gmra.mxu1 %vm1021_vm1, %v9881_v9 }
 0x8ce   : > { %8076 = vmatpush3.msra.mxu1 %v9806_v56 }
 0x8cf   : > { %v9888_v8 = vpop.eup %8548  ;;  %8085 = vmatprep.subr.msk.mxu1 %vm684_vm0, %v4618_v59 }
 0x8d0   : > { %10779 = vst [vmem:[#allocation69_spill] sm:$0xff] %v9888_v8  ;;  %v9891_v15 = vpop.eup %8550  ;;  %8077 = vmatprep.mubr.msk.f32.mxu1 %vm1021_vm1, %v9888_v8 }
 0x8d1   : > { %10780 = vst [vmem:[#allocation70_spill] sm:$0xff] %v9891_v15  ;;  %v4790_v11 = vpop.permute.xlu1 %4789  ;;  %v4703_v13 = vpop.permute.xlu0 %4702  ;;  %8078 = vmatmul.mubr.msk.f32.vlgmr.msra.gmra.mxu1 %vm1021_vm1, %v9891_v15 }
 0x8d2   : > { %8086 = vmatpush3.xpose.msk.msra.mxu1 %vm684_vm0, %v4618_v59  ;;  %8087 = vmatprep.mubr.msk.f32.mxu1 %vm684_vm0, %v4614_v52 }
 0x8d3   : > { %v9899_v42 = vpop.eup %8552  ;;  %8095 = vmatprep.subr.msk.mxu1 %vm684_vm0, %v4792_v47 }
 0x8d4   : > { %v9902_v56 = vpop.eup %8554  ;;  %8062 = vmatprep.mubr.msk.f32.mxu0 %vm1021_vm1, %v9899_v42 }
 0x8d5   : > { %v4788_v40 = vpop.permute.xlu0 %4787  ;;  %v5039_v63 = vpop.permute.xlu1 %5038  ;;  %8063 = vmatmul.mubr.msk.f32.vlgmr.msra.gmra.mxu0 %vm1021_vm1, %v9902_v56  ;;  %8088 = vmatmul.mubr.msk.f32.vlgmr.msra.gmra.mxu1 %vm684_vm0, %v4616_v28 }
 0x8d6   : > { %8071 = vmatpush3.msra.mxu0 %v9814_v39  ;;  %8096 = vmatpush3.xpose.msk.msra.mxu1 %vm684_vm0, %v4792_v47 }
 0x8d7   : > { %v9909_v62 = vpop.eup %8556  ;;  %8080 = vmatprep.subr.msk.mxu0 %vm684_vm0, %v9873_v46  ;;  %8097 = vmatprep.mubr.msk.f32.mxu1 %vm684_vm0, %v4788_v40 }
 0x8d8   : > { %10781 = vst [vmem:[#allocation71_spill] sm:$0xff] %v9909_v62  ;;  %v9916_v10 = vpop.eup %8558  ;;  %8105 = vmatprep.subr.mxu1 %v5039_v63  ;;  %8072 = vmatprep.mubr.msk.f32.mxu0 %vm1021_vm1, %v9909_v62 }
 0x8d9   : > { %10782 = vst [vmem:[#allocation72_spill] sm:$0xff] %v9916_v10  ;;  %v4955_v48 = vpop.permute.xlu0 %4954  ;;  %8073 = vmatmul.mubr.msk.f32.vlgmr.msra.gmra.mxu0 %vm1021_vm1, %v9916_v10  ;;  %8098 = vmatmul.mubr.msk.f32.vlgmr.msra.gmra.mxu1 %vm684_vm0, %v4790_v11  ;;  %v9936_v53 = vpop.permute.xlu1 %5122 }
 0x8da   : > { %8081 = vmatpush3.xpose.msk.msra.mxu0 %vm684_vm0, %v9873_v46  ;;  %8106 = vmatpush3.msra.mxu1 %v5039_v63 }
 0x8db   : > { %8082 = vmatprep.mubr.msk.f32.mxu0 %vm684_vm0, %v9875_v12  ;;  %8090 = vmatprep.subr.msk.mxu0 %vm684_vm0, %v4705_v7 }
 0x8dd   : > { %v9928_v39 = vpop.permute.xlu0 %5206  ;;  %8083 = vmatmul.mubr.msk.f32.vlgmr.msra.gmra.mxu0 %vm684_vm0, %v9877_v45 }
 0x8de   : > { %8115 = vmatprep.subr.mxu1 %v9928_v39  ;;  %8091 = vmatpush3.xpose.msk.msra.mxu0 %vm684_vm0, %v4705_v7 }
 0x8df   : > { %8092 = vmatprep.mubr.msk.f32.mxu0 %vm684_vm0, %v4701_v51  ;;  %8100 = vmatprep.subr.mxu0 %v4955_v48 }
 0x8e1   : > { %8093 = vmatmul.mubr.msk.f32.vlgmr.msra.gmra.mxu0 %vm684_vm0, %v4703_v13 }
 0x8e2   : > { %8101 = vmatpush3.msra.mxu0 %v4955_v48 }
 0x8e3   : > { %8110 = vmatprep.subr.mxu0 %v9936_v53 }
 0x98d   : > { %v9939_v38 = vpop.f32.mrf.mxu1 }
 0x98e   : > { %10783 = vst [vmem:[#allocation73_spill] sm:$0xff] %v9939_v38 }
 0x98f   : > { %v9941_v46 = vpop.f32.mrf.mxu1 }
 0x990   : > { %10784 = vst [vmem:[#allocation74_spill] sm:$0xff] %v9941_v46 }
 0x991   : > { %v9943_v12 = vpop.f32.mrf.mxu1 }
 0x992   : > { %10785 = vst [vmem:[#allocation75_spill] sm:$0xff] %v9943_v12 }
 0x993   : > { %v9945_v45 = vpop.f32.mrf.mxu1 }
 0x994   : > { %10786 = vst [vmem:[#allocation76_spill] sm:$0xff] %v9945_v45 }
 0x995   : > { %v9947_v59 = vpop.f32.mrf.mxu0  ;;  %v8089_v3 = vpop.f32.mrf.mxu1 }
 0x996   : > { %10787 = vst [vmem:[#allocation77_spill] sm:$0xff] %v9947_v59  ;;  %v4883_v57 = vsel %vm1021_vm1, %v8089_v3, -inf }
 0x997   : > { %4884 = vmax.xlane.f32.xlu0 %v4883_v57  ;;  %v9950_v26 = vpop.f32.mrf.mxu0  ;;  %v4691_v52 = vpop.f32.mrf.mxu1 }
 0x998   : > { %10788 = vst [vmem:[#allocation78_spill] sm:$0xff] %v9950_v26  ;;  %v4880_v6 = vsel %vm1021_vm1, %v4691_v52, -inf }
 0x999   : > { %v9952_v16 = vpop.f32.mrf.mxu0  ;;  %v8099_v23 = vpop.f32.mrf.mxu1 }
 0x99a   : > { %10789 = vst [vmem:[#allocation79_spill] sm:$0xff] %v9952_v16  ;;  %v4895_v41 = vsel %vm1021_vm1, %v8099_v23, -inf }
 0x99b   : > { %4881 = vmax.xlane.f32.xlu0 %v4880_v6  ;;  %v9956_v28 = vpop.f32.mrf.mxu0  ;;  %4896 = vmax.xlane.f32.xlu1 %v4895_v41  ;;  %v4865_v7 = vpop.f32.mrf.mxu1 }
 0x99c   : > { %10790 = vst [vmem:[#allocation80_spill] sm:$0xff] %v9956_v28  ;;  %v4892_v11 = vsel %vm1021_vm1, %v4865_v7, -inf  ;;  %v9991_v41 = vpop.permute.xlu1 %5302 }
 0x99d   : > { %v8084_v47 = vpop.f32.mrf.mxu0 }
 0x99e   : > { %v4877_v51 = vsel %vm1021_vm1, %v8084_v47, -inf }
 0x99f   : > { %v4604_v13 = vpop.f32.mrf.mxu0  ;;  %4878 = vmax.xlane.f32.xlu1 %v4877_v51  ;;  %4893 = vmax.xlane.f32.xlu0 %v4892_v11  ;;  %v9995_v11 = vpop.permute.xlu0 %5300 }
 0x9a0   : > { %v4874_v48 = vsel %vm1021_vm1, %v4604_v13, -inf  ;;  %v9993_v51 = vpop.permute.xlu1 %5298 }
 0x9a1   : > { %v8094_v40 = vpop.f32.mrf.mxu0 }
 0x9a2   : > { %v4889_v63 = vsel %vm1021_vm1, %v8094_v40, -inf }
 0x9a3   : > { %v4778_v57 = vpop.f32.mrf.mxu0  ;;  %4890 = vmax.xlane.f32.xlu1 %v4889_v63  ;;  %4875 = vmax.xlane.f32.xlu0 %v4874_v48 }
 0x9a4   : > { %v4886_v6 = vsel %vm1021_vm1, %v4778_v57, -inf  ;;  %v5390_v63 = vpop.permute.xlu1 %5389 }
 0x9a7   : > { %4887 = vmax.xlane.f32.xlu0 %v4886_v6 }
 0x9b4   : > { %5385 = vrot.lane.b32.xlu1 %v9267_v19, %s8963_s23 }
 0x9b8   : > { %5387 = vrot.lane.b32.xlu1 %v9277_v22, %s8963_s23 }
 0x9bc   : > { %5563 = vrot.lane.b32.xlu1 %v9300_v30, %s8963_s23 }
 0x9bd   : > { %5476 = vrot.lane.b32.xlu0 %v9281_v24, %s8963_s23 }
 0x9c0   : > { %5561 = vrot.lane.b32.xlu1 %v9315_v33, %s8963_s23 }
 0x9c1   : > { %5472 = vrot.lane.b32.xlu0 %v9285_v25, %s8963_s23 }
 0x9c4   : > { %5810 = vrot.lane.b32.xlu1 %v9318_v34, %s8963_s23 }
 0x9c5   : > { %5474 = vrot.lane.b32.xlu0 %v9298_v29, %s8963_s23 }
 0x9c8   : > { %5894 = vrot.lane.b32.xlu1 %v9288_v27, %s8963_s23 }
 0x9c9   : > { %5559 = vrot.lane.b32.xlu0 %v9302_v31, %s8963_s23 }
 0x9cc   : > { %6074 = vrot.lane.b32.xlu1 %v9259_v14, %s8964_s20 }
 0x9cd   : > { %5726 = vrot.lane.b32.xlu0 %v9305_v32, %s8963_s23 }
 0x9d0   : > { %6070 = vrot.lane.b32.xlu1 %v9246_v0, %s8964_s20 }
 0x9d1   : > { %5978 = vrot.lane.b32.xlu0 %v9382_v55, %s8963_s23 }
 0xa20   : > { %v4885_v48 = vpop.xlane.xlu0 %4884 }
 0xa21   : > { %v4901_v6 = vsub.f32 %v8089_v3, %v4885_v48 }
 0xa23   : > { %v4912_v16 = vmul.f32 1.442695, %v4901_v6 }
 0xa24   : > { %v4897_v45 = vpop.xlane.xlu1 %4896  ;;  %v4882_v14 = vpop.xlane.xlu0 %4881 }
 0xa25   : > { %v4900_v12 = vsub.f32 %v4691_v52, %v4882_v14  ;;  %v4905_v28 = vsub.f32 %v8099_v23, %v4897_v45 }
 0xa27   : > { %v4910_v38 = vmul.f32 1.442695, %v4900_v12  ;;  %v4920_v59 = vmul.f32 1.442695, %v4905_v28 }
 0xa28   : > { %v4879_v46 = vpop.xlane.xlu1 %4878  ;;  %v4894_v0 = vpop.xlane.xlu0 %4893 }
 0xa29   : > { %v4904_v26 = vsub.f32 %v4865_v7, %v4894_v0  ;;  %8560 = vpow2.f32 %v4910_v38  ;;  %v4899_v15 = vsub.f32 %v8084_v47, %v4879_v46 }
 0xa2a   : > { %8562 = vpow2.f32 %v4912_v16 }
 0xa2b   : > { %v4918_v8 = vmul.f32 1.442695, %v4904_v26  ;;  %v4908_v3 = vmul.f32 1.442695, %v4899_v15 }
 0xa2c   : > { %v4891_v62 = vpop.xlane.xlu1 %4890  ;;  %v4876_v10 = vpop.xlane.xlu0 %4875 }
 0xa2d   : > { %v4898_v58 = vsub.f32 %v4604_v13, %v4876_v10  ;;  %8564 = vpow2.f32 %v4918_v8  ;;  %v4903_v48 = vsub.f32 %v8094_v40, %v4891_v62 }
 0xa2e   : > { %8566 = vpow2.f32 %v4920_v59 }
 0xa2f   : > { %v4906_v2 = vmul.f32 1.442695, %v4898_v58  ;;  %v4916_v12 = vmul.f32 1.442695, %v4903_v48 }
 0xa30   : > { %v5386_v52 = vpop.permute.xlu1 %5385  ;;  %v4888_v6 = vpop.xlane.xlu0 %4887 }
 0xa31   : > { %v4902_v45 = vsub.f32 %v4778_v57, %v4888_v6  ;;  %8568 = vpow2.f32 %v4906_v2 }
 0xa32   : > { %8570 = vpow2.f32 %v4908_v3 }
 0xa33   : > { %v4914_v23 = vmul.f32 1.442695, %v4902_v45 }
 0xa34   : > { %v5388_v38 = vpop.permute.xlu1 %5387  ;;  %v5477_v16 = vpop.permute.xlu0 %5476 }
 0xa35   : > { %8572 = vpow2.f32 %v4914_v23 }
 0xa36   : > { %v9997_v46 = vpop.eup %8560  ;;  %8574 = vpow2.f32 %v4916_v12 }
 0xa37   : > { %v9999_v26 = vpop.eup %8562  ;;  %8107 = vmatprep.mubr.msk.f32.mxu1 %vm1021_vm1, %v9997_v46 }
 0xa38   : > { %v5564_v8 = vpop.permute.xlu1 %5563  ;;  %v5473_v58 = vpop.permute.xlu0 %5472  ;;  %8108 = vmatmul.mubr.msk.f32.vlgmr.msra.gmra.mxu1 %vm1021_vm1, %v9999_v26 }
 0xa39   : > { %8116 = vmatpush3.msra.mxu1 %v9928_v39 }
 0xa3a   : > { %v10006_v2 = vpop.eup %8564  ;;  %8125 = vmatprep.subr.msk.mxu1 %vm684_vm0, %v5390_v63 }
 0xa3b   : > { %v10009_v15 = vpop.eup %8566  ;;  %8117 = vmatprep.mubr.msk.f32.mxu1 %vm1021_vm1, %v10006_v2 }
 0xa3c   : > { %v5562_v62 = vpop.permute.xlu1 %5561  ;;  %v5475_v10 = vpop.permute.xlu0 %5474  ;;  %8118 = vmatmul.mubr.msk.f32.vlgmr.msra.gmra.mxu1 %vm1021_vm1, %v10009_v15 }
 0xa3d   : > { %8126 = vmatpush3.xpose.msk.msra.mxu1 %vm684_vm0, %v5390_v63  ;;  %8127 = vmatprep.mubr.msk.f32.mxu1 %vm684_vm0, %v5386_v52 }
 0xa3e   : > { %v10017_v59 = vpop.eup %8568  ;;  %8135 = vmatprep.subr.msk.mxu1 %vm684_vm0, %v5564_v8 }
 0xa3f   : > { %v10020_v39 = vpop.eup %8570  ;;  %8102 = vmatprep.mubr.msk.f32.mxu0 %vm1021_vm1, %v10017_v59 }
 0xa40   : > { %v5560_v28 = vpop.permute.xlu0 %5559  ;;  %v5811_v7 = vpop.permute.xlu1 %5810  ;;  %8103 = vmatmul.mubr.msk.f32.vlgmr.msra.gmra.mxu0 %vm1021_vm1, %v10020_v39  ;;  %8128 = vmatmul.mubr.msk.f32.vlgmr.msra.gmra.mxu1 %vm684_vm0, %v5388_v38 }
 0xa41   : > { %8111 = vmatpush3.msra.mxu0 %v9936_v53  ;;  %8136 = vmatpush3.xpose.msk.msra.mxu1 %vm684_vm0, %v5564_v8 }
 0xa42   : > { %v10027_v47 = vpop.eup %8572  ;;  %8120 = vmatprep.subr.msk.mxu0 %vm684_vm0, %v9991_v41  ;;  %8137 = vmatprep.mubr.msk.f32.mxu1 %vm684_vm0, %v5560_v28 }
 0xa43   : > { %v10034_v13 = vpop.eup %8574  ;;  %8145 = vmatprep.subr.mxu1 %v5811_v7  ;;  %8112 = vmatprep.mubr.msk.f32.mxu0 %vm1021_vm1, %v10027_v47 }
 0xa44   : > { %v5727_v40 = vpop.permute.xlu0 %5726  ;;  %8113 = vmatmul.mubr.msk.f32.vlgmr.msra.gmra.mxu0 %vm1021_vm1, %v10034_v13  ;;  %8138 = vmatmul.mubr.msk.f32.vlgmr.msra.gmra.mxu1 %vm684_vm0, %v5562_v62  ;;  %v10054_v57 = vpop.permute.xlu1 %5894 }
 0xa45   : > { %8121 = vmatpush3.xpose.msk.msra.mxu0 %vm684_vm0, %v9991_v41  ;;  %8146 = vmatpush3.msra.mxu1 %v5811_v7 }
 0xa46   : > { %8122 = vmatprep.mubr.msk.f32.mxu0 %vm684_vm0, %v9993_v51  ;;  %8130 = vmatprep.subr.msk.mxu0 %vm684_vm0, %v5477_v16 }
 0xa48   : > { %v10046_v53 = vpop.permute.xlu0 %5978  ;;  %8123 = vmatmul.mubr.msk.f32.vlgmr.msra.gmra.mxu0 %vm684_vm0, %v9995_v11 }
 0xa49   : > { %8155 = vmatprep.subr.mxu1 %v10046_v53  ;;  %8131 = vmatpush3.xpose.msk.msra.mxu0 %vm684_vm0, %v5477_v16 }
 0xa4a   : > { %8132 = vmatprep.mubr.msk.f32.mxu0 %vm684_vm0, %v5473_v58  ;;  %8140 = vmatprep.subr.mxu0 %v5727_v40 }
 0xa4c   : > { %8133 = vmatmul.mubr.msk.f32.vlgmr.msra.gmra.mxu0 %vm684_vm0, %v5475_v10 }
 0xa4d   : > { %8141 = vmatpush3.msra.mxu0 %v5727_v40 }
 0xa4e   : > { %8150 = vmatprep.subr.mxu0 %v10054_v57 }
 0xaf8   : > { %v10057_v41 = vpop.f32.mrf.mxu1 }
 0xafa   : > { %v10059_v51 = vpop.f32.mrf.mxu1 }
 0xafc   : > { %v10061_v63 = vpop.f32.mrf.mxu1 }
 0xafd   : > { %10791 = vst [vmem:[#allocation81_spill] sm:$0xff] %v10061_v63 }
 0xafe   : > { %v10063_v11 = vpop.f32.mrf.mxu1 }
 0xaff   : > { %10792 = vst [vmem:[#allocation82_spill] sm:$0xff] %v10063_v11 }
 0xb00   : > { %v10065_v14 = vpop.f32.mrf.mxu0  ;;  %v8129_v0 = vpop.f32.mrf.mxu1 }
 0xb01   : > { %v5655_v3 = vsel %vm1021_vm1, %v8129_v0, -inf }
 0xb02   : > { %5656 = vmax.xlane.f32.xlu0 %v5655_v3  ;;  %v10068_v48 = vpop.f32.mrf.mxu0  ;;  %v5463_v52 = vpop.f32.mrf.mxu1 }
 0xb03   : > { %v5652_v12 = vsel %vm1021_vm1, %v5463_v52, -inf }
 0xb04   : > { %v10070_v6 = vpop.f32.mrf.mxu0  ;;  %v8139_v45 = vpop.f32.mrf.mxu1 }
 0xb05   : > { %10793 = vst [vmem:[#allocation83_spill] sm:$0xff] %v10070_v6  ;;  %v5667_v23 = vsel %vm1021_vm1, %v8139_v45, -inf }
 0xb06   : > { %5653 = vmax.xlane.f32.xlu0 %v5652_v12  ;;  %v10074_v38 = vpop.f32.mrf.mxu0  ;;  %5668 = vmax.xlane.f32.xlu1 %v5667_v23  ;;  %v5637_v16 = vpop.f32.mrf.mxu1 }
 0xb07   : > { %10794 = vst [vmem:[#allocation84_spill] sm:$0xff] %v10074_v38  ;;  %v5664_v62 = vsel %vm1021_vm1, %v5637_v16, -inf }
 0xb08   : > { %v8124_v8 = vpop.f32.mrf.mxu0 }
 0xb09   : > { %v5649_v58 = vsel %vm1021_vm1, %v8124_v8, -inf }
 0xb0a   : > { %v5376_v10 = vpop.f32.mrf.mxu0  ;;  %5650 = vmax.xlane.f32.xlu1 %v5649_v58  ;;  %5665 = vmax.xlane.f32.xlu0 %v5664_v62 }
 0xb0b   : > { %v5646_v40 = vsel %vm1021_vm1, %v5376_v10, -inf }
 0xb0c   : > { %v8134_v28 = vpop.f32.mrf.mxu0 }
 0xb0d   : > { %v5661_v7 = vsel %vm1021_vm1, %v8134_v28, -inf }
 0xb0e   : > { %v5550_v3 = vpop.f32.mrf.mxu0  ;;  %5662 = vmax.xlane.f32.xlu1 %v5661_v7  ;;  %5647 = vmax.xlane.f32.xlu0 %v5646_v40 }
 0xb0f   : > { %v5658_v12 = vsel %vm1021_vm1, %v5550_v3, -inf }
 0xb12   : > { %5659 = vmax.xlane.f32.xlu0 %v5658_v12 }
 0xb1f   : > { %6161 = vrot.lane.b32.xlu1 %v9265_v18, %s8964_s20  ;;  %v10101_v18 = vpop.permute.xlu1 %6074 }
 0xb23   : > { %6159 = vrot.lane.b32.xlu1 %v9277_v22, %s8964_s20 }
 0xb27   : > { %6244 = vrot.lane.b32.xlu1 %v9285_v25, %s8964_s20 }
 0xb28   : > { %6072 = vrot.lane.b32.xlu0 %v9252_v1, %s8964_s20  ;;  %v10103_v1 = vpop.permute.xlu1 %6070 }
 0xb2b   : > { %6335 = vrot.lane.b32.xlu1 %v9300_v30, %s8964_s20 }
 0xb2c   : > { %6157 = vrot.lane.b32.xlu0 %v9267_v19, %s8964_s20 }
 0xb2f   : > { %6333 = vrot.lane.b32.xlu1 %v9315_v33, %s8964_s20 }
 0xb30   : > { %6248 = vrot.lane.b32.xlu0 %v9281_v24, %s8964_s20 }
 0xb34   : > { %6246 = vrot.lane.b32.xlu0 %v9298_v29, %s8964_s20 }
 0xb38   : > { %6331 = vrot.lane.b32.xlu0 %v9302_v31, %s8964_s20 }
 0xb8b   : > { %v5657_v22 = vpop.xlane.xlu0 %5656 }
 0xb8c   : > { %v5673_v25 = vsub.f32 %v8129_v0, %v5657_v22 }
 0xb8e   : > { %v5684_v58 = vmul.f32 1.442695, %v5673_v25 }
 0xb8f   : > { %v5669_v30 = vpop.xlane.xlu1 %5668  ;;  %v5654_v19 = vpop.xlane.xlu0 %5653 }
 0xb90   : > { %v5672_v23 = vsub.f32 %v5463_v52, %v5654_v19  ;;  %v5677_v33 = vsub.f32 %v8139_v45, %v5669_v30 }
 0xb92   : > { %v5682_v62 = vmul.f32 1.442695, %v5672_v23  ;;  %v5692_v29 = vmul.f32 1.442695, %v5677_v33 }
 0xb93   : > { %v5651_v7 = vpop.xlane.xlu1 %5650  ;;  %v5666_v24 = vpop.xlane.xlu0 %5665 }
 0xb94   : > { %v5676_v40 = vsub.f32 %v5637_v16, %v5666_v24  ;;  %8576 = vpow2.f32 %v5682_v62  ;;  %v5671_v12 = vsub.f32 %v8124_v8, %v5651_v7 }
 0xb95   : > { %8578 = vpow2.f32 %v5684_v58 }
 0xb96   : > { %v5690_v31 = vmul.f32 1.442695, %v5676_v40  ;;  %v5680_v0 = vmul.f32 1.442695, %v5671_v12 }
 0xb97   : > { %v5663_v11 = vpop.xlane.xlu1 %5662  ;;  %v5648_v63 = vpop.xlane.xlu0 %5647 }
 0xb98   : > { %v5670_v6 = vsub.f32 %v5376_v10, %v5648_v63  ;;  %8580 = vpow2.f32 %v5690_v31  ;;  %v5675_v22 = vsub.f32 %v8134_v28, %v5663_v11 }
 0xb99   : > { %8582 = vpow2.f32 %v5692_v29 }
 0xb9a   : > { %v5678_v38 = vmul.f32 1.442695, %v5670_v6  ;;  %v5688_v30 = vmul.f32 1.442695, %v5675_v22 }
 0xb9b   : > { %v6162_v52 = vpop.permute.xlu1 %6161  ;;  %v5660_v25 = vpop.xlane.xlu0 %5659 }
 0xb9c   : > { %v5674_v45 = vsub.f32 %v5550_v3, %v5660_v25  ;;  %8584 = vpow2.f32 %v5678_v38 }
 0xb9d   : > { %8586 = vpow2.f32 %v5680_v0 }
 0xb9e   : > { %v5686_v16 = vmul.f32 1.442695, %v5674_v45 }
 0xb9f   : > { %v6160_v19 = vpop.permute.xlu1 %6159  ;;  %v6073_v23 = vpop.permute.xlu0 %6072 }
 0xba0   : > { %8588 = vpow2.f32 %v5686_v16 }
 0xba1   : > { %v10105_v8 = vpop.eup %8576  ;;  %8590 = vpow2.f32 %v5688_v30 }
 0xba2   : > { %v10107_v58 = vpop.eup %8578  ;;  %8147 = vmatprep.mubr.msk.f32.mxu1 %vm1021_vm1, %v10105_v8 }
 0xba3   : > { %v6245_v63 = vpop.permute.xlu1 %6244  ;;  %v6158_v11 = vpop.permute.xlu0 %6157  ;;  %8148 = vmatmul.mubr.msk.f32.vlgmr.msra.gmra.mxu1 %vm1021_vm1, %v10107_v58 }
 0xba4   : > { %8156 = vmatpush3.msra.mxu1 %v10046_v53 }
 0xba5   : > { %v10114_v6 = vpop.eup %8580  ;;  %8165 = vmatprep.subr.msk.mxu1 %vm684_vm0, %v6162_v52 }
 0xba6   : > { %v10117_v38 = vpop.eup %8582  ;;  %8157 = vmatprep.mubr.msk.f32.mxu1 %vm1021_vm1, %v10114_v6 }
 0xba7   : > { %v6336_v10 = vpop.permute.xlu1 %6335  ;;  %v6249_v28 = vpop.permute.xlu0 %6248  ;;  %8158 = vmatmul.mubr.msk.f32.vlgmr.msra.gmra.mxu1 %vm1021_vm1, %v10117_v38 }
 0xba8   : > { %8166 = vmatpush3.xpose.msk.msra.mxu1 %vm684_vm0, %v6162_v52  ;;  %8167 = vmatprep.mubr.msk.f32.mxu1 %vm684_vm0, %v6158_v11 }
 0xba9   : > { %v10125_v3 = vpop.eup %8584  ;;  %8175 = vmatprep.subr.msk.mxu1 %vm684_vm0, %v6336_v10 }
 0xbaa   : > { %v10128_v53 = vpop.eup %8586  ;;  %8142 = vmatprep.mubr.msk.f32.mxu0 %vm1021_vm1, %v10125_v3 }
 0xbab   : > { %v6247_v33 = vpop.permute.xlu0 %6246  ;;  %8143 = vmatmul.mubr.msk.f32.vlgmr.msra.gmra.mxu0 %vm1021_vm1, %v10128_v53  ;;  %8168 = vmatmul.mubr.msk.f32.vlgmr.msra.gmra.mxu1 %vm684_vm0, %v6160_v19  ;;  %v6334_v40 = vpop.permute.xlu1 %6333 }
 0xbac   : > { %8151 = vmatpush3.msra.mxu0 %v10054_v57  ;;  %8176 = vmatpush3.xpose.msk.msra.mxu1 %vm684_vm0, %v6336_v10 }
 0xbad   : > { %v10135_v62 = vpop.eup %8588  ;;  %8160 = vmatprep.subr.msk.mxu0 %vm684_vm0, %v10101_v18 }
 0xbae   : > { %8152 = vmatprep.mubr.msk.f32.mxu0 %vm1021_vm1, %v10135_v62  ;;  %v10143_v7 = vpop.eup %8590 }
 0xbaf   : > { %v6332_v24 = vpop.permute.xlu0 %6331  ;;  %8153 = vmatmul.mubr.msk.f32.vlgmr.msra.gmra.mxu0 %vm1021_vm1, %v10143_v7 }
 0xbb0   : > { %8177 = vmatprep.mubr.msk.f32.mxu1 %vm684_vm0, %v6332_v24  ;;  %8161 = vmatpush3.xpose.msk.msra.mxu0 %vm684_vm0, %v10101_v18 }
 0xbb1   : > { %8162 = vmatprep.mubr.msk.f32.mxu0 %vm684_vm0, %v10103_v1  ;;  %8170 = vmatprep.subr.msk.mxu0 %vm684_vm0, %v6249_v28 }
 0xbb2   : > { %8178 = vmatmul.mubr.msk.f32.vlgmr.msra.gmra.mxu1 %vm684_vm0, %v6334_v40 }
 0xbb3   : > { %8163 = vmatmul.mubr.msk.f32.vlgmr.msra.gmra.mxu0 %vm684_vm0, %v6073_v23 }
 0xbb4   : > { %8171 = vmatpush3.xpose.msk.msra.mxu0 %vm684_vm0, %v6249_v28  ;;  %8172 = vmatprep.mubr.msk.f32.mxu0 %vm684_vm0, %v6245_v63 }
 0xbb7   : > { %8173 = vmatmul.mubr.msk.f32.vlgmr.msra.gmra.mxu0 %vm684_vm0, %v6247_v33 }
 0xc63   : > { %v10158_v57 = vpop.f32.mrf.mxu1 }
 0xc65   : > { %v10160_v29 = vpop.f32.mrf.mxu1 }
 0xc67   : > { %v10162_v18 = vpop.f32.mrf.mxu1 }
 0xc69   : > { %v10164_v12 = vpop.f32.mrf.mxu1 }
 0xc6b   : > { %v10166_v1 = vpop.f32.mrf.mxu0  ;;  %v10168_v31 = vpop.f32.mrf.mxu1 }
 0xc6c   : > { %v6427_v0 = vsel %vm1021_vm1, %v10168_v31, -inf }
 0xc6d   : > { %v10172_v22 = vpop.f32.mrf.mxu0  ;;  %6428 = vmax.xlane.f32.xlu0 %v6427_v0  ;;  %v10174_v52 = vpop.f32.mrf.mxu1 }
 0xc6e   : > { %v6424_v45 = vsel %vm1021_vm1, %v10174_v52, -inf }
 0xc6f   : > { %v10176_v25 = vpop.f32.mrf.mxu0 }
 0xc71   : > { %v10180_v30 = vpop.f32.mrf.mxu0  ;;  %6425 = vmax.xlane.f32.xlu0 %v6424_v45 }
 0xc72   : > { %v10182_v16 = vpop.f32.mrf.mxu1 }
 0xc73   : > { %v6439_v19 = vsel %vm1021_vm1, %v10182_v16, -inf  ;;  %v10186_v23 = vpop.f32.mrf.mxu0 }
 0xc74   : > { %6440 = vmax.xlane.f32.xlu1 %v6439_v19  ;;  %v10188_v63 = vpop.f32.mrf.mxu1  ;;  %v6421_v28 = vsel %vm1021_vm1, %v10186_v23, -inf  ;;  %v1830_v19 = vsel %vm1021_vm1, %v9534_v20, 0.0  ;;  %v1836_v20 = vsel %vm1021_vm1, %v9513_v43, 0.0  ;;  %v1839_v43 = vsel %vm1021_vm1, %v9515_v44, 0.0 }
 0xc75   : > { %v6436_v11 = vsel %vm1021_vm1, %v10188_v63, -inf  ;;  %v10192_v10 = vpop.f32.mrf.mxu0  ;;  %v4156_v44 = vsel %vm1021_vm1, %v9879_v17, 0.0  ;;  %v4159_v17 = vsel %vm1021_vm1, %v9881_v9, 0.0 }
 0xc76   : > { %6437 = vmax.xlane.f32.xlu0 %v6436_v11  ;;  %v6418_v24 = vsel %vm1021_vm1, %v10192_v10, -inf  ;;  %v2606_v11 = vsel %vm1021_vm1, %v9653_v37, 0.0  ;;  %v4922_v37 = vsel %vm1021_vm1, %v10017_v59, 0.0  ;;  %v5697_v59 = vsel %vm1021_vm1, %v10128_v53, 0.0  ;;  %v10795_v53 = vld [vmem:[#allocation37_spill] sm:$0xff] }
 0xc77   : > { %v10196_v33 = vpop.f32.mrf.mxu0 }
 0xc78   : > { %6422 = vmax.xlane.f32.xlu1 %v6421_v28  ;;  %v6433_v0 = vsel %vm1021_vm1, %v10196_v33, -inf  ;;  %v10796_v28 = vld [vmem:[#allocation59_spill] sm:$0xff] }
 0xc79   : > { %v10200_v40 = vpop.f32.mrf.mxu0  ;;  %v3390_v9 = vsel %vm1021_vm1, %v10796_v28, 0.0 }
 0xc7a   : > { %6419 = vmax.xlane.f32.xlu0 %v6418_v24  ;;  %v6430_v45 = vsel %vm1021_vm1, %v10200_v40, -inf  ;;  %v10797_v24 = vld [vmem:[#allocation48_spill] sm:$0xff] }
 0xc7c   : > { %6434 = vmax.xlane.f32.xlu1 %v6433_v0  ;;  %v5703_v0 = vsel %vm1021_vm1, %v10107_v58, 0.0 }
 0xc7e   : > { %6431 = vmax.xlane.f32.xlu0 %v6430_v45  ;;  %v10798_v45 = vld [vmem:[#allocation60_spill] sm:$0xff] }
 0xc8d   : > { %6582 = vrot.lane.b32.xlu1 %v9318_v34, %s8964_s20  ;;  %v1833_v34 = vsel %vm1021_vm1, %v9537_v54, 0.0  ;;  %v4150_v54 = vsel %vm1021_vm1, %v9899_v42, 0.0  ;;  %v4925_v42 = vsel %vm1021_vm1, %v10020_v39, 0.0  ;;  %v1842_v39 = vsel %vm1021_vm1, %v9546_v36, 0.0 }
 0xc8e   : > { %v1845_v36 = vsel %vm1021_vm1, %v10795_v53, 0.0 }
 0xc91   : > { %6666 = vrot.lane.b32.xlu1 %v9288_v27, %s8964_s20  ;;  %v2609_v27 = vsel %vm1021_vm1, %v9657_v5, 0.0  ;;  %v4153_v5 = vsel %vm1021_vm1, %v9902_v56, 0.0  ;;  %v3384_v56 = vsel %vm1021_vm1, %v9757_v21, 0.0  ;;  %v3387_v21 = vsel %vm1021_vm1, %v9759_v50, 0.0 }
 0xc92   : > { %v5700_v50 = vsel %vm1021_vm1, %v10105_v8, 0.0  ;;  %v3393_v8 = vsel %vm1021_vm1, %v10798_v45, 0.0  ;;  %v4937_v45 = vsel %vm1021_vm1, %v10034_v13, 0.0  ;;  %v4934_v13 = vsel %vm1021_vm1, %v10027_v47, 0.0 }
 0xc93   : > { %v4940_v47 = vsel %vm1021_vm1, %v10006_v2, 0.0 }
 0xc94   : > { %6498 = vrot.lane.b32.xlu0 %v9305_v32, %s8964_s20  ;;  %v3381_v32 = vsel %vm1021_vm1, %v9780_v35, 0.0  ;;  %v5694_v35 = vsel %vm1021_vm1, %v10125_v3, 0.0  ;;  %v2618_v3 = vsel %vm1021_vm1, %v9666_v4, 0.0  ;;  %v2621_v4 = vsel %vm1021_vm1, %v10797_v24, 0.0 }
 0xc95   : > { %6750 = vrot.lane.b32.xlu1 %v9382_v55, %s8964_s20  ;;  %v3378_v55 = vsel %vm1021_vm1, %v9777_v49, 0.0  ;;  %v2612_v49 = vsel %vm1021_vm1, %v9635_v60, 0.0  ;;  %v2615_v60 = vsel %vm1021_vm1, %v9637_v61, 0.0  ;;  %v4928_v61 = vsel %vm1021_vm1, %v9997_v46, 0.0 }
 0xc96   : > { %v4931_v46 = vsel %vm1021_vm1, %v9999_v26, 0.0 }
 0xcb3   : > { %1831 = vadd.xlane.f32.xlu0 %v1830_v19 }
 0xcb7   : > { %2607 = vadd.xlane.f32.xlu0 %v2606_v11 }
 0xcb9   : > { %1834 = vadd.xlane.f32.xlu1 %v1833_v34 }
 0xcbb   : > { %2610 = vadd.xlane.f32.xlu0 %v2609_v27 }
 0xcbd   : > { %3382 = vadd.xlane.f32.xlu1 %v3381_v32 }
 0xcbf   : > { %3379 = vadd.xlane.f32.xlu0 %v3378_v55 }
 0xcc1   : > { %1837 = vadd.xlane.f32.xlu1 %v1836_v20 }
 0xcc3   : > { %4151 = vadd.xlane.f32.xlu0 %v4150_v54 }
 0xcc5   : > { %4923 = vadd.xlane.f32.xlu1 %v4922_v37 }
 0xcc7   : > { %4154 = vadd.xlane.f32.xlu0 %v4153_v5 }
 0xcc9   : > { %2613 = vadd.xlane.f32.xlu1 %v2612_v49 }
 0xccb   : > { %1840 = vadd.xlane.f32.xlu0 %v1839_v43 }
 0xccd   : > { %5695 = vadd.xlane.f32.xlu1 %v5694_v35 }
 0xccf   : > { %4926 = vadd.xlane.f32.xlu0 %v4925_v42 }
 0xcd1   : > { %3385 = vadd.xlane.f32.xlu1 %v3384_v56 }
 0xcd3   : > { %2616 = vadd.xlane.f32.xlu0 %v2615_v60 }
 0xcd5   : > { %4157 = vadd.xlane.f32.xlu1 %v4156_v44 }
 0xcd7   : > { %5698 = vadd.xlane.f32.xlu0 %v5697_v59 }
 0xcd9   : > { %1843 = vadd.xlane.f32.xlu1 %v1842_v39 }
 0xcdb   : > { %3388 = vadd.xlane.f32.xlu0 %v3387_v21 }
 0xcdd   : > { %4929 = vadd.xlane.f32.xlu1 %v4928_v61 }
 0xcdf   : > { %4160 = vadd.xlane.f32.xlu0 %v4159_v17 }
 0xce1   : > { %2619 = vadd.xlane.f32.xlu1 %v2618_v3 }
 0xce3   : > { %1846 = vadd.xlane.f32.xlu0 %v1845_v36 }
 0xce5   : > { %5701 = vadd.xlane.f32.xlu1 %v5700_v50  ;;  %v10800_v50 = vld [vmem:[#allocation36_spill] sm:$0xff] }
 0xce7   : > { %4932 = vadd.xlane.f32.xlu0 %v4931_v46  ;;  %v1851_v46 = vsel %vm1021_vm1, %v10800_v50, 0.0 }
 0xce9   : > { %3391 = vadd.xlane.f32.xlu1 %v3390_v9  ;;  %v10801_v9 = vld [vmem:[#allocation71_spill] sm:$0xff] }
 0xcea   : > { %v4162_v24 = vsel %vm1021_vm1, %v10801_v9, 0.0  ;;  %v10815_v9 = vld [vmem:[#allocation24_spill] sm:$0xff] }
 0xceb   : > { %2622 = vadd.xlane.f32.xlu0 %v2621_v4 }
 0xcef   : > { %5704 = vadd.xlane.f32.xlu0 %v5703_v0 }
 0xcf3   : > { %3394 = vadd.xlane.f32.xlu0 %v3393_v8  ;;  %v10802_v8 = vld [vmem:[#allocation35_spill] sm:$0xff] }
 0xcf6   : > { %v6429_v19 = vpop.xlane.xlu0 %6428 }
 0xcf7   : > { %v6445_v26 = vsub.f32 %v10168_v31, %v6429_v19  ;;  %v1848_v19 = vsel %vm1021_vm1, %v10802_v8, 0.0 }
 0xcf9   : > { %v6456_v11 = vmul.f32 1.442695, %v6445_v26 }
 0xcfa   : > { %v6426_v34 = vpop.xlane.xlu0 %6425 }
 0xcfb   : > { %8592 = vpow2.f32 %v6456_v11  ;;  %v6444_v27 = vsub.f32 %v10174_v52, %v6426_v34  ;;  %v10803_v34 = vld [vmem:[#allocation47_spill] sm:$0xff] }
 0xcfd   : > { %v6441_v32 = vpop.xlane.xlu1 %6440  ;;  %v6454_v55 = vmul.f32 1.442695, %v6444_v27  ;;  %v2627_v27 = vsel %vm1021_vm1, %v10803_v34, 0.0 }
 0xcfe   : > { %v6449_v20 = vsub.f32 %v10182_v16, %v6441_v32  ;;  %v5709_v32 = vsel %vm1021_vm1, %v10143_v7, 0.0 }
 0xcff   : > { %v6438_v54 = vpop.xlane.xlu0 %6437  ;;  %8594 = vpow2.f32 %v6454_v55  ;;  %v10804_v55 = vld [vmem:[#allocation46_spill] sm:$0xff] }
 0xd00   : > { %v6448_v58 = vsub.f32 %v10188_v63, %v6438_v54  ;;  %v6464_v5 = vmul.f32 1.442695, %v6449_v20  ;;  %v2624_v20 = vsel %vm1021_vm1, %v10804_v55, 0.0  ;;  %v10805_v54 = vld [vmem:[#allocation58_spill] sm:$0xff] }
 0xd01   : > { %v6423_v37 = vpop.xlane.xlu1 %6422 }
 0xd02   : > { %v6462_v49 = vmul.f32 1.442695, %v6448_v58  ;;  %v6443_v43 = vsub.f32 %v10186_v23, %v6423_v37  ;;  %v3399_v58 = vsel %vm1021_vm1, %v10805_v54, 0.0  ;;  %v5706_v37 = vsel %vm1021_vm1, %v10135_v62, 0.0  ;;  %v10808_v62 = vld [vmem:[#allocation70_spill] sm:$0xff] }
 0xd03   : > { %v6420_v35 = vpop.xlane.xlu0 %6419 }
 0xd04   : > { %8596 = vpow2.f32 %v6462_v49  ;;  %v6442_v31 = vsub.f32 %v10192_v10, %v6420_v35  ;;  %v6452_v42 = vmul.f32 1.442695, %v6443_v43  ;;  %v5712_v49 = vsel %vm1021_vm1, %v10114_v6, 0.0  ;;  %v10807_v43 = vld [vmem:[#allocation69_spill] sm:$0xff]  ;;  %v10809_v6 = vld [vmem:[#allocation19_spill] sm:$0xff] }
 0xd05   : > { %v6435_v56 = vpop.xlane.xlu1 %6434  ;;  %8598 = vpow2.f32 %v6464_v5  ;;  %v10806_v5 = vld [vmem:[#allocation57_spill] sm:$0xff]  ;;  %v4168_v35 = vsel %vm1021_vm1, %v10807_v43, 0.0 }
 0xd06   : > { %v6450_v52 = vmul.f32 1.442695, %v6442_v31  ;;  %v6447_v60 = vsub.f32 %v10196_v33, %v6435_v56  ;;  %v3396_v7 = vsel %vm1021_vm1, %v10806_v5, 0.0  ;;  %v4943_v56 = vsel %vm1021_vm1, %v10009_v15, 0.0 }
 0xd07   : > { %v6432_v16 = vpop.xlane.xlu0 %6431 }
 0xd08   : > { %8600 = vpow2.f32 %v6450_v52  ;;  %v6446_v44 = vsub.f32 %v10200_v40, %v6432_v16  ;;  %v8593_v63 = vpop.eup %8592  ;;  %v6460_v59 = vmul.f32 1.442695, %v6447_v60  ;;  %v10799_v40 = vld [vmem:[#allocation72_spill] sm:$0xff]  ;;  %v1070_v52 = vsel %vm1021_vm1, %v10809_v6, 0.0  ;;  %v10820_v6 = vld [vmem:[#allocation54_spill] sm:$0xff] }
 0xd09   : > { %8602 = vpow2.f32 %v6452_v42  ;;  %v6583_v39 = vpop.permute.xlu1 %6582  ;;  %v6475_v23 = vsel %vm1021_vm1, %v8593_v63, 0.0  ;;  %v4165_v17 = vsel %vm1021_vm1, %v10799_v40, 0.0  ;;  %v4171_v42 = vsel %vm1021_vm1, %v10808_v62, 0.0 }
 0xd0a   : > { %v6458_v21 = vmul.f32 1.442695, %v6446_v44  ;;  %8185 = vmatprep.subr.mxu1 %v6583_v39  ;;  %6476 = vadd.xlane.f32.xlu0 %v6475_v23  ;;  %v5715_v60 = vsel %vm1021_vm1, %v10117_v38, 0.0  ;;  %v10812_v38 = vld [vmem:[#allocation23_spill] sm:$0xff] }
 0xd0b   : > { %8186 = vmatpush3.msra.mxu1 %v6583_v39  ;;  %v6499_v10 = vpop.permute.xlu0 %6498  ;;  %v10811_v39 = vld [vmem:[#allocation20_spill] sm:$0xff] }
 0xd0c   : > { %8604 = vpow2.f32 %v6458_v21  ;;  %8180 = vmatprep.subr.mxu0 %v6499_v10  ;;  %v8595_v61 = vpop.eup %8594  ;;  %v1073_v21 = vsel %vm1021_vm1, %v10811_v39, 0.0 }
 0xd0d   : > { %8606 = vpow2.f32 %v6460_v59  ;;  %v6667_v33 = vpop.permute.xlu1 %6666  ;;  %8181 = vmatpush3.msra.mxu0 %v6499_v10  ;;  %8187 = vmatprep.mubr.msk.f32.mxu1 %vm1021_vm1, %v8595_v61  ;;  %v6472_v3 = vsel %vm1021_vm1, %v8595_v61, 0.0  ;;  %v10810_v59 = vld [vmem:[#allocation21_spill] sm:$0xff]  ;;  %v1082_v61 = vsel %vm1021_vm1, %v10812_v38, 0.0 }
 0xd0e   : > { %8190 = vmatprep.subr.mxu0 %v6667_v33  ;;  %4166 = vadd.xlane.f32.xlu0 %v4165_v17  ;;  %v1076_v15 = vsel %vm1021_vm1, %v10810_v59, 0.0 }
 0xd0f   : > { %8188 = vmatmul.mubr.msk.f32.vlgmr.msra.gmra.mxu1 %vm1021_vm1, %v8593_v63  ;;  %6473 = vadd.xlane.f32.xlu1 %v6472_v3  ;;  %v10813_v3 = vld [vmem:[#allocation25_spill] sm:$0xff] }
 0xd11   : > { %v8597_v53 = vpop.eup %8596  ;;  %v6751_v36 = vpop.permute.xlu1 %6750 }
 0xd12   : > { %8195 = vmatprep.subr.mxu1 %v6751_v36  ;;  %8197 = vmatprep.mubr.msk.f32.mxu1 %vm1021_vm1, %v8597_v53  ;;  %v8599_v28 = vpop.eup %8598  ;;  %v6484_v31 = vsel %vm1021_vm1, %v8597_v53, 0.0  ;;  %v1088_v53 = vsel %vm1021_vm1, %v10813_v3, 0.0 }
 0xd13   : > { %1852 = vadd.xlane.f32.xlu0 %v1851_v46  ;;  %8196 = vmatpush3.msra.mxu1 %v6751_v36  ;;  %v6487_v44 = vsel %vm1021_vm1, %v8599_v28, 0.0  ;;  %v10814_v36 = vld [vmem:[#allocation22_spill] sm:$0xff] }
 0xd14   : > { %4163 = vadd.xlane.f32.xlu1 %v4162_v24  ;;  %8198 = vmatmul.mubr.msk.f32.vlgmr.msra.gmra.mxu1 %vm1021_vm1, %v8599_v28  ;;  %v1079_v50 = vsel %vm1021_vm1, %v10814_v36, 0.0  ;;  %v1085_v24 = vsel %vm1021_vm1, %v10815_v9, 0.0  ;;  %v10825_v36 = vld [vmem:[#allocation77_spill] sm:$0xff] }
 0xd15   : > { %v8601_v4 = vpop.eup %8600 }
 0xd16   : > { %v8603_v0 = vpop.eup %8602  ;;  %8182 = vmatprep.mubr.msk.f32.mxu0 %vm1021_vm1, %v8601_v4 }
 0xd17   : > { %4938 = vadd.xlane.f32.xlu0 %v4937_v45  ;;  %8183 = vmatmul.mubr.msk.f32.vlgmr.msra.gmra.mxu0 %vm1021_vm1, %v8603_v0  ;;  %v6469_v2 = vsel %vm1021_vm1, %v8603_v0, 0.0  ;;  %v10816_v45 = vld [vmem:[#allocation26_spill] sm:$0xff] }
 0xd18   : > { %1849 = vadd.xlane.f32.xlu1 %v1848_v19  ;;  %8191 = vmatpush3.msra.mxu0 %v6667_v33  ;;  %v6466_v33 = vsel %vm1021_vm1, %v8601_v4, 0.0  ;;  %v1091_v8 = vsel %vm1021_vm1, %v10816_v45, 0.0 }
 0xd19   : > { %v10300_v26 = vpop.eup %8604 }
 0xd1a   : > { %v8607_v11 = vpop.eup %8606  ;;  %8192 = vmatprep.mubr.msk.f32.mxu0 %vm1021_vm1, %v10300_v26  ;;  %v6478_v34 = vsel %vm1021_vm1, %v10300_v26, 0.0 }
 0xd1b   : > { %2628 = vadd.xlane.f32.xlu0 %v2627_v27  ;;  %8193 = vmatmul.mubr.msk.f32.vlgmr.msra.gmra.mxu0 %vm1021_vm1, %v8607_v11  ;;  %v6481_v16 = vsel %vm1021_vm1, %v8607_v11, 0.0 }
 0xd1c   : > { %4935 = vadd.xlane.f32.xlu1 %v4934_v13 }
 0xd1f   : > { %5710 = vadd.xlane.f32.xlu0 %v5709_v32 }
 0xd20   : > { %2625 = vadd.xlane.f32.xlu1 %v2624_v20  ;;  %v10817_v20 = vld [vmem:[#allocation42_spill] sm:$0xff] }
 0xd23   : > { %3400 = vadd.xlane.f32.xlu0 %v3399_v58 }
 0xd24   : > { %5707 = vadd.xlane.f32.xlu1 %v5706_v37  ;;  %v10818_v37 = vld [vmem:[#allocation43_spill] sm:$0xff] }
 0xd27   : > { %4941 = vadd.xlane.f32.xlu0 %v4940_v47 }
 0xd28   : > { %3397 = vadd.xlane.f32.xlu1 %v3396_v7 }
 0xd2b   : > { %5713 = vadd.xlane.f32.xlu0 %v5712_v49 }
 0xd2c   : > { %4169 = vadd.xlane.f32.xlu1 %v4168_v35 }
 0xd2f   : > { %6485 = vadd.xlane.f32.xlu0 %v6484_v31  ;;  %v10819_v31 = vld [vmem:[#allocation53_spill] sm:$0xff] }
 0xd30   : > { %4172 = vadd.xlane.f32.xlu1 %v4171_v42 }
 0xd33   : > { %6470 = vadd.xlane.f32.xlu0 %v6469_v2 }
 0xd34   : > { %4944 = vadd.xlane.f32.xlu1 %v4943_v56 }
 0xd37   : > { %1071 = vadd.xlane.f32.xlu0 %v1070_v52 }
 0xd38   : > { %5716 = vadd.xlane.f32.xlu1 %v5715_v60 }
 0xd3b   : > { %6482 = vadd.xlane.f32.xlu0 %v6481_v16 }
 0xd3c   : > { %6488 = vadd.xlane.f32.xlu1 %v6487_v44  ;;  %v1832_v63 = vpop.xlane.xlu0 %1831 }
 0xd3f   : > { %1077 = vadd.xlane.f32.xlu0 %v1076_v15  ;;  %v10821_v15 = vld [vmem:[#allocation39_spill] sm:$0xff] }
 0xd40   : > { %1074 = vadd.xlane.f32.xlu1 %v1073_v21  ;;  %v2608_v23 = vpop.xlane.xlu0 %2607  ;;  %v10822_v21 = vld [vmem:[#allocation38_spill] sm:$0xff] }
 0xd42   : > { %v1835_v10 = vpop.xlane.xlu1 %1834 }
 0xd43   : > { %1083 = vadd.xlane.f32.xlu0 %v1082_v61  ;;  %8608 = vrcp.f32 %v1835_v10  ;;  %v10823_v10 = vld [vmem:[#allocation66_spill] sm:$0xff] }
 0xd44   : > { %6467 = vadd.xlane.f32.xlu1 %v6466_v33  ;;  %v2611_v40 = vpop.xlane.xlu0 %2610  ;;  %8610 = vrcp.f32 %v1832_v63 }
 0xd45   : > { %8612 = vrcp.f32 %v2611_v40 }
 0xd46   : > { %v3383_v17 = vpop.xlane.xlu1 %3382  ;;  %8614 = vrcp.f32 %v2608_v23 }
 0xd47   : > { %1089 = vadd.xlane.f32.xlu0 %v1088_v53 }
 0xd48   : > { %1080 = vadd.xlane.f32.xlu1 %v1079_v50  ;;  %v3380_v46 = vpop.xlane.xlu0 %3379 }
 0xd49   : > { %8616 = vrcp.f32 %v3380_v46 }
 0xd4a   : > { %v1838_v28 = vpop.xlane.xlu1 %1837 }
 0xd4b   : > { %8618 = vrcp.f32 %v1838_v28 }
 0xd4c   : > { %1086 = vadd.xlane.f32.xlu1 %v1085_v24  ;;  %v4152_v4 = vpop.xlane.xlu0 %4151  ;;  %8620 = vrcp.f32 %v3383_v17  ;;  %v10824_v17 = vld [vmem:[#allocation65_spill] sm:$0xff] }
 0xd4e   : > { %v4924_v0 = vpop.xlane.xlu1 %4923 }
 0xd50   : > { %1092 = vadd.xlane.f32.xlu1 %v1091_v8  ;;  %v4155_v19 = vpop.xlane.xlu0 %4154  ;;  %v8609_v27 = vpop.eup %8608 }
 0xd51   : > { %v8611_v32 = vpop.eup %8610  ;;  %v2203_v54 = vmul.f32 %v8609_v27, %v10817_v20  ;;  %v10828_v27 = vld [vmem:[#allocation49_spill] sm:$0xff] }
 0xd52   : > { %v2614_v11 = vpop.xlane.xlu1 %2613  ;;  %v2202_v47 = vmul.f32 %v8611_v32, %v10818_v37  ;;  %v8613_v7 = vpop.eup %8612 }
 0xd53   : > { %v8615_v43 = vpop.eup %8614  ;;  %v2975_v62 = vmul.f32 %v8613_v7, %v10819_v31 }
 0xd54   : > { %6479 = vadd.xlane.f32.xlu1 %v6478_v34  ;;  %v1841_v13 = vpop.xlane.xlu0 %1840  ;;  %v8340_v49 = vpack.i.bf16 %v2203_v54, %v2202_v47  ;;  %v2974_v52 = vmul.f32 %v8615_v43, %v10820_v6 }
 0xd55   : > { %8622 = vrcp.f32 %v1841_v13 }
 0xd56   : > { %8624 = vrcp.f32 %v4155_v19  ;;  %v5696_v55 = vpop.xlane.xlu1 %5695  ;;  %v8617_v42 = vpop.eup %8616  ;;  %v8345_v63 = vpack.i.bf16 %v2975_v62, %v2974_v52  ;;  %v10829_v62 = vld [vmem:[#allocation62_spill] sm:$0xff] }
 0xd57   : > { %8626 = vrcp.f32 %v4152_v4  ;;  %v3746_v38 = vmul.f32 %v8617_v42, %v10823_v10  ;;  %v10826_v4 = vld [vmem:[#allocation78_spill] sm:$0xff]  ;;  %v10830_v42 = vld [vmem:[#allocation61_spill] sm:$0xff] }
 0xd58   : > { %v4927_v58 = vpop.xlane.xlu0 %4926  ;;  %8628 = vrcp.f32 %v2614_v11  ;;  %v8619_v2 = vpop.eup %8618  ;;  %v10827_v11 = vld [vmem:[#allocation50_spill] sm:$0xff] }
 0xd59   : > { %8630 = vrcp.f32 %v4927_v58  ;;  %v8621_v60 = vpop.eup %8620  ;;  %v2204_v39 = vmul.f32 %v8619_v2, %v10821_v15  ;;  %v10831_v52 = vld [vmem:[#allocation74_spill] sm:$0xff] }
 0xd5a   : > { %v3386_v5 = vpop.xlane.xlu1 %3385  ;;  %8632 = vrcp.f32 %v4924_v0  ;;  %v3747_v3 = vmul.f32 %v8621_v60, %v10824_v17 }
 0xd5c   : > { %v2617_v26 = vpop.xlane.xlu0 %2616  ;;  %v8350_v28 = vpack.i.bf16 %v3747_v3, %v3746_v38  ;;  %v10834_v38 = vld [vmem:[#allocation44_spill] sm:$0xff] }
 0xd5d   : > { %8634 = vrcp.f32 %v2617_v26  ;;  %8341 = vrot.lane.b32.xlu0 %v8340_v49, %s8964_s20 }
 0xd5e   : > { %v4158_v35 = vpop.xlane.xlu1 %4157  ;;  %8636 = vrcp.f32 %v5696_v55 }
 0xd60   : > { %v5699_v56 = vpop.xlane.xlu0 %5698 }
 0xd61   : > { %8638 = vrcp.f32 %v5699_v56 }
 0xd62   : > { %v8623_v16 = vpop.eup %8622  ;;  %v1844_v44 = vpop.xlane.xlu1 %1843  ;;  %8640 = vrcp.f32 %v3386_v5 }
 0xd63   : > { %v8625_v59 = vpop.eup %8624  ;;  %v2205_v23 = vmul.f32 %v8623_v16, %v10822_v21  ;;  %v10832_v16 = vld [vmem:[#allocation73_spill] sm:$0xff] }
 0xd64   : > { %v3389_v61 = vpop.xlane.xlu0 %3388  ;;  %v8627_v33 = vpop.eup %8626  ;;  %v4519_v50 = vmul.f32 %v8625_v59, %v10825_v36 }
 0xd65   : > { %8346 = vrot.lane.b32.xlu1 %v8345_v63, %s8963_s23  ;;  %8642 = vrcp.f32 %v3389_v61  ;;  %v8360_v40 = vpack.i.bf16 %v2205_v23, %v2204_v39  ;;  %v8629_v46 = vpop.eup %8628  ;;  %v4518_v0 = vmul.f32 %v8627_v33, %v10826_v4  ;;  %v10833_v23 = vld [vmem:[#allocation45_spill] sm:$0xff]  ;;  %v10836_v4 = vld [vmem:[#allocation55_spill] sm:$0xff] }
 0xd66   : > { %v4930_v53 = vpop.xlane.xlu1 %4929  ;;  %8644 = vrcp.f32 %v4158_v35  ;;  %v8631_v9 = vpop.eup %8630  ;;  %v2976_v34 = vmul.f32 %v8629_v46, %v10827_v11 }
 0xd67   : > { %8361 = vrot.lane.b32.xlu0 %v8360_v40, %s8964_s20  ;;  %v8633_v45 = vpop.eup %8632  ;;  %v8355_v19 = vpack.i.bf16 %v4519_v50, %v4518_v0  ;;  %v5291_v32 = vmul.f32 %v8631_v9, %v10065_v14  ;;  %v10835_v9 = vld [vmem:[#allocation56_spill] sm:$0xff] }
 0xd68   : > { %v4161_v24 = vpop.xlane.xlu0 %4160  ;;  %v5290_v37 = vmul.f32 %v8633_v45, %v10068_v48 }
 0xd69   : > { %8351 = vrot.lane.b32.xlu1 %v8350_v28, %s8962_s6  ;;  %8646 = vrcp.f32 %v4161_v24 }
 0xd6a   : > { %v8635_v8 = vpop.eup %8634  ;;  %8648 = vrcp.f32 %v1844_v44  ;;  %v2620_v20 = vpop.xlane.xlu1 %2619  ;;  %v8365_v5 = vpack.i.bf16 %v5291_v32, %v5290_v37 }
 0xd6b   : > { %v2977_v13 = vmul.f32 %v8635_v8, %v10828_v27  ;;  %v8637_v55 = vpop.eup %8636 }
 0xd6c   : > { %v1847_v54 = vpop.xlane.xlu0 %1846  ;;  %v6062_v7 = vmul.f32 %v8637_v55, %v10172_v22  ;;  %v10838_v55 = vld [vmem:[#allocation67_spill] sm:$0xff] }
 0xd6d   : > { %8356 = vrot.lane.b32.xlu1 %v8355_v19, %s8961_s0  ;;  %8650 = vrcp.f32 %v1847_v54  ;;  %v8370_v58 = vpack.i.bf16 %v2977_v13, %v2976_v34  ;;  %v10837_v13 = vld [vmem:[#allocation68_spill] sm:$0xff] }
 0xd6e   : > { %v8639_v47 = vpop.eup %8638  ;;  %8652 = vrcp.f32 %v4930_v53  ;;  %v5702_v31 = vpop.xlane.xlu1 %5701 }
 0xd6f   : > { %8371 = vrot.lane.b32.xlu0 %v8370_v58, %s8963_s23  ;;  %v6063_v49 = vmul.f32 %v8639_v47, %v10166_v1  ;;  %v8641_v26 = vpop.eup %8640 }
 0xd70   : > { %v4933_v14 = vpop.xlane.xlu0 %4932  ;;  %v3748_v48 = vmul.f32 %v8641_v26, %v10829_v62  ;;  %v10839_v62 = vld [vmem:[#allocation80_spill] sm:$0xff] }
 0xd71   : > { %8366 = vrot.lane.b32.xlu1 %v8365_v5, %s8960_s14  ;;  %8654 = vrcp.f32 %v4933_v14  ;;  %v8375_v43 = vpack.i.bf16 %v6063_v49, %v6062_v7 }
 0xd72   : > { %v8643_v35 = vpop.eup %8642  ;;  %8656 = vrcp.f32 %v2620_v20  ;;  %v3392_v59 = vpop.xlane.xlu1 %3391 }
 0xd73   : > { %v3749_v2 = vmul.f32 %v8643_v35, %v10830_v42  ;;  %v8645_v56 = vpop.eup %8644  ;;  %v10840_v42 = vld [vmem:[#allocation79_spill] sm:$0xff] }
 0xd74   : > { %v2623_v6 = vpop.xlane.xlu0 %2622  ;;  %v4520_v60 = vmul.f32 %v8645_v56, %v10831_v52 }
 0xd75   : > { %8376 = vrot.lane.b32.xlu1 %v8375_v43, %s8959_s22  ;;  %8658 = vrcp.f32 %v2623_v6  ;;  %v8380_v22 = vpack.i.bf16 %v3749_v2, %v3748_v48 }
 0xd76   : > { %v8647_v1 = vpop.eup %8646  ;;  %8660 = vrcp.f32 %v5702_v31 }
 0xd77   : > { %8381 = vrot.lane.b32.xlu0 %v8380_v22, %s8962_s6  ;;  %v4521_v44 = vmul.f32 %v8647_v1, %v10832_v16  ;;  %v8649_v63 = vpop.eup %8648  ;;  %v7143_v16 = vld [vmem:[#allocation10 + $0x78] sm:$0xff] }
 0xd78   : > { %v5705_v15 = vpop.xlane.xlu0 %5704  ;;  %v2206_v10 = vmul.f32 %v8649_v63, %v10833_v23  ;;  %v10841_v63 = vld [vmem:[#allocation84_spill] sm:$0xff]  ;;  %8200 = vmatprep.subr.mxu0 %v7143_v16 }
 0xd79   : > { %8662 = vrcp.f32 %v5705_v15  ;;  %v8385_v39 = vpack.i.bf16 %v4521_v44, %v4520_v60  ;;  %v7142_v44 = vld [vmem:[#allocation10 + $0x70] sm:$0xff]  ;;  %v10842_v15 = vld [vmem:[#allocation83_spill] sm:$0xff]  ;;  %8201 = vmatpush3.msra.mxu0 %v7143_v16  ;;  %v7141_v23 = vld [vmem:[#allocation10 + $0x68] sm:$0xff] }
 0xd7a   : > { %v8651_v21 = vpop.eup %8650  ;;  %8664 = vrcp.f32 %v3392_v59  ;;  %8202 = vmatprep.subr.mxu0 %v7142_v44 }
 0xd7b   : > { %8386 = vrot.lane.b32.xlu0 %v8385_v39, %s8961_s0  ;;  %v2207_v61 = vmul.f32 %v8651_v21, %v10834_v38  ;;  %v8653_v33 = vpop.eup %8652  ;;  %8203 = vmatpush3.msra.mxu0 %v7142_v44 }
 0xd7c   : > { %v3395_v40 = vpop.xlane.xlu0 %3394  ;;  %v5292_v53 = vmul.f32 %v8653_v33, %v10059_v51  ;;  %8204 = vmatprep.subr.mxu0 %v7141_v23 }
 0xd7d   : > { %8666 = vrcp.f32 %v3395_v40  ;;  %v8390_v17 = vpack.i.bf16 %v2207_v61, %v2206_v10  ;;  %v7140_v61 = vld [vmem:[#allocation10 + $0x60] sm:$0xff]  ;;  %8205 = vmatpush3.msra.mxu0 %v7141_v23 }
 0xd7e   : > { %v8655_v3 = vpop.eup %8654  ;;  %8206 = vmatprep.subr.mxu0 %v7140_v61 }
 0xd7f   : > { %8391 = vrot.lane.b32.xlu1 %v8390_v17, %s8964_s20  ;;  %v5293_v36 = vmul.f32 %v8655_v3, %v10057_v41  ;;  %v8657_v50 = vpop.eup %8656  ;;  %v7139_v17 = vld [vmem:[#allocation10 + $0x58] sm:$0xff]  ;;  %8207 = vmatpush3.msra.mxu0 %v7140_v61 }
 0xd80   : > { %v2978_v24 = vmul.f32 %v8657_v50, %v10835_v9  ;;  %8208 = vmatprep.subr.mxu0 %v7139_v17  ;;  %v7137_v9 = vld [vmem:[#allocation10 + $0x48] sm:$0xff] }
 0xd81   : > { %v8395_v46 = vpack.i.bf16 %v5293_v36, %v5292_v53  ;;  %v7138_v53 = vld [vmem:[#allocation10 + $0x50] sm:$0xff]  ;;  %8209 = vmatpush3.msra.mxu0 %v7139_v17 }
 0xd82   : > { %v8659_v28 = vpop.eup %8658  ;;  %8210 = vmatprep.subr.mxu0 %v7138_v53 }
 0xd83   : > { %8396 = vrot.lane.b32.xlu0 %v8395_v46, %s8960_s14  ;;  %v2979_v0 = vmul.f32 %v8659_v28, %v10836_v4  ;;  %v8661_v45 = vpop.eup %8660  ;;  %8211 = vmatpush3.msra.mxu0 %v7138_v53  ;;  %v7136_v4 = vld [vmem:[#allocation10 + $0x40] sm:$0xff] }
 0xd84   : > { %v6064_v11 = vmul.f32 %v8661_v45, %v10160_v29  ;;  %8212 = vmatprep.subr.mxu0 %v7137_v9  ;;  %v7135_v45 = vld [vmem:[#allocation10 + $0x38] sm:$0xff] }
 0xd85   : > { %v8400_v8 = vpack.i.bf16 %v2979_v0, %v2978_v24  ;;  %8213 = vmatpush3.msra.mxu0 %v7137_v9 }
 0xd86   : > { %v8663_v19 = vpop.eup %8662  ;;  %8214 = vmatprep.subr.mxu0 %v7136_v4 }
 0xd87   : > { %8401 = vrot.lane.b32.xlu1 %v8400_v8, %s8963_s23  ;;  %v6065_v51 = vmul.f32 %v8663_v19, %v10158_v57  ;;  %v8665_v34 = vpop.eup %8664  ;;  %8215 = vmatpush3.msra.mxu0 %v7136_v4  ;;  %v10850_v4 = vld [vmem:[#allocation82_spill] sm:$0xff] }
 0xd88   : > { %v3750_v32 = vmul.f32 %v8665_v34, %v10837_v13  ;;  %8216 = vmatprep.subr.mxu0 %v7135_v45  ;;  %v7132_v34 = vld [vmem:[#allocation10 + $0x20] sm:$0xff] }
 0xd89   : > { %v8405_v41 = vpack.i.bf16 %v6065_v51, %v6064_v11  ;;  %8217 = vmatpush3.msra.mxu0 %v7135_v45  ;;  %v7133_v51 = vld [vmem:[#allocation10 + $0x28] sm:$0xff]  ;;  %v10851_v45 = vld [vmem:[#allocation75_spill] sm:$0xff] }
 0xd8a   : > { %v8667_v27 = vpop.eup %8666 }
 0xd8b   : > { %8406 = vrot.lane.b32.xlu0 %v8405_v41, %s8959_s22  ;;  %v3751_v20 = vmul.f32 %v8667_v27, %v10838_v55  ;;  %v7131_v27 = vld [vmem:[#allocation10 + $0x18] sm:$0xff]  ;;  %v7130_v55 = vld [vmem:[#allocation10 + $0x10] sm:$0xff] }
 0xd8d   : > { %v8410_v54 = vpack.i.bf16 %v3751_v20, %v3750_v32 }
 0xd8f   : > { %8411 = vrot.lane.b32.xlu1 %v8410_v54, %s8962_s6 }
 0xd93   : > { %v10399_v58 = vpop.xlane.xlu0 %6476 }
 0xd97   : > { %v4167_v37 = vpop.xlane.xlu0 %4166 }
 0xd98   : > { %v10401_v47 = vpop.xlane.xlu1 %6473  ;;  %8668 = vrcp.f32 %v4167_v37 }
 0xd9c   : > { %v10403_v29 = vpop.xlane.xlu0 %1852 }
 0xd9d   : > { %v4164_v57 = vpop.xlane.xlu1 %4163 }
 0xd9e   : > { %8670 = vrcp.f32 %v4164_v57  ;;  %v7129_v57 = vld [vmem:[#allocation10 + $0x8] sm:$0xff] }
 0xda0   : > { %v4939_v5 = vpop.xlane.xlu0 %4938 }
 0xda1   : > { %v10405_v7 = vpop.xlane.xlu1 %1849  ;;  %8672 = vrcp.f32 %v4939_v5 }
 0xda4   : > { %v10407_v49 = vpop.xlane.xlu0 %2628 }
 0xda5   : > { %v4936_v26 = vpop.xlane.xlu1 %4935  ;;  %v8669_v14 = vpop.eup %8668 }
 0xda6   : > { %8674 = vrcp.f32 %v4936_v26  ;;  %v4523_v2 = vmul.f32 %v8669_v14, %v10840_v42  ;;  %v10843_v14 = vld [vmem:[#allocation41_spill] sm:$0xff] }
 0xda8   : > { %v5711_v35 = vpop.xlane.xlu0 %5710 }
 0xda9   : > { %v10409_v43 = vpop.xlane.xlu1 %2625  ;;  %8676 = vrcp.f32 %v5711_v35 }
 0xdab   : > { %v8671_v31 = vpop.eup %8670 }
 0xdac   : > { %v4522_v48 = vmul.f32 %v8671_v31, %v10839_v62  ;;  %v3401_v1 = vpop.xlane.xlu0 %3400 }
 0xdad   : > { %v5708_v56 = vpop.xlane.xlu1 %5707 }
 0xdae   : > { %8678 = vrcp.f32 %v5708_v56  ;;  %v8420_v6 = vpack.i.bf16 %v4523_v2, %v4522_v48  ;;  %v8673_v22 = vpop.eup %8672  ;;  %v10844_v48 = vld [vmem:[#allocation40_spill] sm:$0xff] }
 0xdaf   : > { %v5295_v39 = vmul.f32 %v8673_v22, %v10842_v15  ;;  %8680 = vrcp.f32 %v10399_v58  ;;  %v10846_v15 = vld [vmem:[#allocation51_spill] sm:$0xff] }
 0xdb0   : > { %8421 = vrot.lane.b32.xlu1 %v8420_v6, %s8961_s0  ;;  %v4942_v38 = vpop.xlane.xlu0 %4941  ;;  %8682 = vrcp.f32 %v10401_v47 }
 0xdb1   : > { %v3398_v52 = vpop.xlane.xlu1 %3397  ;;  %8684 = vrcp.f32 %v10405_v7  ;;  %v7128_v7 = vld [vmem:[#allocation10] sm:$0xff] }
 0xdb2   : > { %8686 = vrcp.f32 %v10403_v29 }
 0xdb3   : > { %v8675_v60 = vpop.eup %8674  ;;  %8688 = vrcp.f32 %v10409_v43 }
 0xdb4   : > { %v5294_v59 = vmul.f32 %v8675_v60, %v10841_v63  ;;  %v10421_v46 = vpop.xlane.xlu0 %5713  ;;  %8690 = vrcp.f32 %v10407_v49 }
 0xdb5   : > { %v10416_v21 = vpop.xlane.xlu1 %4169  ;;  %8692 = vrcp.f32 %v3401_v1  ;;  %v10845_v1 = vld [vmem:[#allocation52_spill] sm:$0xff] }
 0xdb6   : > { %v8430_v10 = vpack.i.bf16 %v5295_v39, %v5294_v59  ;;  %v8677_v33 = vpop.eup %8676  ;;  %8694 = vrcp.f32 %v3398_v52 }
 0xdb7   : > { %v6067_v50 = vmul.f32 %v8677_v33, %v10176_v25  ;;  %v10847_v33 = vld [vmem:[#allocation64_spill] sm:$0xff] }
 0xdb8   : > { %8431 = vrot.lane.b32.xlu1 %v8430_v10, %s8960_s14  ;;  %v10426_v25 = vpop.xlane.xlu0 %6485 }
 0xdb9   : > { %v4173_v40 = vpop.xlane.xlu1 %4172 }
 0xdbb   : > { %v8679_v3 = vpop.eup %8678 }
 0xdbc   : > { %v6066_v36 = vmul.f32 %v8679_v3, %v10180_v30  ;;  %v7134_v30 = vld [vmem:[#allocation10 + $0x30] sm:$0xff]  ;;  %v6471_v19 = vpop.xlane.xlu0 %6470  ;;  %v8681_v13 = vpop.eup %8680 }
 0xdbd   : > { %v4945_v28 = vpop.xlane.xlu1 %4944  ;;  %8218 = vmatprep.subr.mxu0 %v7134_v30  ;;  %8696 = vrcp.f32 %v6471_v19  ;;  %v8683_v20 = vpop.eup %8682 }
 0xdbe   : > { %v8440_v24 = vpack.i.bf16 %v6067_v50, %v6066_v36  ;;  %8219 = vmatpush3.msra.mxu0 %v7134_v30  ;;  %8698 = vrcp.f32 %v4945_v28  ;;  %v8685_v54 = vpop.eup %8684  ;;  %v10848_v36 = vld [vmem:[#allocation63_spill] sm:$0xff] }
 0xdbf   : > { %8220 = vmatprep.subr.mxu0 %v7133_v51  ;;  %v8687_v5 = vpop.eup %8686  ;;  %v2208_v43 = vmul.f32 %v8685_v54, %v10843_v14 }
 0xdc0   : > { %8441 = vrot.lane.b32.xlu1 %v8440_v24, %s8959_s22  ;;  %8221 = vmatpush3.msra.mxu0 %v7133_v51  ;;  %v10439_v49 = vpop.xlane.xlu0 %1071  ;;  %v8689_v35 = vpop.eup %8688  ;;  %v2209_v42 = vmul.f32 %v8687_v5, %v10844_v48 }
 0xdc1   : > { %v5717_v0 = vpop.xlane.xlu1 %5716  ;;  %8222 = vmatprep.subr.mxu0 %v7132_v34  ;;  %v8691_v62 = vpop.eup %8690  ;;  %v2980_v52 = vmul.f32 %v8689_v35, %v10845_v1 }
 0xdc2   : > { %8223 = vmatpush3.msra.mxu0 %v7132_v34  ;;  %v8693_v2 = vpop.eup %8692  ;;  %v8425_v22 = vpack.i.bf16 %v2209_v42, %v2208_v43  ;;  %v2981_v39 = vmul.f32 %v8691_v62, %v10846_v15  ;;  %v10852_v34 = vld [vmem:[#allocation76_spill] sm:$0xff] }
 0xdc3   : > { %8224 = vmatprep.subr.mxu0 %v7131_v27  ;;  %v8695_v6 = vpop.eup %8694  ;;  %v3753_v50 = vmul.f32 %v8693_v2, %v10848_v36 }
 0xdc4   : > { %8225 = vmatpush3.msra.mxu0 %v7131_v27  ;;  %v6483_v59 = vpop.xlane.xlu0 %6482  ;;  %v8435_v61 = vpack.i.bf16 %v2981_v39, %v2980_v52 }
 0xdc5   : > { %v10429_v8 = vpop.xlane.xlu1 %6488  ;;  %8226 = vmatprep.subr.mxu0 %v7130_v55 }
 0xdc6   : > { %8227 = vmatpush3.msra.mxu0 %v7130_v55 }
 0xdc7   : > { %8228 = vmatprep.subr.mxu0 %v7129_v57 }
 0xdc8   : > { %8229 = vmatpush3.msra.mxu0 %v7129_v57 }
 0xdc9   : > { %v10434_v11 = vpop.xlane.xlu1 %1074  ;;  %8230 = vmatprep.subr.mxu0 %v7128_v7 }
 0xdca   : > { %8231 = vmatpush3.msra.mxu0 %v7128_v7  ;;  %v8697_v60 = vpop.eup %8696 }
 0xdcb   : > { %v8699_v63 = vpop.eup %8698 }
 0xdcd   : > { %v6468_v41 = vpop.xlane.xlu1 %6467 }
 0xdce   : > { %8700 = vrcp.f32 %v6468_v41 }
 0xdcf   : > { %8702 = vrcp.f32 %v4942_v38  ;;  %v8189_v32 = vpop.f32.mrf.mxu1 }
 0xdd0   : > { %8704 = vrcp.f32 %v4173_v40  ;;  %v6837_v47 = vmul.f32 %v8681_v13, %v8189_v32  ;;  %v3752_v40 = vmul.f32 %v8695_v6, %v10847_v33 }
 0xdd1   : > { %v10436_v58 = vpop.xlane.xlu1 %1080  ;;  %v6657_v37 = vpop.f32.mrf.mxu1  ;;  %8706 = vrcp.f32 %v10416_v21 }
 0xdd2   : > { %v6836_v29 = vmul.f32 %v8683_v20, %v6657_v37  ;;  %8708 = vrcp.f32 %v5717_v0  ;;  %v8445_v24 = vpack.i.bf16 %v3753_v50, %v3752_v40  ;;  %v10854_v40 = vld [vmem:[#allocation27_spill] sm:$0xff]  ;;  %v10855_v50 = vld [vmem:[#allocation29_spill] sm:$0xff] }
 0xdd3   : > { %8710 = vrcp.f32 %v10421_v46  ;;  %v10849_v46 = vld [vmem:[#allocation81_spill] sm:$0xff] }
 0xdd4   : > { %v8415_v26 = vpack.i.bf16 %v6837_v47, %v6836_v29  ;;  %8712 = vrcp.f32 %v6483_v59  ;;  %v5297_v28 = vmul.f32 %v8699_v63, %v10849_v46  ;;  %v8199_v55 = vpop.f32.mrf.mxu1 }
 0xdd5   : > { %v10442_v31 = vpop.xlane.xlu1 %1086 }
 0xdd6   : > { %8416 = vrot.lane.b32.xlu0 %v8415_v26, %s8958_s15  ;;  %v6825_v47 = vpop.f32.mrf.mxu1 }
 0xdd7   : > { %v8184_v56 = vpop.f32.mrf.mxu0 }
 0xdd8   : > { %v6835_v10 = vmul.f32 %v8697_v60, %v8184_v56 }
 0xdd9   : > { %v10448_v16 = vpop.xlane.xlu1 %1092  ;;  %v6573_v44 = vpop.f32.mrf.mxu0 }
 0xdda   : > { %8426 = vrot.lane.b32.xlu0 %v8425_v22, %s8964_s20 }
 0xddb   : > { %v8701_v21 = vpop.eup %8700  ;;  %v8194_v20 = vpop.f32.mrf.mxu0 }
 0xddc   : > { %v8703_v23 = vpop.eup %8702  ;;  %v6834_v38 = vmul.f32 %v8701_v21, %v6573_v44 }
 0xddd   : > { %v8705_v17 = vpop.eup %8704  ;;  %v6480_v3 = vpop.xlane.xlu1 %6479  ;;  %v5296_v0 = vmul.f32 %v8703_v23, %v10850_v4 }
 0xdde   : > { %v8455_v53 = vpack.i.bf16 %v6835_v10, %v6834_v38  ;;  %8714 = vrcp.f32 %v6480_v3  ;;  %8436 = vrot.lane.b32.xlu0 %v8435_v61, %s8963_s23  ;;  %v8707_v9 = vpop.eup %8706  ;;  %v4525_v30 = vmul.f32 %v8705_v17, %v10851_v45  ;;  %v6741_v29 = vpop.f32.mrf.mxu0 }
 0xddf   : > { %8716 = vrcp.f32 %v10426_v25  ;;  %v8709_v19 = vpop.eup %8708  ;;  %v8460_v51 = vpack.i.bf16 %v5297_v28, %v5296_v0  ;;  %v4524_v41 = vmul.f32 %v8707_v9, %v10852_v34  ;;  %v10856_v9 = vld [vmem:[#allocation30_spill] sm:$0xff] }
 0xde0   : > { %8456 = vrot.lane.b32.xlu1 %v8455_v53, %s8958_s15  ;;  %8718 = vrcp.f32 %v10429_v8  ;;  %v8711_v27 = vpop.eup %8710  ;;  %v6069_v25 = vmul.f32 %v8709_v19, %v10162_v18 }
 0xde1   : > { %v8450_v13 = vpack.i.bf16 %v4525_v30, %v4524_v41  ;;  %v6068_v32 = vmul.f32 %v8711_v27, %v10164_v12  ;;  %v8713_v37 = vpop.eup %8712  ;;  %v1078_v12 = vpop.xlane.xlu0 %1077  ;;  %8720 = vrcp.f32 %v10439_v49 }
 0xde2   : > { %8446 = vrot.lane.b32.xlu0 %v8445_v24, %s8962_s6  ;;  %v6839_v57 = vmul.f32 %v8713_v37, %v8194_v20  ;;  %v8347_v62 = vpop.permute.xlu1 %8346  ;;  %8722 = vrcp.f32 %v10434_v11 }
 0xde3   : > { %v8470_v54 = vpack.i.bf16 %v6069_v25, %v6068_v32  ;;  %8724 = vrcp.f32 %v10436_v58  ;;  %v10853_v58 = vld [vmem:[#allocation28_spill] sm:$0xff]  ;;  %v8349_v4 = vunpack.i.h.bf16 %v8347_v62  ;;  %v8348_v0 = vunpack.i.l.bf16 %v8347_v62 }
 0xde4   : > { %8461 = vrot.lane.b32.xlu1 %v8460_v51, %s8960_s14  ;;  %8726 = vrcp.f32 %v1078_v12 }
 0xde5   : > { %v1084_v48 = vpop.xlane.xlu0 %1083 }
 0xde6   : > { %8451 = vrot.lane.b32.xlu0 %v8450_v13, %s8961_s0  ;;  %v10470_v42 = vpop.permute.xlu1 %8351  ;;  %8728 = vrcp.f32 %v1084_v48 }
 0xde7   : > { %v8353_v34 = vunpack.i.l.bf16 %v10470_v42  ;;  %v8354_v27 = vunpack.i.h.bf16 %v10470_v42 }
 0xde9   : > { %v1090_v2 = vpop.xlane.xlu0 %1089 }
 0xdea   : > { %8471 = vrot.lane.b32.xlu0 %v8470_v54, %s8959_s22  ;;  %v10472_v56 = vpop.permute.xlu1 %8356  ;;  %8730 = vrcp.f32 %v1090_v2 }
 0xdeb   : > { %v8715_v8 = vpop.eup %8714  ;;  %8732 = vrcp.f32 %v10442_v31  ;;  %v8359_v32 = vunpack.i.h.bf16 %v10472_v56 }
 0xdec   : > { %v6838_v5 = vmul.f32 %v8715_v8, %v6741_v29  ;;  %v8717_v7 = vpop.eup %8716  ;;  %8734 = vrcp.f32 %v10448_v16 }
 0xded   : > { %v6840_v26 = vmul.f32 %v8717_v7, %v6825_v47  ;;  %v8719_v43 = vpop.eup %8718  ;;  %v8342_v6 = vpop.permute.xlu0 %8341 }
 0xdee   : > { %v8465_v14 = vpack.i.bf16 %v6839_v57, %v6838_v5  ;;  %v6841_v18 = vmul.f32 %v8719_v43, %v8199_v55  ;;  %v10474_v22 = vpop.permute.xlu1 %8366  ;;  %v8721_v23 = vpop.eup %8720  ;;  %v8343_v3 = vunpack.i.l.bf16 %v8342_v6  ;;  %v8344_v36 = vunpack.i.h.bf16 %v8342_v6 }
 0xdef   : > { %v8723_v38 = vpop.eup %8722  ;;  %v1426_v33 = vmul.f32 %v8721_v23, %v10853_v58  ;;  %v8358_v55 = vunpack.i.l.bf16 %v10472_v56  ;;  %v8369_v8 = vunpack.i.h.bf16 %v10474_v22  ;;  %v8368_v7 = vunpack.i.l.bf16 %v10474_v22 }
 0xdf0   : > { %8466 = vrot.lane.b32.xlu1 %v8465_v14, %s8958_s15  ;;  %v8475_v35 = vpack.i.bf16 %v6841_v18, %v6840_v26  ;;  %v8725_v49 = vpop.eup %8724  ;;  %v1427_v17 = vmul.f32 %v8723_v38, %v10854_v40 }
 0xdf1   : > { %v8362_v1 = vpop.permute.xlu0 %8361  ;;  %v8727_v61 = vpop.eup %8726  ;;  %v1429_v46 = vmul.f32 %v8725_v49, %v10855_v50  ;;  %v7066_v41 = vsel %vm684_vm0, %v1426_v33, %v8343_v3 }
 0xdf2   : > { %v10476_v60 = vpop.permute.xlu1 %8376  ;;  %v8363_v28 = vunpack.i.l.bf16 %v8362_v1  ;;  %v1428_v24 = vmul.f32 %v8727_v61, %v10856_v9  ;;  %v8364_v30 = vunpack.i.h.bf16 %v8362_v1  ;;  %v7067_v31 = vsel %vm684_vm0, %v1427_v17, %v8344_v36 }
 0xdf3   : > { %v7075_v20 = vsel %vm7074_vm2, %v7066_v41, %v8348_v0  ;;  %v7076_v54 = vsel %vm7074_vm2, %v7067_v31, %v8349_v4  ;;  %v8379_v43 = vunpack.i.h.bf16 %v10476_v60  ;;  %v8378_v18 = vunpack.i.l.bf16 %v10476_v60  ;;  %v8729_v49 = vpop.eup %8728  ;;  %v10858_v41 = vld [vmem:[#allocation32_spill] sm:$0xff] }
 0xdf4   : > { %8476 = vrot.lane.b32.xlu1 %v8475_v35, %s8958_s15  ;;  %v7069_v16 = vsel %vm684_vm0, %v1429_v46, %v8364_v30  ;;  %v7068_v25 = vsel %vm684_vm0, %v1428_v24, %v8363_v28  ;;  %v7084_v5 = vsel %vm7083_vm3, %v7075_v20, %v8353_v34  ;;  %v7085_v26 = vsel %vm7083_vm3, %v7076_v54, %v8354_v27  ;;  %v10857_v34 = vld [vmem:[#allocation31_spill] sm:$0xff]  ;;  %s8870_s15 = scalar_lea.vmem %s10617_s13, 1024 }
 0xdf5   : > { %v8372_v52 = vpop.permute.xlu0 %8371  ;;  %v7093_v12 = vsel %vm7092_vm4, %v7084_v5, %v8358_v55  ;;  %v7094_v62 = vsel %vm7092_vm4, %v7085_v26, %v8359_v32  ;;  %v1430_v27 = vmul.f32 %v8729_v49, %v10858_v41  ;;  %v10860_v55 = vld [vmem:[#allocation33_spill] sm:$0xff]  ;;  %p8871_p0 = scmp.ne.s32.totalorder %s10617_s13, %s8870_s15  ;;  %p8878_p13 = scmp.lt.s32.totalorder %s8876_s24, %s8870_s15 }
 0xdf6   : > { %v10482_v63 = vpop.permute.xlu1 %8391  ;;  %v8374_v19 = vunpack.i.h.bf16 %v8372_v52  ;;  %v8373_v51 = vunpack.i.l.bf16 %v8372_v52  ;;  %v7103_v56 = vsel %vm7101_vm5, %v7094_v62, %v8369_v8  ;;  %v7102_v38 = vsel %vm7101_vm5, %v7093_v12, %v8368_v7 }
 0xdf7   : > { %v7111_v58 = vsel %vm7110_vm6, %v7102_v38, %v8378_v18  ;;  %v7112_v33 = vsel %vm7110_vm6, %v7103_v56, %v8379_v43  ;;  %v8731_v40 = vpop.eup %8730  ;;  %v8393_v0 = vunpack.i.l.bf16 %v10482_v63  ;;  %p8872_p10 = pnand %p8871_p0, %p10861_p5  ;;  %p8879_p1 = por %p8878_p13, %p8877_p9 }
 0xdf8   : > { %v7077_v29 = vsel %vm7074_vm2, %v7068_v25, %v8373_v51  ;;  %v7078_v57 = vsel %vm7074_vm2, %v7069_v16, %v8374_v19  ;;  %v8733_v46 = vpop.eup %8732  ;;  %v10859_v25 = vld [vmem:[#allocation34_spill] sm:$0xff] }
 0xdf9   : > { %v10478_v44 = vpop.permute.xlu0 %8381  ;;  %v8735_v24 = vpop.eup %8734  ;;  %v1431_v31 = vmul.f32 %v8733_v46, %v10857_v34  ;;  %v1432_v32 = vmul.f32 %v8731_v40, %v10859_v25  ;;  %p8873_p11 = pneg %p8872_p10 }
 0xdfa   : > { %v10487_v15 = vpop.permute.xlu1 %8401  ;;  %v8383_v37 = vunpack.i.l.bf16 %v10478_v44  ;;  %v8384_v48 = vunpack.i.h.bf16 %v10478_v44 }
 0xdfb   : > { %v8404_v19 = vunpack.i.h.bf16 %v10487_v15  ;;  %v8403_v51 = vunpack.i.l.bf16 %v10487_v15  ;;  %p8880_p4 = pnand %p8879_p1, %p8873_p11 }
 0xdfc   : > { %v7086_v2 = vsel %vm7083_vm3, %v7077_v29, %v8383_v37  ;;  %v7087_v28 = vsel %vm7083_vm3, %v7078_v57, %v8384_v48  ;;  %v7070_v37 = vsel %vm684_vm0, %v1430_v27, %v8393_v0  ;;  %v7584_v27 = vld [vmem:[%s10672_s7] ss:$0 sm:$0xff] }
 0xdfd   : > { %v10485_v59 = vpop.permute.xlu0 %8386  ;;  %v7079_v5 = vsel %vm7074_vm2, %v7070_v37, %v8403_v51 }
 0xdfe   : > { %v8388_v14 = vunpack.i.l.bf16 %v10485_v59  ;;  %v8389_v6 = vunpack.i.h.bf16 %v10485_v59 }
 0xe00   : > { %v7095_v44 = vsel %vm7092_vm4, %v7086_v2, %v8388_v14  ;;  %v7096_v4 = vsel %vm7092_vm4, %v7087_v28, %v8389_v6 }
 0xe01   : > { %v10489_v39 = vpop.permute.xlu0 %8396  ;;  %v10491_v21 = vpop.permute.xlu1 %8411 }
 0xe02   : > { %v8398_v42 = vunpack.i.l.bf16 %v10489_v39  ;;  %v8399_v61 = vunpack.i.h.bf16 %v10489_v39  ;;  %v8414_v15 = vunpack.i.h.bf16 %v10491_v21  ;;  %v8413_v8 = vunpack.i.l.bf16 %v10491_v21 }
 0xe04   : > { %v7104_v50 = vsel %vm7101_vm5, %v7095_v44, %v8398_v42 }
 0xe05   : > { %v10493_v10 = vpop.permute.xlu0 %8406 }
 0xe06   : > { %v8408_v22 = vunpack.i.l.bf16 %v10493_v10  ;;  %v8409_v59 = vunpack.i.h.bf16 %v10493_v10  ;;  %v8394_v10 = vunpack.i.h.bf16 %v10482_v63  ;;  %v1433_v63 = vmul.f32 %v8735_v24, %v10860_v55 }
 0xe08   : > { %v7113_v9 = vsel %vm7110_vm6, %v7104_v50, %v8408_v22  ;;  %v7071_v54 = vsel %vm684_vm0, %v1431_v31, %v8394_v10 }
 0xe09   : > { %v7080_v57 = vsel %vm7074_vm2, %v7071_v54, %v8404_v19 }
 0xe0a   : > { %v7089_v56 = vsel %vm7083_vm3, %v7080_v57, %v8414_v15 }
 0xe22   : > { %v10495_v11 = vpop.permute.xlu1 %8421 }
 0xe23   : > { %v8424_v7 = vunpack.i.h.bf16 %v10495_v11  ;;  %v8423_v26 = vunpack.i.l.bf16 %v10495_v11  ;;  %v7088_v11 = vsel %vm7083_vm3, %v7079_v5, %v8413_v8 }
 0xe25   : > { %v7098_v22 = vsel %vm7092_vm4, %v7089_v56, %v8424_v7 }
 0xe2a   : > { %v10505_v45 = vpop.permute.xlu1 %8431 }
 0xe2b   : > { %v8434_v14 = vunpack.i.h.bf16 %v10505_v45  ;;  %v8433_v43 = vunpack.i.l.bf16 %v10505_v45 }
 0xe2d   : > { %v7107_v38 = vsel %vm7101_vm5, %v7098_v22, %v8434_v14 }
 0xe32   : > { %v10521_v47 = vpop.permute.xlu1 %8441 }
 0xe33   : > { %v8444_v21 = vunpack.i.h.bf16 %v10521_v47  ;;  %v8443_v62 = vunpack.i.l.bf16 %v10521_v47 }
 0xe48   : > { %v10499_v53 = vpop.permute.xlu0 %8416 }
 0xe49   : > { %v8418_v52 = vunpack.i.l.bf16 %v10499_v53  ;;  %v8419_v39 = vunpack.i.h.bf16 %v10499_v53  ;;  %v7105_v53 = vsel %vm7101_vm5, %v7096_v4, %v8399_v61 }
 0xe4a   : > { %v7114_v16 = vsel %vm7110_vm6, %v7105_v53, %v8409_v59 }
 0xe4b   : > { %v7122_v30 = vsel %vm7119_vm7, %v7113_v9, %v8418_v52  ;;  %v7123_v20 = vsel %vm7119_vm7, %v7114_v16, %v8419_v39 }
 0xe4c   : > { %v10511_v13 = vpop.permute.xlu0 %8426 }
 0xe4d   : > { %v8429_v18 = vunpack.i.h.bf16 %v10511_v13  ;;  %v8428_v12 = vunpack.i.l.bf16 %v10511_v13  ;;  %v7097_v13 = vsel %vm7092_vm4, %v7088_v11, %v8423_v26 }
 0xe4f   : > { %v7073_v47 = vsel %vm684_vm0, %v1433_v63, %v8429_v18 }
 0xe50   : > { %v10531_v35 = vpop.permute.xlu0 %8436 }
 0xe51   : > { %v8439_v48 = vunpack.i.h.bf16 %v10531_v35  ;;  %v8438_v42 = vunpack.i.l.bf16 %v10531_v35 }
 0xe52   : > { %v8457_v1 = vpop.permute.xlu1 %8456 }
 0xe53   : > { %v8459_v60 = vunpack.i.h.bf16 %v8457_v1  ;;  %v8458_v23 = vunpack.i.l.bf16 %v8457_v1  ;;  %v7082_v44 = vsel %vm7074_vm2, %v7073_v47, %v8439_v48 }
 0xe54   : > { %v10548_v17 = vpop.permute.xlu0 %8446 }
 0xe55   : > { %v7120_v3 = vsel %vm7119_vm7, %v7111_v58, %v8458_v23  ;;  %v7121_v36 = vsel %vm7119_vm7, %v7112_v33, %v8459_v60  ;;  %v8449_v6 = vunpack.i.h.bf16 %v10548_v17  ;;  %v8448_v45 = vunpack.i.l.bf16 %v10548_v17 }
 0xe56   : > { %8232 = vmatprep.mubr.f32.mxu0 %v7120_v3  ;;  %v8462_v2 = vpop.permute.xlu1 %8461  ;;  %v7072_v60 = vsel %vm684_vm0, %v1432_v32, %v8428_v12  ;;  %v7106_v23 = vsel %vm7101_vm5, %v7097_v13, %v8433_v43  ;;  %v7116_v33 = vsel %vm7110_vm6, %v7107_v38, %v8444_v21 }
 0xe57   : > { %8233 = vmatmul.mubr.f32.vlgmr.msra.gmra.mxu0 %v7121_v36  ;;  %v7081_v49 = vsel %vm7074_vm2, %v7072_v60, %v8438_v42  ;;  %v7115_v58 = vsel %vm7110_vm6, %v7106_v23, %v8443_v62  ;;  %v7091_v59 = vsel %vm7083_vm3, %v7082_v44, %v8449_v6  ;;  %v8464_v39 = vunpack.i.h.bf16 %v8462_v2 }
 0xe58   : > { %8235 = vmatprep.mubr.f32.mxu0 %v7122_v30  ;;  %v8452_v29 = vpop.permute.xlu0 %8451  ;;  %v7090_v40 = vsel %vm7083_vm3, %v7081_v49, %v8448_v45  ;;  %v8463_v9 = vunpack.i.l.bf16 %v8462_v2 }
 0xe59   : > { %v8454_v1 = vunpack.i.h.bf16 %v8452_v29  ;;  %v8453_v52 = vunpack.i.l.bf16 %v8452_v29 }
 0xe5b   : > { %8236 = vmatmul.mubr.f32.gmra.mxu0 %v7123_v20  ;;  %v7099_v36 = vsel %vm7092_vm4, %v7090_v40, %v8453_v52  ;;  %v7100_v50 = vsel %vm7092_vm4, %v7091_v59, %v8454_v1 }
 0xe5c   : > { %v8472_v35 = vpop.permute.xlu0 %8471  ;;  %v7108_v19 = vsel %vm7101_vm5, %v7099_v36, %v8463_v9  ;;  %v7109_v51 = vsel %vm7101_vm5, %v7100_v50, %v8464_v39 }
 0xe5d   : > { %v8474_v46 = vunpack.i.h.bf16 %v8472_v35  ;;  %v8473_v28 = vunpack.i.l.bf16 %v8472_v35 }
 0xe5f   : > { %v7117_v53 = vsel %vm7110_vm6, %v7108_v19, %v8473_v28  ;;  %v7118_v34 = vsel %vm7110_vm6, %v7109_v51, %v8474_v46 }
 0xe62   : > { %v8467_v61 = vpop.permute.xlu1 %8466 }
 0xe63   : > { %v8469_v17 = vunpack.i.h.bf16 %v8467_v61  ;;  %v8468_v3 = vunpack.i.l.bf16 %v8467_v61 }
 0xe65   : > { %v7124_v24 = vsel %vm7119_vm7, %v7115_v58, %v8468_v3  ;;  %v7125_v4 = vsel %vm7119_vm7, %v7116_v33, %v8469_v17 }
 0xe66   : > { %v8477_v10 = vpop.permute.xlu1 %8476  ;;  %8238 = vmatprep.mubr.f32.mxu0 %v7124_v24 }
 0xe67   : > { %v8479_v0 = vunpack.i.h.bf16 %v8477_v10  ;;  %v8478_v30 = vunpack.i.l.bf16 %v8477_v10  ;;  %8239 = vmatmul.mubr.f32.gmra.mxu0 %v7125_v4 }
 0xe69   : > { %v7126_v31 = vsel %vm7119_vm7, %v7117_v53, %v8478_v30  ;;  %v7127_v41 = vsel %vm7119_vm7, %v7118_v34, %v8479_v0 }
 0xe6a   : > { %8241 = vmatprep.mubr.f32.mxu0 %v7126_v31 }
 0xe6b   : > { %8242 = vmatmul.mubr.f32.gmra.mxu0 %v7127_v41 }
 0xf17   : > { %v8234_v16 = vpop.f32.mrf.mxu0 }
 0xf18   : > { %v7223_v25 = vadd.f32 %v8234_v16, %v7584_v27 }
 0xf19   : > { %v7217_v32 = vpop.f32.mrf.mxu0 }
 0xf1a   : > { %7257 = vst [vmem:[%s407_s4 + $0x8] sm:$0xff] %v7223_v25  ;;  %v7218_v55 = vadd.f32 %v7584_v27, %v7217_v32 }
 0xf1b   : > { %v8237_v63 = vpop.f32.mrf.mxu0 }
 0xf1c   : > { %7256 = vst [vmem:[%s407_s4] sm:$0xff] %v7218_v55  ;;  %v7233_v20 = vadd.f32 %v8237_v63, %v7584_v27 }
 0xf1d   : > { %v7227_v54 = vpop.f32.mrf.mxu0 }
 0xf1e   : > { %7259 = vst [vmem:[%s407_s4 + $0x18] sm:$0xff] %v7233_v20  ;;  %v7228_v37 = vadd.f32 %v7584_v27, %v7227_v54 }
 0xf20   : > { %7258 = vst [vmem:[%s407_s4 + $0x10] sm:$0xff] %v7228_v37 }
 0xf27   : > { %v8240_v15 = vpop.f32.mrf.mxu0 }
 0xf28   : > { %v7243_v8 = vadd.f32 %v8240_v15, %v7584_v27 }
 0xf29   : > { %v7237_v29 = vpop.f32.mrf.mxu0 }
 0xf2a   : > { %7261 = vst [vmem:[%s407_s4 + $0x28] sm:$0xff] %v7243_v8  ;;  %v7238_v57 = vadd.f32 %v7584_v27, %v7237_v29 }
 0xf2b   : > { %v8243_v5 = vpop.f32.mrf.mxu0 }
 0xf2c   : > { %7260 = vst [vmem:[%s407_s4 + $0x20] sm:$0xff] %v7238_v57  ;;  %v7253_v7 = vadd.f32 %v8243_v5, %v7584_v27 }
 0xf2d   : > { %v7247_v26 = vpop.f32.mrf.mxu0 }
 0xf2e   : > { %7263 = vst [vmem:[%s407_s4 + $0x38] sm:$0xff] %v7253_v7  ;;  %v7248_v14 = vadd.f32 %v7584_v27, %v7247_v26 }
 0xf30   : > { %7262 = vst [vmem:[%s407_s4 + $0x30] sm:$0xff] %v7248_v14 }
 0xf31   : > { %8883 = shalt.err (!%p8880_p4)
}
 0xf32   : > { %s8884_s22 = scalar_lea.hbm %s10622_s11, 1024  ;;  %s8888_s6 = scalar_lea.hbm %s10673_s8, 2048 }
 0xf33   : > { %p8885_p3 = scmp.ne.s32.totalorder %s10622_s11, %s8884_s22  ;;  %p8889_p2 = scmp.lt.s32.totalorder %s10622_s11, %s10673_s8 }
 0xf34   : > { %p8890_p6 = scmp.lt.s32.totalorder %s8888_s6, %s8884_s22 }
 0xf35   : > { %p8886_p7 = pnand %p8885_p3, %p10861_p5 }
 0xf36   : > { %p8891_p12 = por %p8890_p6, %p8889_p2 }
 0xf37   : > { %p8887_p8 = pneg %p8886_p7 }
 0xf39   : > { %p8892_p0 = pnand %p8891_p12, %p8887_p8 }
 0xf3b   : > { %8895 = shalt.err (!%p8892_p0)
}
 0xf3c   : > { %s8966_s10 = smov 128   ;;  %s8967_s16 = smov 8  }
 0xf3d   : > { %8260 = dma.vmem_to_hbm [thread:$0]  (%p10861_p5), %s10617_s13, 1024, %s10622_s11, %s7265_s17, %s8966_s10, %s8966_s10, %s8967_s16  }
 0xf3e PF: > { %s7294_s4 = sand.u32 1, %s8934_s27   ;;  %p10862_p10 = scmp.ne.s32.totalorder %s10710_s12, 0 }
 0xf3f   : > { %p10863_p11 = scmp.ge.s32.totalorder %s8946_s30, 2  ;;  %s7295_s25 = scalar_lea.sflag [#allocation4], %s7294_s4 }
 0xf41   : > { %p8280_p9 = pnand %p10863_p11, %p10862_p10 }
 0xf43   : > { %p8281_p13 = pneg %p8280_p9 }
 0xf45   : > { %8929 = dma.done.wait (%p8281_p13), %s7295_s25, 1024  }
 0xf46   : > { %8931 = vsyncadd (%p8281_p13), %s7295_s25, 4294966272  ;;  %s10864_s21 = sld [smem:[#allocation17_spill]]  ;;  %p25_p1 = scmp.ge.s32.totalorder %s9088_s19, 4  }
 0xf47   : > { %s10865_s29 = sld [smem:[#allocation18_spill]]  ;;  %s10866_s27 = smov %s8938_s28 }
 0xf48   : > { %s10868_s30 = smov %s9088_s19  ;;  %27 = sbr.rel (!%p25_p1) target bundleno = 13 (0xd), region = 122 }
 0xf4c   : > { %s10867_s28 = smov %s10864_s21 }
 0xf4d   :  { %7300 = vsyncpa [#allocation3], 1 }
 0xf4e   :  { %7302 = vsyncpa [#allocation3 + $0x1], 1 }
 0xf4f   :  { %7303 = vsyncpa [#allocation6], 1 }
 0xf50   :  { %7305 = vsyncpa [#allocation6 + $0x1], 1 }
 0xf51   :  { %7306 = vsyncpa [#allocation9], 1 }
 0xf52   :  { %7307 = vsyncpa [#allocation4], 1 }
 0xf53   :  { %7309 = vsyncpa [#allocation4 + $0x1], 1 }

</bundles_post_ra>
